<compile_context>
chip_gen: v7x
topology: tpu7x:2x2x1
jax: 0.10.0
libtpu: 0.0.40
codegen_flags: <defaults>
</compile_context>

<pallas_src>
import functools

import jax
import jax.numpy as jnp
from jax.experimental import pallas as pl
from jax.experimental.pallas import tpu as pltpu

NEG_SLOPE = 0.2
EPS = 1e-5


def _leaky_relu(x):
    return jnp.where(x > 0, x, NEG_SLOPE * x)


def convmg_embedder_kernel(a_ref, x_ref, w_ref, p_ref, out_ref, *,
                           layers_num, bt, n, f):
    """One grid step == Bt graphs of the batched graph."""
    a = a_ref[0]                            # (Bt*N, Bt*N) bf16 block-diag normalized adj
    h = x_ref[...]                          # (Bt, N, F) f32

    for l in range(layers_num):             # static unroll over the 3 layers
        # --- GraphConv(norm='both', bias=False):  (D^{-1/2} A D^{-1/2}) H W ---
        # One dense MXU matmul for the aggregation (block-diag packs all Bt graphs),
        # one (Bt*N, F) @ (F, F) GEMM for the weights.  bf16 inputs, f32 accumulation.
        h2d = h.reshape(bt * n, f)
        agg = jnp.dot(a, h2d.astype(jnp.bfloat16),
                      preferred_element_type=jnp.float32)        # (Bt*N, F) f32
        h2d = jnp.dot(agg.astype(jnp.bfloat16), w_ref[l],
                      preferred_element_type=jnp.float32)        # (Bt*N, F) f32
        h = h2d.reshape(bt, n, f)

        # --- UnitedNormCommon (approx, see TODO): single-pass fused statistics ---
        hh = h * h
        mu_n = jnp.mean(h, axis=2, keepdims=True)                # (Bt, N, 1) node-wise
        var_n = jnp.maximum(jnp.mean(hh, axis=2, keepdims=True) - mu_n * mu_n, 0.0)
        mu_g = jnp.mean(h, axis=1, keepdims=True)                # (Bt, 1, F) graph-wise
        var_g = jnp.maximum(jnp.mean(hh, axis=1, keepdims=True) - mu_g * mu_g, 0.0)
        h_node = (h - mu_n) * jax.lax.rsqrt(var_n + EPS)
        h_graph = (h - mu_g) * jax.lax.rsqrt(var_g + EPS)

        p = p_ref[l]                        # (4, F): [gamma*w_id, gamma*w_node, gamma*w_graph, beta]
        h = p[0:1, :] * h + p[1:2, :] * h_node + p[2:3, :] * h_graph + p[3:4, :]

        # --- LeakyReLU + Dropout(p=0) ---
        h = _leaky_relu(h)

    # --- readout (dgl.mean_nodes) of the LAST layer, then final LeakyReLU ---
    emb = jnp.mean(h, axis=1)               # (Bt, F) slab per step
    out_ref[...] = _leaky_relu(emb).astype(out_ref.dtype)


def convmg_embedder(adj, node_feats, weights, lambdas_softmax, gamma, beta, *,
                    graphs_per_step=8):
    """adj:(B,N,N) raw adjacency with self-loops, node_feats:(B,N,F),
       weights:(L,F,F), lambdas_softmax:(L,3), gamma/beta:(L,F)  ->  (B,F)."""
    B, N, _ = adj.shape
    F = node_feats.shape[-1]
    L = weights.shape[0]

    # Bt graphs per grid step; pad the batch so it divides evenly (padded graphs are
    # fully independent — per-graph stats & readout — and sliced off below).
    bt = min(graphs_per_step, B)
    b_pad = pl.cdiv(B, bt) * bt
    pad = b_pad - B
    if pad:
        adj = jnp.pad(adj, ((0, pad), (0, 0), (0, 0)))
        node_feats = jnp.pad(node_feats, ((0, pad), (0, 0), (0, 0)))
    steps = b_pad // bt

    # DGL GraphConv norm='both' symmetric normalization, folded into the adjacency once
    # (graph-structure preprocessing, computed a single time and reused by all layers).
    deg = jnp.sum(adj, axis=-1)                                   # (b_pad, N)
    d_inv_sqrt = jax.lax.rsqrt(jnp.maximum(deg, 1.0))             # DGL clamps degree to >= 1
    a_norm = adj * d_inv_sqrt[:, :, None] * d_inv_sqrt[:, None, :]

    # Pack the Bt graphs of each grid step into ONE block-diagonal (Bt*N, Bt*N) operator
    # so the in-kernel aggregation is a single dense MXU matmul (Bt*N = 128 rows).
    a_r = a_norm.reshape(steps, bt, N, N)
    eye_bt = jnp.eye(bt, dtype=a_norm.dtype)
    a_bd = a_r[:, :, None, :, :] * eye_bt[None, :, :, None, None]   # (steps, bt, bt, N, N)
    a_bd = a_bd.transpose(0, 1, 3, 2, 4).reshape(steps, bt * N, bt * N)
    a_bd = a_bd.astype(jnp.bfloat16)

    # Fold gamma into the softmaxed norm-mixing weights (saves one (N,F) multiply / layer).
    g_id = gamma * lambdas_softmax[:, 0:1]
    g_node = gamma * lambdas_softmax[:, 1:2]
    g_graph = gamma * lambdas_softmax[:, 2:3]
    params = jnp.stack([g_id, g_node, g_graph, beta], axis=1).astype(jnp.float32)  # (L, 4, F)

    kernel = functools.partial(convmg_embedder_kernel, layers_num=L, bt=bt, n=N, f=F)

    out = pl.pallas_call(
        kernel,
        out_shape=jax.ShapeDtypeStruct((b_pad, F), jnp.float32),
        grid=(steps,),
        in_specs=[
            pl.BlockSpec((1, bt * N, bt * N), lambda b: (b, 0, 0)),  # block-diag norm adj (bf16)
            pl.BlockSpec((bt, N, F), lambda b: (b, 0, 0)),           # node features (f32)
            pl.BlockSpec((L, F, F), lambda b: (0, 0, 0)),            # stacked GraphConv weights (bf16)
            pl.BlockSpec((L, 4, F), lambda b: (0, 0, 0)),            # fused norm params (f32)
        ],
        out_specs=pl.BlockSpec((bt, F), lambda b: (b, 0)),
        compiler_params=pltpu.CompilerParams(
            dimension_semantics=("parallel",),
            vmem_limit_bytes=32 * 1024 * 1024),                      # safe on v5e/v6e/v7x
    )(a_bd, node_feats.astype(jnp.float32), weights.astype(jnp.bfloat16), params)

    return out[:B]


if __name__ == "__main__":
    # 16 graphs, 16 nodes each, feat_in_channels=32, 3 layers; Bt=8 -> Bt*N=128 GEMM rows,
    # grid length 2 (keeps both v7x TensorCores busy).
    B, N, F, L = 16, 16, 32, 3

    key = jax.random.PRNGKey(0)
    k_adj, k_x, k_w, k_lam = jax.random.split(key, 4)

    # deterministic synthetic batched mesh graph: random symmetric adjacency + self loops
    raw = jax.random.uniform(k_adj, (B, N, N))
    adj = (raw + jnp.swapaxes(raw, 1, 2) > 1.0).astype(jnp.float32)
    adj = jnp.maximum(adj, jnp.eye(N)[None, :, :])               # ensure nonzero degree

    node_feats = jax.random.normal(k_x, (B, N, F), dtype=jnp.float32)

    # deterministic parameter init (synthetic, no checkpoint)
    weights = jax.random.normal(k_w, (L, F, F), dtype=jnp.float32) / jnp.sqrt(F)
    lambdas = 0.1 * jax.random.normal(k_lam, (L, 3), dtype=jnp.float32)
    lambdas_softmax = jax.nn.softmax(lambdas, axis=-1)
    gamma = jnp.ones((L, F), dtype=jnp.float32)
    beta = jnp.zeros((L, F), dtype=jnp.float32)

    out = convmg_embedder(adj, node_feats, weights, lambdas_softmax, gamma, beta,
                          graphs_per_step=8)
    out = jax.block_until_ready(out)
    assert out.shape == (B, F)
    assert bool(jnp.all(jnp.isfinite(out)))
    print("KERNEL_OK")
</pallas_src>

<mosaic_0001>
module attributes {stable_mosaic.version = 11 : i64} {
  func.func @convmg_embedder_kernel(%arg0: i32, %arg1: memref<1x128x128xbf16, #tpu.memory_space<vmem>>, %arg2: memref<8x16x32xf32, #tpu.memory_space<vmem>>, %arg3: memref<3x32x32xbf16, #tpu.memory_space<vmem>>, %arg4: memref<3x4x32xf32, #tpu.memory_space<vmem>>, %arg5: memref<8x32xf32, #tpu.memory_space<vmem>>) attributes {dimension_semantics = [#tpu.dimension_semantics<parallel>], iteration_bounds = array<i64: 2>, scalar_prefetch = 0 : i64, scratch_operands = 0 : i64, tpu.core_type = #tpu.core_type<tc>, window_params = [{transform_indices = @transform_0, window_bounds = array<i64: 1, 128, 128>}, {transform_indices = @transform_1, window_bounds = array<i64: 8, 16, 32>}, {pipeline_mode = #tpu.pipeline_mode<synchronous>, transform_indices = @transform_2, window_bounds = array<i64: 3, 32, 32>}, {pipeline_mode = #tpu.pipeline_mode<synchronous>, transform_indices = @transform_3, window_bounds = array<i64: 3, 4, 32>}, {transform_indices = @transform_4, window_bounds = array<i64: 8, 32>}]} {
    %c0 = arith.constant 0 : index
    %c0_0 = arith.constant 0 : index
    %c0_1 = arith.constant 0 : index
    %0 = vector.load %arg1[%c0, %c0_0, %c0_1] : memref<1x128x128xbf16, #tpu.memory_space<vmem>>, vector<1x128x128xbf16>
    %1 = vector.shape_cast %0 : vector<1x128x128xbf16> to vector<128x128xbf16>
    %c0_2 = arith.constant 0 : index
    %c0_3 = arith.constant 0 : index
    %c0_4 = arith.constant 0 : index
    %2 = vector.load %arg2[%c0_2, %c0_3, %c0_4] : memref<8x16x32xf32, #tpu.memory_space<vmem>>, vector<8x16x32xf32>
    %3 = vector.shape_cast %2 : vector<8x16x32xf32> to vector<128x32xf32>
    %4 = arith.truncf %3 : vector<128x32xf32> to vector<128x32xbf16>
    %cst = arith.constant dense<0.000000e+00> : vector<128x32xf32>
    %5 = tpu.matmul %1, %4, %cst {dimension_numbers = #tpu.dot_dimension_numbers<[1], [0], [0], [1], [0, 0, 1, 1], [], []>} : vector<128x128xbf16>, vector<128x32xbf16>, vector<128x32xf32> -> vector<128x32xf32>
    %6 = arith.truncf %5 : vector<128x32xf32> to vector<128x32xbf16>
    %c0_5 = arith.constant 0 : index
    %c0_6 = arith.constant 0 : index
    %c0_7 = arith.constant 0 : index
    %7 = vector.load %arg3[%c0_5, %c0_6, %c0_7] : memref<3x32x32xbf16, #tpu.memory_space<vmem>>, vector<1x32x32xbf16>
    %8 = vector.shape_cast %7 : vector<1x32x32xbf16> to vector<32x32xbf16>
    %cst_8 = arith.constant dense<0.000000e+00> : vector<128x32xf32>
    %9 = tpu.matmul %6, %8, %cst_8 {dimension_numbers = #tpu.dot_dimension_numbers<[1], [0], [0], [1], [0, 0, 1, 1], [], []>} : vector<128x32xbf16>, vector<32x32xbf16>, vector<128x32xf32> -> vector<128x32xf32>
    %10 = vector.shape_cast %9 : vector<128x32xf32> to vector<8x16x32xf32>
    %11 = arith.mulf %10, %10 : vector<8x16x32xf32>
    %cst_9 = arith.constant dense<0.000000e+00> : vector<8x16xf32>
    %12 = vector.multi_reduction <add>, %10, %cst_9 [2] : vector<8x16x32xf32> to vector<8x16xf32>
    %13 = vector.shape_cast %12 : vector<8x16xf32> to vector<8x16x1xf32>
    %cst_10 = arith.constant 3.200000e+01 : f32
    %14 = vector.broadcast %cst_10 : f32 to vector<8x16x1xf32>
    %15 = arith.divf %13, %14 : vector<8x16x1xf32>
    %cst_11 = arith.constant dense<0.000000e+00> : vector<8x16xf32>
    %16 = vector.multi_reduction <add>, %11, %cst_11 [2] : vector<8x16x32xf32> to vector<8x16xf32>
    %17 = vector.shape_cast %16 : vector<8x16xf32> to vector<8x16x1xf32>
    %cst_12 = arith.constant 3.200000e+01 : f32
    %18 = vector.broadcast %cst_12 : f32 to vector<8x16x1xf32>
    %19 = arith.divf %17, %18 : vector<8x16x1xf32>
    %20 = arith.mulf %15, %15 : vector<8x16x1xf32>
    %21 = arith.subf %19, %20 : vector<8x16x1xf32>
    %cst_13 = arith.constant 0.000000e+00 : f32
    %22 = vector.broadcast %cst_13 : f32 to vector<8x16x1xf32>
    %23 = arith.maximumf %21, %22 : vector<8x16x1xf32>
    %cst_14 = arith.constant dense<0.000000e+00> : vector<8x32xf32>
    %24 = vector.multi_reduction <add>, %10, %cst_14 [1] : vector<8x16x32xf32> to vector<8x32xf32>
    %25 = vector.shape_cast %24 : vector<8x32xf32> to vector<8x1x32xf32>
    %cst_15 = arith.constant 1.600000e+01 : f32
    %26 = vector.broadcast %cst_15 : f32 to vector<8x1x32xf32>
    %27 = arith.divf %25, %26 : vector<8x1x32xf32>
    %cst_16 = arith.constant dense<0.000000e+00> : vector<8x32xf32>
    %28 = vector.multi_reduction <add>, %11, %cst_16 [1] : vector<8x16x32xf32> to vector<8x32xf32>
    %29 = vector.shape_cast %28 : vector<8x32xf32> to vector<8x1x32xf32>
    %cst_17 = arith.constant 1.600000e+01 : f32
    %30 = vector.broadcast %cst_17 : f32 to vector<8x1x32xf32>
    %31 = arith.divf %29, %30 : vector<8x1x32xf32>
    %32 = arith.mulf %27, %27 : vector<8x1x32xf32>
    %33 = arith.subf %31, %32 : vector<8x1x32xf32>
    %cst_18 = arith.constant 0.000000e+00 : f32
    %34 = vector.broadcast %cst_18 : f32 to vector<8x1x32xf32>
    %35 = arith.maximumf %33, %34 : vector<8x1x32xf32>
    %36 = vector.broadcast %15 : vector<8x16x1xf32> to vector<8x16x32xf32>
    %37 = arith.subf %10, %36 : vector<8x16x32xf32>
    %cst_19 = arith.constant 9.99999974E-6 : f32
    %38 = vector.broadcast %cst_19 : f32 to vector<8x16x1xf32>
    %39 = arith.addf %23, %38 : vector<8x16x1xf32>
    %40 = math.rsqrt %39 : vector<8x16x1xf32>
    %41 = vector.broadcast %40 : vector<8x16x1xf32> to vector<8x16x32xf32>
    %42 = arith.mulf %37, %41 : vector<8x16x32xf32>
    %43 = vector.broadcast %27 : vector<8x1x32xf32> to vector<8x16x32xf32>
    %44 = arith.subf %10, %43 : vector<8x16x32xf32>
    %cst_20 = arith.constant 9.99999974E-6 : f32
    %45 = vector.broadcast %cst_20 : f32 to vector<8x1x32xf32>
    %46 = arith.addf %35, %45 : vector<8x1x32xf32>
    %47 = math.rsqrt %46 : vector<8x1x32xf32>
    %48 = vector.broadcast %47 : vector<8x1x32xf32> to vector<8x16x32xf32>
    %49 = arith.mulf %44, %48 : vector<8x16x32xf32>
    %c0_21 = arith.constant 0 : index
    %c0_22 = arith.constant 0 : index
    %c0_23 = arith.constant 0 : index
    %50 = vector.load %arg4[%c0_21, %c0_22, %c0_23] : memref<3x4x32xf32, #tpu.memory_space<vmem>>, vector<1x4x32xf32>
    %51 = vector.shape_cast %50 : vector<1x4x32xf32> to vector<4x32xf32>
    %52 = vector.extract_strided_slice %51 {offsets = [0, 0], sizes = [1, 32], strides = [1, 1]} : vector<4x32xf32> to vector<1x32xf32>
    %53 = vector.shape_cast %52 : vector<1x32xf32> to vector<1x1x32xf32>
    %54 = vector.broadcast %53 : vector<1x1x32xf32> to vector<8x16x32xf32>
    %55 = arith.mulf %54, %10 : vector<8x16x32xf32>
    %56 = vector.extract_strided_slice %51 {offsets = [1, 0], sizes = [1, 32], strides = [1, 1]} : vector<4x32xf32> to vector<1x32xf32>
    %57 = vector.shape_cast %56 : vector<1x32xf32> to vector<1x1x32xf32>
    %58 = vector.broadcast %57 : vector<1x1x32xf32> to vector<8x16x32xf32>
    %59 = arith.mulf %58, %42 : vector<8x16x32xf32>
    %60 = arith.addf %55, %59 : vector<8x16x32xf32>
    %61 = vector.extract_strided_slice %51 {offsets = [2, 0], sizes = [1, 32], strides = [1, 1]} : vector<4x32xf32> to vector<1x32xf32>
    %62 = vector.shape_cast %61 : vector<1x32xf32> to vector<1x1x32xf32>
    %63 = vector.broadcast %62 : vector<1x1x32xf32> to vector<8x16x32xf32>
    %64 = arith.mulf %63, %49 : vector<8x16x32xf32>
    %65 = arith.addf %60, %64 : vector<8x16x32xf32>
    %66 = vector.extract_strided_slice %51 {offsets = [3, 0], sizes = [1, 32], strides = [1, 1]} : vector<4x32xf32> to vector<1x32xf32>
    %67 = vector.shape_cast %66 : vector<1x32xf32> to vector<1x1x32xf32>
    %68 = vector.broadcast %67 : vector<1x1x32xf32> to vector<8x16x32xf32>
    %69 = arith.addf %65, %68 : vector<8x16x32xf32>
    %cst_24 = arith.constant 0.000000e+00 : f32
    %70 = vector.broadcast %cst_24 : f32 to vector<8x16x32xf32>
    %71 = arith.cmpf ogt, %69, %70 : vector<8x16x32xf32>
    %cst_25 = arith.constant 2.000000e-01 : f32
    %72 = vector.broadcast %cst_25 : f32 to vector<8x16x32xf32>
    %73 = arith.mulf %72, %69 : vector<8x16x32xf32>
    %74 = arith.select %71, %69, %73 : vector<8x16x32xi1>, vector<8x16x32xf32>
    %75 = vector.shape_cast %74 : vector<8x16x32xf32> to vector<128x32xf32>
    %76 = arith.truncf %75 : vector<128x32xf32> to vector<128x32xbf16>
    %cst_26 = arith.constant dense<0.000000e+00> : vector<128x32xf32>
    %77 = tpu.matmul %1, %76, %cst_26 {dimension_numbers = #tpu.dot_dimension_numbers<[1], [0], [0], [1], [0, 0, 1, 1], [], []>} : vector<128x128xbf16>, vector<128x32xbf16>, vector<128x32xf32> -> vector<128x32xf32>
    %78 = arith.truncf %77 : vector<128x32xf32> to vector<128x32xbf16>
    %c1 = arith.constant 1 : index
    %c0_27 = arith.constant 0 : index
    %c0_28 = arith.constant 0 : index
    %79 = vector.load %arg3[%c1, %c0_27, %c0_28] : memref<3x32x32xbf16, #tpu.memory_space<vmem>>, vector<1x32x32xbf16>
    %80 = vector.shape_cast %79 : vector<1x32x32xbf16> to vector<32x32xbf16>
    %cst_29 = arith.constant dense<0.000000e+00> : vector<128x32xf32>
    %81 = tpu.matmul %78, %80, %cst_29 {dimension_numbers = #tpu.dot_dimension_numbers<[1], [0], [0], [1], [0, 0, 1, 1], [], []>} : vector<128x32xbf16>, vector<32x32xbf16>, vector<128x32xf32> -> vector<128x32xf32>
    %82 = vector.shape_cast %81 : vector<128x32xf32> to vector<8x16x32xf32>
    %83 = arith.mulf %82, %82 : vector<8x16x32xf32>
    %cst_30 = arith.constant dense<0.000000e+00> : vector<8x16xf32>
    %84 = vector.multi_reduction <add>, %82, %cst_30 [2] : vector<8x16x32xf32> to vector<8x16xf32>
    %85 = vector.shape_cast %84 : vector<8x16xf32> to vector<8x16x1xf32>
    %cst_31 = arith.constant 3.200000e+01 : f32
    %86 = vector.broadcast %cst_31 : f32 to vector<8x16x1xf32>
    %87 = arith.divf %85, %86 : vector<8x16x1xf32>
    %cst_32 = arith.constant dense<0.000000e+00> : vector<8x16xf32>
    %88 = vector.multi_reduction <add>, %83, %cst_32 [2] : vector<8x16x32xf32> to vector<8x16xf32>
    %89 = vector.shape_cast %88 : vector<8x16xf32> to vector<8x16x1xf32>
    %cst_33 = arith.constant 3.200000e+01 : f32
    %90 = vector.broadcast %cst_33 : f32 to vector<8x16x1xf32>
    %91 = arith.divf %89, %90 : vector<8x16x1xf32>
    %92 = arith.mulf %87, %87 : vector<8x16x1xf32>
    %93 = arith.subf %91, %92 : vector<8x16x1xf32>
    %cst_34 = arith.constant 0.000000e+00 : f32
    %94 = vector.broadcast %cst_34 : f32 to vector<8x16x1xf32>
    %95 = arith.maximumf %93, %94 : vector<8x16x1xf32>
    %cst_35 = arith.constant dense<0.000000e+00> : vector<8x32xf32>
    %96 = vector.multi_reduction <add>, %82, %cst_35 [1] : vector<8x16x32xf32> to vector<8x32xf32>
    %97 = vector.shape_cast %96 : vector<8x32xf32> to vector<8x1x32xf32>
    %cst_36 = arith.constant 1.600000e+01 : f32
    %98 = vector.broadcast %cst_36 : f32 to vector<8x1x32xf32>
    %99 = arith.divf %97, %98 : vector<8x1x32xf32>
    %cst_37 = arith.constant dense<0.000000e+00> : vector<8x32xf32>
    %100 = vector.multi_reduction <add>, %83, %cst_37 [1] : vector<8x16x32xf32> to vector<8x32xf32>
    %101 = vector.shape_cast %100 : vector<8x32xf32> to vector<8x1x32xf32>
    %cst_38 = arith.constant 1.600000e+01 : f32
    %102 = vector.broadcast %cst_38 : f32 to vector<8x1x32xf32>
    %103 = arith.divf %101, %102 : vector<8x1x32xf32>
    %104 = arith.mulf %99, %99 : vector<8x1x32xf32>
    %105 = arith.subf %103, %104 : vector<8x1x32xf32>
    %cst_39 = arith.constant 0.000000e+00 : f32
    %106 = vector.broadcast %cst_39 : f32 to vector<8x1x32xf32>
    %107 = arith.maximumf %105, %106 : vector<8x1x32xf32>
    %108 = vector.broadcast %87 : vector<8x16x1xf32> to vector<8x16x32xf32>
    %109 = arith.subf %82, %108 : vector<8x16x32xf32>
    %cst_40 = arith.constant 9.99999974E-6 : f32
    %110 = vector.broadcast %cst_40 : f32 to vector<8x16x1xf32>
    %111 = arith.addf %95, %110 : vector<8x16x1xf32>
    %112 = math.rsqrt %111 : vector<8x16x1xf32>
    %113 = vector.broadcast %112 : vector<8x16x1xf32> to vector<8x16x32xf32>
    %114 = arith.mulf %109, %113 : vector<8x16x32xf32>
    %115 = vector.broadcast %99 : vector<8x1x32xf32> to vector<8x16x32xf32>
    %116 = arith.subf %82, %115 : vector<8x16x32xf32>
    %cst_41 = arith.constant 9.99999974E-6 : f32
    %117 = vector.broadcast %cst_41 : f32 to vector<8x1x32xf32>
    %118 = arith.addf %107, %117 : vector<8x1x32xf32>
    %119 = math.rsqrt %118 : vector<8x1x32xf32>
    %120 = vector.broadcast %119 : vector<8x1x32xf32> to vector<8x16x32xf32>
    %121 = arith.mulf %116, %120 : vector<8x16x32xf32>
    %c1_42 = arith.constant 1 : index
    %c0_43 = arith.constant 0 : index
    %c0_44 = arith.constant 0 : index
    %122 = vector.load %arg4[%c1_42, %c0_43, %c0_44] : memref<3x4x32xf32, #tpu.memory_space<vmem>>, vector<1x4x32xf32>
    %123 = vector.shape_cast %122 : vector<1x4x32xf32> to vector<4x32xf32>
    %124 = vector.extract_strided_slice %123 {offsets = [0, 0], sizes = [1, 32], strides = [1, 1]} : vector<4x32xf32> to vector<1x32xf32>
    %125 = vector.shape_cast %124 : vector<1x32xf32> to vector<1x1x32xf32>
    %126 = vector.broadcast %125 : vector<1x1x32xf32> to vector<8x16x32xf32>
    %127 = arith.mulf %126, %82 : vector<8x16x32xf32>
    %128 = vector.extract_strided_slice %123 {offsets = [1, 0], sizes = [1, 32], strides = [1, 1]} : vector<4x32xf32> to vector<1x32xf32>
    %129 = vector.shape_cast %128 : vector<1x32xf32> to vector<1x1x32xf32>
    %130 = vector.broadcast %129 : vector<1x1x32xf32> to vector<8x16x32xf32>
    %131 = arith.mulf %130, %114 : vector<8x16x32xf32>
    %132 = arith.addf %127, %131 : vector<8x16x32xf32>
    %133 = vector.extract_strided_slice %123 {offsets = [2, 0], sizes = [1, 32], strides = [1, 1]} : vector<4x32xf32> to vector<1x32xf32>
    %134 = vector.shape_cast %133 : vector<1x32xf32> to vector<1x1x32xf32>
    %135 = vector.broadcast %134 : vector<1x1x32xf32> to vector<8x16x32xf32>
    %136 = arith.mulf %135, %121 : vector<8x16x32xf32>
    %137 = arith.addf %132, %136 : vector<8x16x32xf32>
    %138 = vector.extract_strided_slice %123 {offsets = [3, 0], sizes = [1, 32], strides = [1, 1]} : vector<4x32xf32> to vector<1x32xf32>
    %139 = vector.shape_cast %138 : vector<1x32xf32> to vector<1x1x32xf32>
    %140 = vector.broadcast %139 : vector<1x1x32xf32> to vector<8x16x32xf32>
    %141 = arith.addf %137, %140 : vector<8x16x32xf32>
    %cst_45 = arith.constant 0.000000e+00 : f32
    %142 = vector.broadcast %cst_45 : f32 to vector<8x16x32xf32>
    %143 = arith.cmpf ogt, %141, %142 : vector<8x16x32xf32>
    %cst_46 = arith.constant 2.000000e-01 : f32
    %144 = vector.broadcast %cst_46 : f32 to vector<8x16x32xf32>
    %145 = arith.mulf %144, %141 : vector<8x16x32xf32>
    %146 = arith.select %143, %141, %145 : vector<8x16x32xi1>, vector<8x16x32xf32>
    %147 = vector.shape_cast %146 : vector<8x16x32xf32> to vector<128x32xf32>
    %148 = arith.truncf %147 : vector<128x32xf32> to vector<128x32xbf16>
    %cst_47 = arith.constant dense<0.000000e+00> : vector<128x32xf32>
    %149 = tpu.matmul %1, %148, %cst_47 {dimension_numbers = #tpu.dot_dimension_numbers<[1], [0], [0], [1], [0, 0, 1, 1], [], []>} : vector<128x128xbf16>, vector<128x32xbf16>, vector<128x32xf32> -> vector<128x32xf32>
    %150 = arith.truncf %149 : vector<128x32xf32> to vector<128x32xbf16>
    %c2 = arith.constant 2 : index
    %c0_48 = arith.constant 0 : index
    %c0_49 = arith.constant 0 : index
    %151 = vector.load %arg3[%c2, %c0_48, %c0_49] : memref<3x32x32xbf16, #tpu.memory_space<vmem>>, vector<1x32x32xbf16>
    %152 = vector.shape_cast %151 : vector<1x32x32xbf16> to vector<32x32xbf16>
    %cst_50 = arith.constant dense<0.000000e+00> : vector<128x32xf32>
    %153 = tpu.matmul %150, %152, %cst_50 {dimension_numbers = #tpu.dot_dimension_numbers<[1], [0], [0], [1], [0, 0, 1, 1], [], []>} : vector<128x32xbf16>, vector<32x32xbf16>, vector<128x32xf32> -> vector<128x32xf32>
    %154 = vector.shape_cast %153 : vector<128x32xf32> to vector<8x16x32xf32>
    %155 = arith.mulf %154, %154 : vector<8x16x32xf32>
    %cst_51 = arith.constant dense<0.000000e+00> : vector<8x16xf32>
    %156 = vector.multi_reduction <add>, %154, %cst_51 [2] : vector<8x16x32xf32> to vector<8x16xf32>
    %157 = vector.shape_cast %156 : vector<8x16xf32> to vector<8x16x1xf32>
    %cst_52 = arith.constant 3.200000e+01 : f32
    %158 = vector.broadcast %cst_52 : f32 to vector<8x16x1xf32>
    %159 = arith.divf %157, %158 : vector<8x16x1xf32>
    %cst_53 = arith.constant dense<0.000000e+00> : vector<8x16xf32>
    %160 = vector.multi_reduction <add>, %155, %cst_53 [2] : vector<8x16x32xf32> to vector<8x16xf32>
    %161 = vector.shape_cast %160 : vector<8x16xf32> to vector<8x16x1xf32>
    %cst_54 = arith.constant 3.200000e+01 : f32
    %162 = vector.broadcast %cst_54 : f32 to vector<8x16x1xf32>
    %163 = arith.divf %161, %162 : vector<8x16x1xf32>
    %164 = arith.mulf %159, %159 : vector<8x16x1xf32>
    %165 = arith.subf %163, %164 : vector<8x16x1xf32>
    %cst_55 = arith.constant 0.000000e+00 : f32
    %166 = vector.broadcast %cst_55 : f32 to vector<8x16x1xf32>
    %167 = arith.maximumf %165, %166 : vector<8x16x1xf32>
    %cst_56 = arith.constant dense<0.000000e+00> : vector<8x32xf32>
    %168 = vector.multi_reduction <add>, %154, %cst_56 [1] : vector<8x16x32xf32> to vector<8x32xf32>
    %169 = vector.shape_cast %168 : vector<8x32xf32> to vector<8x1x32xf32>
    %cst_57 = arith.constant 1.600000e+01 : f32
    %170 = vector.broadcast %cst_57 : f32 to vector<8x1x32xf32>
    %171 = arith.divf %169, %170 : vector<8x1x32xf32>
    %cst_58 = arith.constant dense<0.000000e+00> : vector<8x32xf32>
    %172 = vector.multi_reduction <add>, %155, %cst_58 [1] : vector<8x16x32xf32> to vector<8x32xf32>
    %173 = vector.shape_cast %172 : vector<8x32xf32> to vector<8x1x32xf32>
    %cst_59 = arith.constant 1.600000e+01 : f32
    %174 = vector.broadcast %cst_59 : f32 to vector<8x1x32xf32>
    %175 = arith.divf %173, %174 : vector<8x1x32xf32>
    %176 = arith.mulf %171, %171 : vector<8x1x32xf32>
    %177 = arith.subf %175, %176 : vector<8x1x32xf32>
    %cst_60 = arith.constant 0.000000e+00 : f32
    %178 = vector.broadcast %cst_60 : f32 to vector<8x1x32xf32>
    %179 = arith.maximumf %177, %178 : vector<8x1x32xf32>
    %180 = vector.broadcast %159 : vector<8x16x1xf32> to vector<8x16x32xf32>
    %181 = arith.subf %154, %180 : vector<8x16x32xf32>
    %cst_61 = arith.constant 9.99999974E-6 : f32
    %182 = vector.broadcast %cst_61 : f32 to vector<8x16x1xf32>
    %183 = arith.addf %167, %182 : vector<8x16x1xf32>
    %184 = math.rsqrt %183 : vector<8x16x1xf32>
    %185 = vector.broadcast %184 : vector<8x16x1xf32> to vector<8x16x32xf32>
    %186 = arith.mulf %181, %185 : vector<8x16x32xf32>
    %187 = vector.broadcast %171 : vector<8x1x32xf32> to vector<8x16x32xf32>
    %188 = arith.subf %154, %187 : vector<8x16x32xf32>
    %cst_62 = arith.constant 9.99999974E-6 : f32
    %189 = vector.broadcast %cst_62 : f32 to vector<8x1x32xf32>
    %190 = arith.addf %179, %189 : vector<8x1x32xf32>
    %191 = math.rsqrt %190 : vector<8x1x32xf32>
    %192 = vector.broadcast %191 : vector<8x1x32xf32> to vector<8x16x32xf32>
    %193 = arith.mulf %188, %192 : vector<8x16x32xf32>
    %c2_63 = arith.constant 2 : index
    %c0_64 = arith.constant 0 : index
    %c0_65 = arith.constant 0 : index
    %194 = vector.load %arg4[%c2_63, %c0_64, %c0_65] : memref<3x4x32xf32, #tpu.memory_space<vmem>>, vector<1x4x32xf32>
    %195 = vector.shape_cast %194 : vector<1x4x32xf32> to vector<4x32xf32>
    %196 = vector.extract_strided_slice %195 {offsets = [0, 0], sizes = [1, 32], strides = [1, 1]} : vector<4x32xf32> to vector<1x32xf32>
    %197 = vector.shape_cast %196 : vector<1x32xf32> to vector<1x1x32xf32>
    %198 = vector.broadcast %197 : vector<1x1x32xf32> to vector<8x16x32xf32>
    %199 = arith.mulf %198, %154 : vector<8x16x32xf32>
    %200 = vector.extract_strided_slice %195 {offsets = [1, 0], sizes = [1, 32], strides = [1, 1]} : vector<4x32xf32> to vector<1x32xf32>
    %201 = vector.shape_cast %200 : vector<1x32xf32> to vector<1x1x32xf32>
    %202 = vector.broadcast %201 : vector<1x1x32xf32> to vector<8x16x32xf32>
    %203 = arith.mulf %202, %186 : vector<8x16x32xf32>
    %204 = arith.addf %199, %203 : vector<8x16x32xf32>
    %205 = vector.extract_strided_slice %195 {offsets = [2, 0], sizes = [1, 32], strides = [1, 1]} : vector<4x32xf32> to vector<1x32xf32>
    %206 = vector.shape_cast %205 : vector<1x32xf32> to vector<1x1x32xf32>
    %207 = vector.broadcast %206 : vector<1x1x32xf32> to vector<8x16x32xf32>
    %208 = arith.mulf %207, %193 : vector<8x16x32xf32>
    %209 = arith.addf %204, %208 : vector<8x16x32xf32>
    %210 = vector.extract_strided_slice %195 {offsets = [3, 0], sizes = [1, 32], strides = [1, 1]} : vector<4x32xf32> to vector<1x32xf32>
    %211 = vector.shape_cast %210 : vector<1x32xf32> to vector<1x1x32xf32>
    %212 = vector.broadcast %211 : vector<1x1x32xf32> to vector<8x16x32xf32>
    %213 = arith.addf %209, %212 : vector<8x16x32xf32>
    %cst_66 = arith.constant 0.000000e+00 : f32
    %214 = vector.broadcast %cst_66 : f32 to vector<8x16x32xf32>
    %215 = arith.cmpf ogt, %213, %214 : vector<8x16x32xf32>
    %cst_67 = arith.constant 2.000000e-01 : f32
    %216 = vector.broadcast %cst_67 : f32 to vector<8x16x32xf32>
    %217 = arith.mulf %216, %213 : vector<8x16x32xf32>
    %218 = arith.select %215, %213, %217 : vector<8x16x32xi1>, vector<8x16x32xf32>
    %cst_68 = arith.constant dense<0.000000e+00> : vector<8x32xf32>
    %219 = vector.multi_reduction <add>, %218, %cst_68 [1] : vector<8x16x32xf32> to vector<8x32xf32>
    %cst_69 = arith.constant 1.600000e+01 : f32
    %220 = vector.broadcast %cst_69 : f32 to vector<8x32xf32>
    %221 = arith.divf %219, %220 : vector<8x32xf32>
    %cst_70 = arith.constant 0.000000e+00 : f32
    %222 = vector.broadcast %cst_70 : f32 to vector<8x32xf32>
    %223 = arith.cmpf ogt, %221, %222 : vector<8x32xf32>
    %cst_71 = arith.constant 2.000000e-01 : f32
    %224 = vector.broadcast %cst_71 : f32 to vector<8x32xf32>
    %225 = arith.mulf %224, %221 : vector<8x32xf32>
    %226 = arith.select %223, %221, %225 : vector<8x32xi1>, vector<8x32xf32>
    %c0_72 = arith.constant 0 : index
    %c0_73 = arith.constant 0 : index
    %227 = vector.load %arg5[%c0_72, %c0_73] : memref<8x32xf32, #tpu.memory_space<vmem>>, vector<8x32xf32>
    tpu.vector_store %arg5[%c0_72, %c0_73], %226 {strides = array<i32>} : memref<8x32xf32, #tpu.memory_space<vmem>>, vector<8x32xf32>,
    return
  }
  func.func @transform_0(%arg0: i32) -> (i32, i32, i32) {
    %c0_i32 = arith.constant 0 : i32
    %c0_i32_0 = arith.constant 0 : i32
    %c0_i32_1 = arith.constant 0 : i32
    return %arg0, %c0_i32, %c0_i32_0 : i32, i32, i32
  }
  func.func @transform_1(%arg0: i32) -> (i32, i32, i32) {
    %c0_i32 = arith.constant 0 : i32
    %c0_i32_0 = arith.constant 0 : i32
    %c0_i32_1 = arith.constant 0 : i32
    return %arg0, %c0_i32, %c0_i32_0 : i32, i32, i32
  }
  func.func @transform_2(%arg0: i32) -> (i32, i32, i32) {
    %c0_i32 = arith.constant 0 : i32
    %c0_i32_0 = arith.constant 0 : i32
    %c0_i32_1 = arith.constant 0 : i32
    %c0_i32_2 = arith.constant 0 : i32
    return %c0_i32, %c0_i32_0, %c0_i32_1 : i32, i32, i32
  }
  func.func @transform_3(%arg0: i32) -> (i32, i32, i32) {
    %c0_i32 = arith.constant 0 : i32
    %c0_i32_0 = arith.constant 0 : i32
    %c0_i32_1 = arith.constant 0 : i32
    %c0_i32_2 = arith.constant 0 : i32
    return %c0_i32, %c0_i32_0, %c0_i32_1 : i32, i32, i32
  }
  func.func @transform_4(%arg0: i32) -> (i32, i32) {
    %c0_i32 = arith.constant 0 : i32
    %c0_i32_0 = arith.constant 0 : i32
    return %arg0, %c0_i32 : i32, i32
  }
}

</mosaic_0001>

<bundles_post_ra>
// kernel: tpu_custom_call.1
= control target key start
LH: loop header
LB: loop body
LE: loop exit
PB: predicated region body
PF: predicated region fallthrough
CT: control target
= control target key end

     0   :  { %s6002_s0 = inlined_call_operand.hbm [shape: bf16[2,128,128], index: 0, kind: input, shape index: {}]   ;;  %s6003_s1 = inlined_call_operand.hbm [shape: f32[16,16,32], index: 1, kind: input, shape index: {}]   ;;  %s6004_s2 = inlined_call_operand.hbm [shape: bf16[3,32,32], index: 2, kind: input, shape index: {}]   ;;  %s6005_s3 = inlined_call_operand.hbm [shape: f32[3,4,32], index: 3, kind: input, shape index: {}]   ;;  %s6006_s4 = inlined_call_operand.hbm [shape: f32[16,32], index: 4, kind: output, shape index: {}]  }
   0x1   :  { %6046 = sst [smem:[#allocation31_spill]] %s6002_s0 }
   0x2   :  { %6047 = sst [smem:[#allocation32_spill]] %s6004_s2 }
   0x3   :  { %9 = vsyncpa [#allocation3], 0 }
   0x4   :  { %11 = vsyncpa [#allocation3 + $0x1], 0 }
   0x5   :  { %12 = vsyncpa [#allocation6], 0 }
   0x6   :  { %14 = vsyncpa [#allocation6 + $0x1], 0 }
   0x7   :  { %15 = vsyncpa [#allocation9], 0 }
   0x8   :  { %16 = vsyncpa [#allocation4], 0 }
   0x9   :  { %18 = vsyncpa [#allocation4 + $0x1], 0  ;;  %s4010_s15 = smov 0   ;;  %s4012_s16 = smov 0  }
   0xa   :  { %s4014_s17 = smov 0   ;;  %s4016_s18 = smov 0  }
   0xb LB: > { %s4031_s19 = sadd.s32 4294967295, %s3974_s18   ;;  %s3230_s20 = sadd.s32 4294967294, %s3974_s18   ;;  %s3974_s18 = sphi %s4016_s18, %s6148_s18   ;;  %s3970_s17 = sphi %s4014_s17, %s6147_s17   ;;  %s3966_s16 = sphi %s4012_s16, %s6146_s16   ;;  %s3962_s15 = sphi %s4010_s15, %s6145_s15  }
   0xc   : > { %p44_p0 = scmp.ne.s32.totalorder %s3966_s16, %s3962_s15  ;;  %p6007_p1 = scmp.eq.s32.totalorder %s4031_s19, 0 }
   0xd   : > { %p142_p3 = scmp.eq.s32.totalorder %s3230_s20, 1  ;;  %p3231_p5 = scmp.ge.s32.totalorder %s3974_s18, 1 }
   0xe   : > { %p4040_p4 = por %p6007_p1, %p44_p0  ;;  %p149_p7 = scmp.lt.s32.totalorder %s3974_s18, 3 }
   0xf   : > { %p4045_p6 = por %p142_p3, %p44_p0  ;;  %s3976_s24 = smov [#allocation7]  }
  0x10   : > { %s6048_s21 = scalar_select %p4040_p4, 1, 0 }
  0x11   : > { %s6049_s22 = scalar_select %p4045_p6, 1, 0 }
  0x12   : > { %p4050_p8 = pnand %p3231_p5, %p149_p7  ;;  %s161_s25 = sshll.u32 %s3976_s24, 4  ;;  %s4054_s25 = int_to_ptr.vmem [resolvable:$true] %s161_s25 }
  0x13   : > { %s3977_s27 = smov [#allocation8]   ;;  %s6052_s2 = sld [smem:[#allocation32_spill]] }
  0x14   : > { %p3545_p9 = pneg %p4050_p8  ;;  %s174_s28 = sshll.u32 %s3977_s27, 4  ;;  %s4065_s28 = int_to_ptr.vmem [resolvable:$true] %s174_s28 }
  0x16   : > { %p4061_p11 = pnand %p3545_p9, %p6007_p1 }
  0x18   : > { %p3782_p13 = pneg %p4061_p11 }
  0x19   : > { %s3780_s5 = scalar_lea.hbm %s6052_s2, 768 }
  0x1a   : > { %p3781_p12 = scmp.ne.s32.totalorder %s6052_s2, %s3780_s5  ;;  %p3787_p5 = scmp.lt.u32.totalorder %s3780_s5, %s6052_s2 }
  0x1c   : > { %p3783_p0 = pnand %p3782_p13, %p3781_p12 }
  0x1e   : > { %p3784_p3 = pneg %p3783_p0 }
  0x20   : > { %p3789_p7 = pnand %p3787_p5, %p3784_p3 }
  0x22   : > { %3792 = shalt.err (!%p3789_p7)
}
  0x23   : > { %s3793_s10 = scalar_lea.vmem %s4054_s25, 768  ;;  %p3801_p2 = scmp.lt.s32.totalorder %s4054_s25, %s4054_s25 }
  0x24   : > { %p3794_p9 = scmp.ne.s32.totalorder %s4054_s25, %s3793_s10  ;;  %p3802_p12 = scmp.lt.s32.totalorder %s3793_s10, %s3793_s10 }
  0x26   : > { %p3796_p10 = pnand %p3794_p9, %p3782_p13  ;;  %p3803_p0 = por %p3802_p12, %p3801_p2 }
  0x28   : > { %p3797_p1 = pneg %p3796_p10 }
  0x2a   : > { %p3804_p6 = pnand %p3803_p0, %p3797_p1 }
  0x2c   : > { %3807 = shalt.err (!%p3804_p6)
}
  0x2d   : > { %s3978_s11 = smov 64   ;;  %s3979_s12 = smov 4  }
  0x2e   : > { %3548 = dma.hbm_to_vmem [thread:$0]  (!%p4061_p11), %s6052_s2, 768, %s4054_s25, [#allocation6], %s3978_s11, %s3978_s11, %s3979_s12  }
  0x2f   : > { %s3808_s27 = scalar_lea.hbm %s6005_s3, 192 }
  0x30   : > { %p3809_p1 = scmp.ne.s32.totalorder %s6005_s3, %s3808_s27  ;;  %p3815_p10 = scmp.lt.u32.totalorder %s3808_s27, %s6005_s3 }
  0x32   : > { %p3811_p2 = pnand %p3809_p1, %p3782_p13 }
  0x34   : > { %p3812_p6 = pneg %p3811_p2 }
  0x36   : > { %p3817_p3 = pnand %p3815_p10, %p3812_p6 }
  0x38   : > { %3820 = shalt.err (!%p3817_p3)
}
  0x39   : > { %s3821_s25 = scalar_lea.vmem %s4065_s28, 192  ;;  %p3829_p12 = scmp.lt.s32.totalorder %s4065_s28, %s4065_s28 }
  0x3a   : > { %p3822_p5 = scmp.ne.s32.totalorder %s4065_s28, %s3821_s25  ;;  %p3830_p0 = scmp.lt.s32.totalorder %s3821_s25, %s3821_s25 }
  0x3c   : > { %p3824_p7 = pnand %p3822_p5, %p3782_p13  ;;  %p3831_p1 = por %p3830_p0, %p3829_p12 }
  0x3e   : > { %p3825_p9 = pneg %p3824_p7 }
  0x40   : > { %p3832_p2 = pnand %p3831_p1, %p3825_p9 }
  0x42   : > { %3835 = shalt.err (!%p3832_p2)
}
  0x43   : > { %3551 = dma.hbm_to_vmem [thread:$0]  (!%p4061_p11), %s6005_s3, 192, %s4065_s28, [#allocation9], %s3978_s11, %s3978_s11, %s3979_s12  }
  0x44   : > { %s4126_s26 = sadd.s32 1, %s3974_s18   ;;  %s31_s9 = sadd.s32 1, %s3970_s17 }
  0x45   : > { %s28_s10 = ssub.s32 %s3974_s18, %s4126_s26  ;;  %p38_p13 = scmp.ne.s32.totalorder %s3970_s17, %s3966_s16 }
  0x46   : > { %p29_p6 = scmp.eq.s32.totalorder %s28_s10, 0  ;;  %p39_p10 = scmp.eq.s32.totalorder %s3974_s18, 0 }
  0x47   : > { %p6053_p3 = scmp.eq.s32.totalorder %s4031_s19, 1  ;;  %p3565_p7 = scmp.lt.s32.totalorder %s3974_s18, 2 }
  0x48   : > { %s4142_s14 = scalar_select %p29_p6, %s3970_s17, %s31_s9  }
  0x49   : > { %p4136_p5 = por %p6053_p3, %p38_p13  ;;  %p40_p9 = por %p39_p10, %p38_p13 }
  0x4a   : > { %s4145_s20 = sand.u32 1, %s3970_s17   ;;  %s3290_s24 = sshll.u32 %s3974_s18, 10 }
  0x4b   : > { %s6054_s13 = scalar_select %p4136_p5, 1, 0 }
  0x4c   : > { %s3235_s28 = sshll.u32 %s4145_s20, 6  ;;  %s6055_s0 = sld [smem:[#allocation31_spill]] }
  0x4d   : > { %s192_s5 = scalar_lea.vmem [#allocation2], %s3235_s28  ;;  %p4156_p11 = pnand %p3565_p7, %p40_p9 }
  0x4e   : > { %s199_s6 = sshll.u32 %s192_s5, 4  ;;  %s3238_s8 = sshll.u32 %s4145_s20, 7  ;;  %s4154_s6 = int_to_ptr.vmem [resolvable:$true] %s199_s6 }
  0x4f   : > { %s189_s9 = scalar_lea.sflag [#allocation3], %s4145_s20  ;;  %p3838_p0 = pneg %p4156_p11 }
  0x52   : > { %s4152_s30 = scalar_lea.hbm %s6055_s0, %s3290_s24  ;;  %s3841_s27 = scalar_lea.hbm %s6055_s0, 2048 }
  0x53   : > { %s3836_s10 = scalar_lea.hbm %s4152_s30, 1024  ;;  %p3842_p13 = scmp.lt.u32.totalorder %s4152_s30, %s6055_s0 }
  0x54   : > { %p3837_p12 = scmp.ne.s32.totalorder %s4152_s30, %s3836_s10  ;;  %p3843_p6 = scmp.lt.u32.totalorder %s3841_s27, %s3836_s10 }
  0x55   : > { %p3845_p3 = scmp.lt.u32.totalorder %s3836_s10, %s4152_s30 }
  0x56   : > { %p3839_p1 = pnand %p3838_p0, %p3837_p12  ;;  %p3844_p10 = por %p3843_p6, %p3842_p13 }
  0x58   : > { %p3840_p2 = pneg %p3839_p1  ;;  %p3846_p7 = por %p3845_p3, %p3844_p10 }
  0x5a   : > { %p3847_p9 = pnand %p3846_p7, %p3840_p2 }
  0x5c   : > { %3850 = shalt.err (!%p3847_p9)
}
  0x5d   : > { %s3851_s7 = scalar_lea.vmem %s4154_s6, 1024  ;;  %s3980_s28 = smov [#allocation2]  }
  0x5e   : > { %p3852_p12 = scmp.ne.s32.totalorder %s4154_s6, %s3851_s7  ;;  %s3856_s24 = sshll.u32 %s3980_s28, 4  ;;  %s3857_s24 = int_to_ptr.vmem [resolvable:$false] %s3856_s24 }
  0x5f   : > { %s3858_s29 = scalar_lea.vmem %s3857_s24, 2048  ;;  %p3859_p4 = scmp.lt.s32.totalorder %s4154_s6, %s3857_s24 }
  0x60   : > { %p3854_p1 = pnand %p3852_p12, %p3838_p0  ;;  %p3860_p13 = scmp.lt.s32.totalorder %s3858_s29, %s3851_s7 }
  0x62   : > { %p3855_p5 = pneg %p3854_p1  ;;  %p3861_p6 = por %p3860_p13, %p3859_p4 }
  0x64   : > { %p3862_p10 = pnand %p3861_p6, %p3855_p5 }
  0x66   : > { %3865 = shalt.err (!%p3862_p10)
}
  0x67   : > { %3555 = dma.hbm_to_vmem [thread:$0]  (!%p4156_p11), %s4152_s30, 1024, %s4154_s6, %s189_s9, %s3978_s11, %s3978_s11, %s3979_s12  }
  0x68   : > { %s3292_s10 = sshll.u32 %s3974_s18, 11  ;;  %s213_s28 = scalar_lea.vmem [#allocation5], %s3238_s8 }
  0x69   : > { %s4197_s5 = scalar_lea.hbm %s6003_s1, %s3292_s10  ;;  %s221_s24 = sshll.u32 %s213_s28, 4  ;;  %s4201_s24 = int_to_ptr.vmem [resolvable:$true] %s221_s24 }
  0x6a   : > { %s6057_s29 = sand.u32 1, %s3974_s18   ;;  %s3866_s2 = scalar_lea.hbm %s4197_s5, 2048 }
  0x6b   : > { %s4205_s0 = scalar_lea.sflag [#allocation6], %s6057_s29  ;;  %p3867_p4 = scmp.ne.s32.totalorder %s4197_s5, %s3866_s2 }
  0x6c   : > { %s3871_s20 = scalar_lea.hbm %s6003_s1, 4096  ;;  %p3872_p3 = scmp.lt.u32.totalorder %s4197_s5, %s6003_s1 }
  0x6d   : > { %p3869_p5 = pnand %p3867_p4, %p3838_p0  ;;  %p3873_p7 = scmp.lt.u32.totalorder %s3871_s20, %s3866_s2 }
  0x6e   : > { %p3875_p12 = scmp.lt.u32.totalorder %s3866_s2, %s4197_s5 }
  0x6f   : > { %p3870_p2 = pneg %p3869_p5  ;;  %p3874_p9 = por %p3873_p7, %p3872_p3 }
  0x71   : > { %p3876_p1 = por %p3875_p12, %p3874_p9 }
  0x73   : > { %p3877_p13 = pnand %p3876_p1, %p3870_p2 }
  0x75   : > { %3880 = shalt.err (!%p3877_p13)
}
  0x76   : > { %s3881_s8 = scalar_lea.vmem %s4201_s24, 2048  ;;  %s3981_s9 = smov [#allocation5]  }
  0x77   : > { %p3882_p6 = scmp.ne.s32.totalorder %s4201_s24, %s3881_s8  ;;  %s3886_s10 = sshll.u32 %s3981_s9, 4  ;;  %s3887_s10 = int_to_ptr.vmem [resolvable:$false] %s3886_s10 }
  0x78   : > { %s3888_s27 = scalar_lea.vmem %s3887_s10, 4096  ;;  %p3889_p5 = scmp.lt.s32.totalorder %s4201_s24, %s3887_s10 }
  0x79   : > { %p3884_p10 = pnand %p3882_p6, %p3838_p0  ;;  %p3890_p3 = scmp.lt.s32.totalorder %s3888_s27, %s3881_s8 }
  0x7b   : > { %p3885_p4 = pneg %p3884_p10  ;;  %p3891_p7 = por %p3890_p3, %p3889_p5 }
  0x7d   : > { %p3892_p9 = pnand %p3891_p7, %p3885_p4 }
  0x7f   : > { %3895 = shalt.err (!%p3892_p9)
}
  0x80   : > { %s3982_s2 = smov 128   ;;  %s3983_s7 = smov 8  }
  0x81   : > { %3558 = dma.hbm_to_vmem [thread:$0]  (!%p4156_p11), %s4197_s5, 2048, %s4201_s24, %s4205_s0, %s3982_s2, %s3982_s2, %s3983_s7  }
  0x82   : > { %233 = sbr.rel (%p4050_p8) target bundleno = 2241 (0x8c1), region = 36 }
  0x89   : > { %s4234_s28 = sand.u32 1, %s3966_s16   ;;  %p6058_p0 = scmp.ne.s32.totalorder %s6048_s21, 0 }
  0x8a   : > { %s3243_s29 = sshll.u32 %s4234_s28, 6  ;;  %s236_s11 = scalar_lea.sflag [#allocation3], %s4234_s28 }
  0x8b   : > { %s4238_s12 = scalar_lea.vmem [#allocation2], %s3243_s29 }
  0x8c   : > { %3941 = dma.done.wait (%p6058_p0), %s236_s11, 1024  }
  0x8d   : > { %3943 = vsyncadd (%p6058_p0), %s236_s11, 4294966272  ;;  %s244_s0 = sand.u32 1, %s4031_s19   ;;  %s3244_s23 = sshll.u32 %s4234_s28, 7 }
  0x8e   : > { %s245_s25 = scalar_lea.sflag [#allocation6], %s244_s0  ;;  %s4246_s5 = scalar_lea.vmem [#allocation5], %s3244_s23 }
  0x8f   : > { %3945 = dma.done.wait (%p6058_p0), %s245_s25, 2048  }
  0x90   : > { %3947 = vsyncadd (%p6058_p0), %s245_s25, 4294965248  ;;  %p6059_p8 = scmp.eq.s32.totalorder %s4031_s19, 0 }
  0x92   : > { %3949 = dma.done.wait (%p6059_p8), [#allocation6], 768   ;;  %p6060_p11 = pmov %p6059_p8 }
  0x93   : > { %p6061_p2 = pmov %p6059_p8 }
  0x94   : > { %3951 = vsyncadd (%p6060_p11), [#allocation6], 4294966528 }
  0x95   : > { %3953 = dma.done.wait (%p6061_p2), [#allocation9], 192   ;;  %p6062_p12 = pmov %p6061_p2 }
  0x96   : > { %v304_v0 = vld [vmem:[%s4246_s5] sm:$0xff]  ;;  %v305_v1 = vld [vmem:[%s4246_s5 + $0x8] sm:$0xff]  ;;  %v306_v2 = vld [vmem:[%s4246_s5 + $0x10] sm:$0xff]  ;;  %vm497_vm0 = vcmask 261120   ;;  %s3247_s21 = sshll.u32 %s4234_s28, 3  ;;  %s3287_s24 = sshll.u32 %s4031_s19, 7 }
  0x97   : > { %3955 = vsyncadd (%p6062_p12), [#allocation9], 4294967104  ;;  %v320_v3 = vpack.c.bf16 %v305_v1, %v304_v0  ;;  %v307_v4 = vld [vmem:[%s4246_s5 + $0x18] sm:$0xff]  ;;  %v308_v6 = vld [vmem:[%s4246_s5 + $0x20] sm:$0xff]  ;;  %s285_s20 = scalar_lea.vmem [#allocation10], %s3247_s21  ;;  %s5957_s9 = scalar_lea.hbm %s6006_s4, %s3287_s24 }
  0x98   : > { %v321_v5 = vpack.c.bf16 %v307_v4, %v306_v2  ;;  %v309_v7 = vld [vmem:[%s4246_s5 + $0x28] sm:$0xff]  ;;  %v310_v8 = vld [vmem:[%s4246_s5 + $0x30] sm:$0xff]  ;;  %v311_v10 = vld [vmem:[%s4246_s5 + $0x38] sm:$0xff]  ;;  %s3118_s30 = sshll.u32 %s285_s20, 4  ;;  %s3105_s19 = scalar_lea.sflag [#allocation4], %s4234_s28  ;;  %s5959_s30 = int_to_ptr.vmem [resolvable:$true] %s3118_s30 }
  0x99   : > { %3371 = vmatprep.subr.bf16.mxu0 %v320_v3  ;;  %v322_v9 = vpack.c.bf16 %v309_v7, %v308_v6  ;;  %v4269_v11 = vld [vmem:[%s4238_s12] sm:$0xff]   ;;  %v323_v12 = vpack.c.bf16 %v311_v10, %v310_v8  ;;  %v313_v14 = vld [vmem:[%s4246_s5 + $0x48] sm:$0xff]  ;;  %v314_v15 = vld [vmem:[%s4246_s5 + $0x50] sm:$0xff]  ;;  %s3896_s10 = scalar_lea.vmem %s5959_s30, 128  ;;  %p6142_p13 = scmp.ne.s32.totalorder %s6054_s13, 0 }
  0x9a   : > { %3372 = vmatpush3.bf16.msra.mxu0 %v320_v3  ;;  %3387 = vmatprep.mubr.bf16.mxu0 %v4269_v11  ;;  %v312_v13 = vld [vmem:[%s4246_s5 + $0x40] sm:$0xff]  ;;  %v315_v17 = vld [vmem:[%s4246_s5 + $0x58] sm:$0xff]  ;;  %v317_v21 = vld [vmem:[%s4246_s5 + $0x68] sm:$0xff]  ;;  %p3897_p1 = scmp.ne.s32.totalorder %s5959_s30, %s3896_s10  ;;  %s3984_s27 = smov [#allocation10]  }
  0x9b   : > { %3373 = vmatprep.subr.bf16.mxu0 %v321_v5  ;;  %v324_v16 = vpack.c.bf16 %v313_v14, %v312_v13  ;;  %v3615_v18 = vld [vmem:[#allocation7] sm:$0xff]   ;;  %v325_v19 = vpack.c.bf16 %v315_v17, %v314_v15  ;;  %v318_v23 = vld [vmem:[%s4246_s5 + $0x70] sm:$0xff]  ;;  %v319_v24 = vld [vmem:[%s4246_s5 + $0x78] sm:$0xff]  ;;  %s3900_s2 = sshll.u32 %s3984_s27, 4  ;;  %s3901_s2 = int_to_ptr.vmem [resolvable:$false] %s3900_s2 }
  0x9c   : > { %3403 = vmatprep.subr.bf16.mxu1 %v3615_v18  ;;  %v316_v20 = vld [vmem:[%s4246_s5 + $0x60] sm:$0xff]  ;;  %v327_v25 = vpack.c.bf16 %v319_v24, %v318_v23  ;;  %v3608_v26 = vld [vmem:[%s4238_s12 + $0x8] sm:$0xff]   ;;  %v3609_v27 = vld [vmem:[%s4238_s12 + $0x10] sm:$0xff]   ;;  %p3898_p6 = pnand %p3897_p1, %p6142_p13  ;;  %s3902_s7 = scalar_lea.vmem %s3901_s2, 256 }
  0x9d   : > { %3404 = vmatpush3.bf16.msra.mxu1 %v3615_v18  ;;  %v326_v22 = vpack.c.bf16 %v317_v21, %v316_v20  ;;  %v3610_v28 = vld [vmem:[%s4238_s12 + $0x18] sm:$0xff]   ;;  %v3611_v29 = vld [vmem:[%s4238_s12 + $0x20] sm:$0xff]   ;;  %v3612_v30 = vld [vmem:[%s4238_s12 + $0x28] sm:$0xff]   ;;  %p3903_p4 = scmp.lt.s32.totalorder %s5959_s30, %s3901_s2  ;;  %p3904_p5 = scmp.lt.s32.totalorder %s3902_s7, %s3896_s10 }
  0x9e   : > { %3374 = vmatpush3.bf16.msra.mxu0 %v321_v5  ;;  %v3613_v31 = vld [vmem:[%s4238_s12 + $0x30] sm:$0xff]   ;;  %v3614_v32 = vld [vmem:[%s4238_s12 + $0x38] sm:$0xff]   ;;  %v3616_v33 = vld [vmem:[#allocation7 + $0x8] sm:$0xff]   ;;  %p3899_p10 = pneg %p3898_p6 }
  0x9f   : > { %3375 = vmatprep.subr.bf16.mxu0 %v322_v9  ;;  %3405 = vmatprep.subr.bf16.mxu1 %v3616_v33  ;;  %p3905_p3 = por %p3904_p5, %p3903_p4 }
  0xa1   : > { %3406 = vmatpush3.bf16.msra.mxu1 %v3616_v33  ;;  %p3906_p7 = pnand %p3905_p3, %p3899_p10 }
  0xa2   : > { %3376 = vmatpush3.bf16.msra.mxu0 %v322_v9 }
  0xa3   : > { %3377 = vmatprep.subr.bf16.mxu0 %v323_v12 }
  0xa6   : > { %3378 = vmatpush3.bf16.msra.mxu0 %v323_v12 }
  0xa7   : > { %3379 = vmatprep.subr.bf16.mxu0 %v324_v16 }
  0xaa   : > { %3380 = vmatpush3.bf16.msra.mxu0 %v324_v16 }
  0xab   : > { %3381 = vmatprep.subr.bf16.mxu0 %v325_v19 }
  0xae   : > { %3382 = vmatpush3.bf16.msra.mxu0 %v325_v19 }
  0xaf   : > { %3383 = vmatprep.subr.bf16.mxu0 %v326_v22 }
  0xb2   : > { %3384 = vmatpush3.bf16.msra.mxu0 %v326_v22 }
  0xb3   : > { %3385 = vmatprep.subr.bf16.mxu0 %v327_v25 }
  0xb6   : > { %3386 = vmatpush3.bf16.msra.mxu0 %v327_v25 }
  0xb9   : > { %3388 = vmatmul.mubr.bf16.vlgmr.msra.gmra.mrb[0].mxu0 %v3608_v26 }
  0xba   : > { %3391 = vmatprep.mubr.bf16.mxu0 %v3609_v27 }
  0xc1   : > { %3392 = vmatmul.mubr.bf16.gmra.mrb[4].mxu0 %v3610_v28 }
  0xc2   : > { %3395 = vmatprep.mubr.bf16.mxu0 %v3611_v29 }
  0xc9   : > { %3396 = vmatmul.mubr.bf16.gmra.mrb[8].mxu0 %v3612_v30 }
  0xca   : > { %3399 = vmatprep.mubr.bf16.mxu0 %v3613_v31 }
  0xd1   : > { %3400 = vmatmul.mubr.bf16.gmra.mrb[12].mxu0 %v3614_v32 }
 0x18c   : > { %v3389_v34 = vpop.f32.mrb[0].mxu0 }
 0x18d   : > { %v410_v35 = vpop.f32.mrb[1].mxu0 }
 0x18e   : > { %v3390_v36 = vpop.f32.mrb[2].mxu0 }
 0x18f   : > { %v474_v37 = vpack.c.bf16 %v3390_v36, %v3389_v34  ;;  %v413_v38 = vpop.f32.mrb[3].mxu0 }
 0x190   : > { %v473_v39 = vpack.c.bf16 %v413_v38, %v410_v35 }
 0x192   : > { %3407 = vmatprep.mubr.msk.bf16.mxu1 %vm497_vm0, %v473_v39 }
 0x193   : > { %3408 = vmatmul.mubr.msk.bf16.vlgmr.msra.gmra.mrb[0].mxu1 %vm497_vm0, %v474_v37 }
 0x194   : > { %v3393_v40 = vpop.f32.mrb[4].mxu0 }
 0x195   : > { %v426_v41 = vpop.f32.mrb[5].mxu0 }
 0x196   : > { %v3394_v42 = vpop.f32.mrb[6].mxu0 }
 0x197   : > { %v476_v43 = vpack.c.bf16 %v3394_v42, %v3393_v40  ;;  %v429_v44 = vpop.f32.mrb[7].mxu0 }
 0x198   : > { %v475_v45 = vpack.c.bf16 %v429_v44, %v426_v41 }
 0x19a   : > { %3411 = vmatprep.mubr.msk.bf16.mxu1 %vm497_vm0, %v475_v45 }
 0x19b   : > { %3412 = vmatmul.mubr.msk.bf16.gmra.mrb[4].mxu1 %vm497_vm0, %v476_v43 }
 0x19c   : > { %v3397_v46 = vpop.f32.mrb[8].mxu0 }
 0x19d   : > { %v442_v47 = vpop.f32.mrb[9].mxu0 }
 0x19e   : > { %v3398_v48 = vpop.f32.mrb[10].mxu0 }
 0x19f   : > { %v478_v49 = vpack.c.bf16 %v3398_v48, %v3397_v46  ;;  %v445_v50 = vpop.f32.mrb[11].mxu0 }
 0x1a0   : > { %v477_v51 = vpack.c.bf16 %v445_v50, %v442_v47 }
 0x1a2   : > { %3415 = vmatprep.mubr.msk.bf16.mxu1 %vm497_vm0, %v477_v51 }
 0x1a3   : > { %3416 = vmatmul.mubr.msk.bf16.gmra.mrb[8].mxu1 %vm497_vm0, %v478_v49 }
 0x1a4   : > { %v3401_v52 = vpop.f32.mrb[12].mxu0 }
 0x1a5   : > { %v458_v53 = vpop.f32.mrb[13].mxu0 }
 0x1a6   : > { %v3402_v54 = vpop.f32.mrb[14].mxu0 }
 0x1a7   : > { %v480_v55 = vpack.c.bf16 %v3402_v54, %v3401_v52  ;;  %v461_v56 = vpop.f32.mrb[15].mxu0 }
 0x1a8   : > { %v479_v57 = vpack.c.bf16 %v461_v56, %v458_v53 }
 0x1aa   : > { %3419 = vmatprep.mubr.msk.bf16.mxu1 %vm497_vm0, %v479_v57 }
 0x1ab   : > { %3420 = vmatmul.mubr.msk.bf16.gmra.mrb[12].mxu1 %vm497_vm0, %v480_v55 }
 0x1ac   : > { %3439 = vmatprep.mubr.bf16.mxu1 %v4269_v11 }
 0x266   : > { %v4296_v58 = vpop.f32.mrb[0].mxu1 }
 0x267   : > { %v4298_v59 = vpop.f32.mrb[1].mxu1  ;;  %v641_v60 = vsel %vm497_vm0, %v4296_v58, 0.0  ;;  %v621_v61 = vmul.f32 %v4296_v58, %v4296_v58 }
 0x268   : > { %642 = vadd.xlane.f32.xlu0 %v641_v60  ;;  %v4304_v62 = vpop.f32.mrb[2].mxu1  ;;  %v619_v1 = vmul.f32 %v4298_v59, %v4298_v59  ;;  %v635_v4 = vsel %vm497_vm0, %v4298_v59, 0.0 }
 0x269   : > { %v4306_v63 = vpop.f32.mrb[3].mxu1  ;;  %v644_v0 = vsel %vm497_vm0, %v4304_v62, 0.0  ;;  %v622_v2 = vmul.f32 %v4304_v62, %v4304_v62  ;;  %v706_v6 = vsel %vm497_vm0, %v621_v61, 0.0 }
 0x26a   : > { %645 = vadd.xlane.f32.xlu1 %v644_v0  ;;  %v819_v3 = vadd.f32 %v644_v0, %v641_v60  ;;  %v638_v5 = vsel %vm497_vm0, %v4306_v63, 0.0  ;;  %v620_v9 = vmul.f32 %v4306_v63, %v4306_v63  ;;  %v700_v12 = vsel %vm497_vm0, %v619_v1, 0.0 }
 0x26b   : > { %v709_v7 = vsel %vm497_vm0, %v622_v2, 0.0  ;;  %v812_v8 = vadd.f32 %v638_v5, %v635_v4 }
 0x26c   : > { %v820_v10 = vrot.slane %v819_v3, 4  ;;  %636 = vadd.xlane.f32.xlu0 %v635_v4  ;;  %v884_v11 = vadd.f32 %v709_v7, %v706_v6  ;;  %v703_v14 = vsel %vm497_vm0, %v620_v9, 0.0 }
 0x26d   : > { %v813_v13 = vrot.slane %v812_v8, 4  ;;  %v877_v18 = vadd.f32 %v703_v14, %v700_v12 }
 0x26e   : > { %v821_v15 = vadd.f32 %v820_v10, %v819_v3  ;;  %701 = vadd.xlane.f32.xlu1 %v700_v12  ;;  %v4324_v16 = vpop.f32.mrb[4].mxu1  ;;  %v885_v17 = vrot.slane %v884_v11, 4 }
 0x26f   : > { %v4326_v19 = vpop.f32.mrb[5].mxu1  ;;  %v814_v20 = vadd.f32 %v813_v13, %v812_v8  ;;  %v878_v24 = vrot.slane %v877_v18, 4  ;;  %v653_v25 = vsel %vm497_vm0, %v4324_v16, 0.0  ;;  %v625_v36 = vmul.f32 %v4324_v16, %v4324_v16 }
 0x270   : > { %v822_v21 = vrot.slane %v821_v15, 2  ;;  %707 = vadd.xlane.f32.xlu0 %v706_v6  ;;  %v4328_v22 = vpop.f32.mrb[6].mxu1  ;;  %v886_v23 = vadd.f32 %v885_v17, %v884_v11  ;;  %v647_v29 = vsel %vm497_vm0, %v4326_v19, 0.0  ;;  %v623_v57 = vmul.f32 %v4326_v19, %v4326_v19 }
 0x271   : > { %v4332_v26 = vpop.f32.mrb[7].mxu1  ;;  %v815_v27 = vrot.slane %v814_v20, 2  ;;  %v656_v28 = vsel %vm497_vm0, %v4328_v22, 0.0  ;;  %v879_v32 = vadd.f32 %v878_v24, %v877_v18  ;;  %v626_v43 = vmul.f32 %v4328_v22, %v4328_v22 }
 0x272   : > { %v823_v30 = vadd.f32 %v822_v21, %v821_v15  ;;  %710 = vadd.xlane.f32.xlu1 %v709_v7  ;;  %v887_v31 = vrot.slane %v886_v23, 2  ;;  %v833_v34 = vadd.f32 %v656_v28, %v653_v25  ;;  %v650_v35 = vsel %vm497_vm0, %v4332_v26, 0.0 }
 0x273   : > { %v816_v33 = vadd.f32 %v815_v27, %v814_v20  ;;  %v880_v39 = vrot.slane %v879_v32, 2  ;;  %v826_v40 = vadd.f32 %v650_v35, %v647_v29  ;;  %v718_v52 = vsel %vm497_vm0, %v625_v36, 0.0 }
 0x274   : > { %v824_v37 = vrot.slane %v823_v30, 1  ;;  %v888_v38 = vadd.f32 %v887_v31, %v886_v23  ;;  %639 = vadd.xlane.f32.xlu0 %v638_v5  ;;  %v834_v42 = vrot.slane %v833_v34, 4  ;;  %v721_v2 = vsel %vm497_vm0, %v626_v43, 0.0 }
 0x275   : > { %v817_v41 = vrot.slane %v816_v33, 1  ;;  %v881_v46 = vadd.f32 %v880_v39, %v879_v32  ;;  %v827_v48 = vrot.slane %v826_v40, 4  ;;  %v898_v15 = vadd.f32 %v721_v2, %v718_v52 }
 0x276   : > { %v825_v44 = vadd.f32 %v824_v37, %v823_v30  ;;  %v889_v45 = vrot.slane %v888_v38, 1  ;;  %704 = vadd.xlane.f32.xlu1 %v703_v14  ;;  %v4344_v47 = vpop.f32.mrb[8].mxu1  ;;  %v835_v51 = vadd.f32 %v834_v42, %v833_v34  ;;  %v624_v17 = vmul.f32 %v4332_v26, %v4332_v26 }
 0x277   : > { %v818_v49 = vadd.f32 %v817_v41, %v816_v33  ;;  %v4346_v50 = vpop.f32.mrb[9].mxu1  ;;  %v882_v55 = vrot.slane %v881_v46, 1  ;;  %v828_v1 = vadd.f32 %v827_v48, %v826_v40  ;;  %v712_v24 = vsel %vm497_vm0, %v623_v57, 0.0 }
 0x278   : > { %v4349_v53 = vmul.f32 0.0625, %v825_v44  ;;  %v890_v54 = vadd.f32 %v889_v45, %v888_v38  ;;  %654 = vadd.xlane.f32.xlu0 %v653_v25  ;;  %v4351_v56 = vpop.f32.mrb[10].mxu1  ;;  %v836_v0 = vrot.slane %v835_v51, 2  ;;  %v665_v40 = vsel %vm497_vm0, %v4344_v47, 0.0 }
 0x279   : > { %v4355_v60 = vmul.f32 0.0625, %v818_v49  ;;  %v4357_v61 = vpop.f32.mrb[11].mxu1  ;;  %v883_v10 = vadd.f32 %v882_v55, %v881_v46  ;;  %v829_v13 = vrot.slane %v828_v1, 2  ;;  %v668_v44 = vsel %vm497_vm0, %v4351_v56, 0.0 }
 0x27a   : > { %v1031_v3 = vsub.f32 %v4296_v58, %v4349_v53  ;;  %v1032_v4 = vsub.f32 %v4304_v62, %v4349_v53  ;;  %v942_v5 = vmul.f32 %v4349_v53, %v4349_v53  ;;  %v934_v6 = vmul.f32 0.0625, %v890_v54  ;;  %657 = vadd.xlane.f32.xlu1 %v656_v28 }
 0x27b   : > { %v1029_v7 = vsub.f32 %v4298_v59, %v4355_v60  ;;  %v1030_v8 = vsub.f32 %v4306_v63, %v4355_v60  ;;  %v941_v9 = vmul.f32 %v4355_v60, %v4355_v60  ;;  %v837_v12 = vadd.f32 %v836_v0, %v835_v51 }
 0x27c   : > { %v950_v11 = vsub.f32 %v934_v6, %v942_v5  ;;  %648 = vadd.xlane.f32.xlu0 %v647_v29  ;;  %v933_v14 = vmul.f32 0.0625, %v883_v10  ;;  %v830_v21 = vadd.f32 %v829_v13, %v828_v1  ;;  %v899_v28 = vrot.slane %v898_v15, 4 }
 0x27d   : > { %v838_v20 = vrot.slane %v837_v12, 1  ;;  %v715_v29 = vsel %vm497_vm0, %v624_v17, 0.0  ;;  %v847_v54 = vadd.f32 %v668_v44, %v665_v40  ;;  %v659_v1 = vsel %vm497_vm0, %v4346_v50, 0.0 }
 0x27e   : > { %v958_v18 = vmax.f32 %v950_v11, 0.0  ;;  %651 = vadd.xlane.f32.xlu1 %v650_v35  ;;  %v4374_v23 = vpop.f32.mrb[12].mxu1  ;;  %v949_v25 = vsub.f32 %v933_v14, %v941_v9  ;;  %v831_v32 = vrot.slane %v830_v21, 1  ;;  %v900_v35 = vadd.f32 %v899_v28, %v898_v15 }
 0x27f   : > { %6063 = vst [vmem:[#allocation16_spill] sm:$0xff] %v4374_v23  ;;  %v4377_v27 = vpop.f32.mrb[13].mxu1  ;;  %v839_v31 = vadd.f32 %v838_v20, %v837_v12  ;;  %v891_v37 = vadd.f32 %v715_v29, %v712_v24  ;;  %v848_v6 = vrot.slane %v847_v54, 4  ;;  %v662_v9 = vsel %vm497_vm0, %v4357_v61, 0.0 }
 0x280   : > { %6064 = vst [vmem:[#allocation17_spill] sm:$0xff] %v4377_v27  ;;  %v1046_v30 = vadd.f32 1e-05, %v958_v18  ;;  %719 = vadd.xlane.f32.xlu0 %v718_v52  ;;  %v4380_v33 = vpop.f32.mrb[14].mxu1  ;;  %v957_v34 = vmax.f32 %v949_v25, 0.0  ;;  %v832_v39 = vadd.f32 %v831_v32, %v830_v21  ;;  %v901_v42 = vrot.slane %v900_v35, 2 }
 0x281   : > { %6065 = vst [vmem:[#allocation18_spill] sm:$0xff] %v4380_v33  ;;  %v4382_v36 = vpop.f32.mrb[15].mxu1  ;;  %v4384_v38 = vmul.f32 0.0625, %v839_v31  ;;  %v892_v43 = vrot.slane %v891_v37, 4  ;;  %v840_v10 = vadd.f32 %v662_v9, %v659_v1  ;;  %v629_v11 = vmul.f32 %v4344_v47, %v4344_v47 }
 0x282   : > { %6066 = vst [vmem:[#allocation19_spill] sm:$0xff] %v4382_v36  ;;  %3621 = vrsqrt.f32 %v1046_v30  ;;  %722 = vadd.xlane.f32.xlu1 %v721_v2  ;;  %v1045_v41 = vadd.f32 1e-05, %v957_v34  ;;  %v4394_v48 = vmul.f32 0.0625, %v832_v39  ;;  %v902_v51 = vadd.f32 %v901_v42, %v900_v35 }
 0x283   : > { %v1035_v45 = vsub.f32 %v4324_v16, %v4384_v38  ;;  %v1036_v46 = vsub.f32 %v4328_v22, %v4384_v38  ;;  %v944_v49 = vmul.f32 %v4384_v38, %v4384_v38  ;;  %v893_v52 = vadd.f32 %v892_v43, %v891_v37 }
 0x284   : > { %713 = vadd.xlane.f32.xlu0 %v712_v24  ;;  %3623 = vrsqrt.f32 %v1045_v41  ;;  %v1033_v55 = vsub.f32 %v4326_v19, %v4394_v48  ;;  %v1034_v57 = vsub.f32 %v4332_v26, %v4394_v48  ;;  %v943_v0 = vmul.f32 %v4394_v48, %v4394_v48 }
 0x285   : > { %v903_v2 = vrot.slane %v902_v51, 1  ;;  %v894_v5 = vrot.slane %v893_v52, 2  ;;  %v630_v12 = vmul.f32 %v4351_v56, %v4351_v56  ;;  %v627_v13 = vmul.f32 %v4346_v50, %v4346_v50 }
 0x286   : > { %716 = vadd.xlane.f32.xlu1 %v715_v29  ;;  %v849_v17 = vadd.f32 %v848_v6, %v847_v54  ;;  %v628_v18 = vmul.f32 %v4357_v61, %v4357_v61  ;;  %v841_v20 = vrot.slane %v840_v10, 4  ;;  %v730_v21 = vsel %vm497_vm0, %v629_v11, 0.0 }
 0x287   : > { %v904_v14 = vadd.f32 %v903_v2, %v902_v51  ;;  %v895_v15 = vadd.f32 %v894_v5, %v893_v52  ;;  %v733_v24 = vsel %vm497_vm0, %v630_v12, 0.0  ;;  %v724_v25 = vsel %vm497_vm0, %v627_v13, 0.0 }
 0x288   : > { %666 = vadd.xlane.f32.xlu0 %v665_v40  ;;  %v850_v30 = vrot.slane %v849_v17, 2  ;;  %v912_v31 = vadd.f32 %v733_v24, %v730_v21  ;;  %v842_v34 = vadd.f32 %v841_v20, %v840_v10  ;;  %v727_v35 = vsel %vm497_vm0, %v628_v18, 0.0 }
 0x289   : > { %v936_v28 = vmul.f32 0.0625, %v904_v14  ;;  %v896_v29 = vrot.slane %v895_v15, 1  ;;  %v677_v37 = vsel %vm497_vm0, %v4374_v23, 0.0  ;;  %v680_v39 = vsel %vm497_vm0, %v4380_v33, 0.0 }
 0x28a   : > { %669 = vadd.xlane.f32.xlu1 %v668_v44  ;;  %v851_v42 = vadd.f32 %v850_v30, %v849_v17  ;;  %v913_v43 = vrot.slane %v912_v31, 4  ;;  %v843_v44 = vrot.slane %v842_v34, 2  ;;  %v905_v51 = vadd.f32 %v727_v35, %v724_v25 }
 0x28b   : > { %v952_v40 = vsub.f32 %v936_v28, %v944_v49  ;;  %v897_v41 = vadd.f32 %v896_v29, %v895_v15  ;;  %v861_v52 = vadd.f32 %v680_v39, %v677_v37  ;;  %v671_v54 = vsel %vm497_vm0, %v4377_v27, 0.0 }
 0x28c   : > { %v4419_v32 = vpop.eup %3621  ;;  %660 = vadd.xlane.f32.xlu0 %v659_v1  ;;  %v852_v6 = vrot.slane %v851_v42, 1  ;;  %v914_v10 = vadd.f32 %v913_v43, %v912_v31  ;;  %v844_v11 = vadd.f32 %v843_v44, %v842_v34  ;;  %v906_v12 = vrot.slane %v905_v51, 4 }
 0x28d   : > { %v960_v2 = vmax.f32 %v952_v40, 0.0  ;;  %v935_v5 = vmul.f32 0.0625, %v897_v41  ;;  %v862_v49 = vrot.slane %v861_v52, 4  ;;  %v674_v13 = vsel %vm497_vm0, %v4382_v36, 0.0 }
 0x28e   : > { %663 = vadd.xlane.f32.xlu1 %v662_v9  ;;  %v4428_v1 = vpop.eup %3623  ;;  %v853_v15 = vadd.f32 %v852_v6, %v851_v42  ;;  %v915_v17 = vrot.slane %v914_v10, 2  ;;  %v845_v18 = vrot.slane %v844_v11, 1  ;;  %v907_v20 = vadd.f32 %v906_v12, %v905_v51 }
 0x28f   : > { %v1048_v9 = vadd.f32 1e-05, %v960_v2  ;;  %v951_v14 = vsub.f32 %v935_v5, %v943_v0  ;;  %v863_v28 = vadd.f32 %v862_v49, %v861_v52  ;;  %v854_v29 = vadd.f32 %v674_v13, %v671_v54 }
 0x290   : > { %731 = vadd.xlane.f32.xlu0 %v730_v21  ;;  %v4432_v40 = vmul.f32 0.0625, %v853_v15  ;;  %v916_v31 = vadd.f32 %v915_v17, %v914_v10  ;;  %v846_v21 = vadd.f32 %v845_v18, %v844_v11  ;;  %v908_v34 = vrot.slane %v907_v20, 2 }
 0x291   : > { %3625 = vrsqrt.f32 %v1048_v9  ;;  %v959_v30 = vmax.f32 %v951_v14, 0.0  ;;  %v864_v41 = vrot.slane %v863_v28, 2  ;;  %v855_v43 = vrot.slane %v854_v29, 4 }
 0x292   : > { %734 = vadd.xlane.f32.xlu1 %v733_v24  ;;  %v1039_v0 = vsub.f32 %v4344_v47, %v4432_v40  ;;  %v1040_v24 = vsub.f32 %v4351_v56, %v4432_v40  ;;  %v917_v42 = vrot.slane %v916_v31, 1  ;;  %v4438_v51 = vmul.f32 0.0625, %v846_v21 }
 0x293   : > { %v1047_v44 = vadd.f32 1e-05, %v959_v30  ;;  %v946_v52 = vmul.f32 %v4432_v40, %v4432_v40  ;;  %v909_v2 = vadd.f32 %v908_v34, %v907_v20  ;;  %v865_v5 = vadd.f32 %v864_v41, %v863_v28 }
 0x294   : > { %725 = vadd.xlane.f32.xlu0 %v724_v25  ;;  %v918_v25 = vadd.f32 %v917_v42, %v916_v31  ;;  %v856_v6 = vadd.f32 %v855_v43, %v854_v29  ;;  %v631_v10 = vmul.f32 %v4377_v27, %v4377_v27  ;;  %v1037_v11 = vsub.f32 %v4346_v50, %v4438_v51 }
 0x295   : > { %3627 = vrsqrt.f32 %v1047_v44  ;;  %v1038_v12 = vsub.f32 %v4357_v61, %v4438_v51  ;;  %v945_v49 = vmul.f32 %v4438_v51, %v4438_v51  ;;  %v910_v9 = vrot.slane %v909_v2, 1  ;;  %v3618_v51 = vld [vmem:[#allocation7 + $0x18] sm:$0xff]  }
 0x296   : > { %728 = vadd.xlane.f32.xlu1 %v727_v35  ;;  %v938_v35 = vmul.f32 0.0625, %v918_v25  ;;  %v866_v14 = vrot.slane %v865_v5, 1  ;;  %v857_v15 = vrot.slane %v856_v6, 2  ;;  %v736_v17 = vsel %vm497_vm0, %v631_v10, 0.0 }
 0x297   : > { %v911_v18 = vadd.f32 %v910_v9, %v909_v2  ;;  %v632_v20 = vmul.f32 %v4382_v36, %v4382_v36  ;;  %v633_v28 = vmul.f32 %v4374_v23, %v4374_v23  ;;  %v634_v29 = vmul.f32 %v4380_v33, %v4380_v33 }
 0x298   : > { %678 = vadd.xlane.f32.xlu0 %v677_v37  ;;  %v954_v30 = vsub.f32 %v938_v35, %v946_v52  ;;  %v867_v31 = vadd.f32 %v866_v14, %v865_v5  ;;  %v858_v21 = vadd.f32 %v857_v15, %v856_v6  ;;  %v4461_v37 = vmul.f32 %v4428_v1, %v1029_v7 }
 0x299   : > { %v937_v34 = vmul.f32 0.0625, %v911_v18  ;;  %v742_v41 = vsel %vm497_vm0, %v633_v28, 0.0  ;;  %v745_v43 = vsel %vm497_vm0, %v634_v29, 0.0  ;;  %v4472_v7 = vmul.f32 %v4428_v1, %v1030_v8 }
 0x29a   : > { %681 = vadd.xlane.f32.xlu1 %v680_v39  ;;  %v739_v39 = vsel %vm497_vm0, %v632_v20, 0.0  ;;  %v962_v42 = vmax.f32 %v954_v30, 0.0  ;;  %v4466_v2 = vmul.f32 0.0625, %v867_v31  ;;  %v859_v52 = vrot.slane %v858_v21, 1 }
 0x29b   : > { %v3626_v44 = vpop.eup %3625  ;;  %v919_v5 = vadd.f32 %v739_v39, %v736_v17  ;;  %v953_v25 = vsub.f32 %v937_v34, %v945_v49  ;;  %v926_v6 = vadd.f32 %v745_v43, %v742_v41  ;;  %v4482_v60 = vmul.f32 %v4419_v32, %v1031_v3 }
 0x29c   : > { %672 = vadd.xlane.f32.xlu0 %v671_v54  ;;  %v1050_v54 = vadd.f32 1e-05, %v962_v42  ;;  %v1043_v10 = vsub.f32 %v4374_v23, %v4466_v2  ;;  %v1044_v9 = vsub.f32 %v4380_v33, %v4466_v2  ;;  %v860_v35 = vadd.f32 %v859_v52, %v858_v21 }
 0x29d   : > { %v961_v14 = vmax.f32 %v953_v25, 0.0  ;;  %v920_v15 = vrot.slane %v919_v5, 4  ;;  %v927_v49 = vrot.slane %v926_v6, 4 }
 0x29e   : > { %675 = vadd.xlane.f32.xlu1 %v674_v13  ;;  %3629 = vrsqrt.f32 %v1050_v54  ;;  %v875_v18 = vmul.f32 0.0625, %v860_v35 }
 0x29f   : > { %v3628_v13 = vpop.eup %3627  ;;  %v1049_v8 = vadd.f32 1e-05, %v961_v14  ;;  %v921_v1 = vadd.f32 %v920_v15, %v919_v5  ;;  %v928_v20 = vadd.f32 %v927_v49, %v926_v6 }
 0x2a0   : > { %737 = vadd.xlane.f32.xlu0 %v736_v17  ;;  %v4488_v17 = vmul.f32 %v4419_v32, %v1032_v4  ;;  %v1041_v28 = vsub.f32 %v4377_v27, %v875_v18  ;;  %v1042_v29 = vsub.f32 %v4382_v36, %v875_v18  ;;  %v4495_v3 = vmul.f32 %v3628_v13, %v1033_v55 }
 0x2a1   : > { %3631 = vrsqrt.f32 %v1049_v8  ;;  %v922_v30 = vrot.slane %v921_v1, 2  ;;  %v929_v31 = vrot.slane %v928_v20, 2  ;;  %v4500_v53 = vmul.f32 %v3628_v13, %v1034_v57 }
 0x2a2   : > { %740 = vadd.xlane.f32.xlu1 %v739_v39  ;;  %v4505_v4 = vmul.f32 %v3626_v44, %v1035_v45  ;;  %v4510_v32 = vmul.f32 %v3626_v44, %v1036_v46  ;;  %v948_v57 = vmul.f32 %v4466_v2, %v4466_v2  ;;  %v1078_v8 = vlaneseq }
 0x2a3   : > { %v923_v21 = vadd.f32 %v922_v30, %v921_v1  ;;  %v930_v34 = vadd.f32 %v929_v31, %v928_v20 }
 0x2a4   : > { %743 = vadd.xlane.f32.xlu0 %v742_v41  ;;  %v947_v41 = vmul.f32 %v875_v18, %v875_v18  ;;  %v3617_v18 = vld [vmem:[#allocation7 + $0x10] sm:$0xff]  }
 0x2a5   : > { %v924_v55 = vrot.slane %v923_v21, 1  ;;  %v931_v39 = vrot.slane %v930_v34, 1  ;;  %3455 = vmatprep.subr.bf16.mxu0 %v3617_v18 }
 0x2a6   : > { %746 = vadd.xlane.f32.xlu1 %v745_v43  ;;  %3456 = vmatpush3.bf16.msra.mxu0 %v3617_v18 }
 0x2a7   : > { %v925_v42 = vadd.f32 %v924_v55, %v923_v21  ;;  %v932_v48 = vadd.f32 %v931_v39, %v930_v34  ;;  %3457 = vmatprep.subr.bf16.mxu0 %v3618_v51 }
 0x2a8   : > { %v3630_v52 = vpop.eup %3629 }
 0x2a9   : > { %v939_v5 = vmul.f32 0.0625, %v925_v42  ;;  %v940_v45 = vmul.f32 0.0625, %v932_v48  ;;  %v4517_v38 = vmul.f32 %v3630_v52, %v1039_v0  ;;  %v4522_v46 = vmul.f32 %v3630_v52, %v1040_v24 }
 0x2aa   : > { %3458 = vmatpush3.bf16.msra.mxu0 %v3618_v51 }
 0x2ab   : > { %v3632_v43 = vpop.eup %3631  ;;  %v955_v44 = vsub.f32 %v939_v5, %v947_v41  ;;  %v956_v25 = vsub.f32 %v940_v45, %v948_v57  ;;  %v4554_v57 = vld [vmem:[#allocation8] sm:$0xf] }
 0x2ac   : > { %v4527_v2 = vmul.f32 %v3632_v43, %v1037_v11  ;;  %v4532_v6 = vmul.f32 %v3632_v43, %v1038_v12 }
 0x2ad   : > { %v963_v0 = vmax.f32 %v955_v44, 0.0  ;;  %v964_v54 = vmax.f32 %v956_v25, 0.0 }
 0x2af   : > { %v1051_v35 = vadd.f32 1e-05, %v963_v0  ;;  %v1052_v14 = vadd.f32 1e-05, %v964_v54 }
 0x2b1   : > { %3633 = vrsqrt.f32 %v1051_v35 }
 0x2b2   : > { %3635 = vrsqrt.f32 %v1052_v14 }
 0x2bb   : > { %v3634_v40 = vpop.eup %3633 }
 0x2bc   : > { %v3636_v24 = vpop.eup %3635  ;;  %v4534_v15 = vmul.f32 %v3634_v40, %v1041_v28  ;;  %v4536_v49 = vmul.f32 %v3634_v40, %v1042_v29  ;;  %v1079_v29 = vshrl.u32 %v1078_v8, 7 }
 0x2bd   : > { %v4538_v13 = vmul.f32 %v3636_v24, %v1043_v10  ;;  %v4540_v11 = vmul.f32 %v3636_v24, %v1044_v9 }
 0x2be   : > { %6067 = vst [vmem:[#allocation20_spill] sm:$0xff] %v4534_v15  ;;  %6068 = vst [vmem:[#allocation21_spill] sm:$0xff] %v4536_v49  ;;  %v4552_v42 = vsub.s32 0, %v1079_v29  ;;  %v4564_v24 = vsub.s32 2, %v1079_v29 }
 0x2bf   : > { %6069 = vst [vmem:[#allocation22_spill] sm:$0xff] %v4538_v13  ;;  %6070 = vst [vmem:[#allocation23_spill] sm:$0xff] %v4540_v11  ;;  %v4636_v11 = vsub.s32 3, %v1079_v29 }
 0x2c0   : > { %6071 = vst [vmem:[#allocation24_spill] sm:$0xff] %v4552_v42  ;;  %v4562_v14 = vrot.slane %v4554_v57, %v4552_v42  ;;  %6073 = vst [vmem:[#allocation26_spill] sm:$0xff] %v4564_v24 }
 0x2c1   : > { %6076 = vst [vmem:[#allocation29_spill] sm:$0xff] %v4636_v11 }
 0x2c2   : > { %6072 = vst [vmem:[#allocation25_spill] sm:$0xff] %v4562_v14 }
 0x2f5   : > { %v643_v12 = vpop.xlane.xlu0 %642 }
 0x2f6   : > { %v4542_v30 = vmul.f32 0.03125, %v643_v12 }
 0x2f7   : > { %v646_v1 = vpop.xlane.xlu1 %645 }
 0x2f8   : > { %v4546_v10 = vmul.f32 0.03125, %v646_v1  ;;  %v766_v55 = vmul.f32 %v4542_v30, %v4542_v30 }
 0x2f9   : > { %v637_v20 = vpop.xlane.xlu0 %636 }
 0x2fa   : > { %v4544_v28 = vmul.f32 0.03125, %v637_v20  ;;  %v767_v52 = vmul.f32 %v4546_v10, %v4546_v10 }
 0x2fb   : > { %v702_v31 = vpop.xlane.xlu1 %701 }
 0x2fc   : > { %v764_v9 = vmul.f32 %v4544_v28, %v4544_v28  ;;  %v748_v21 = vmul.f32 0.03125, %v702_v31 }
 0x2fd   : > { %v708_v34 = vpop.xlane.xlu0 %707 }
 0x2fe   : > { %v780_v39 = vsub.f32 %v748_v21, %v764_v9  ;;  %v750_v41 = vmul.f32 0.03125, %v708_v34  ;;  %v4570_v21 = vrot.slane %v4554_v57, %v4564_v24  ;;  %v4574_v34 = vmul.f32 %v4296_v58, %v4562_v14 }
 0x2ff   : > { %v711_v48 = vpop.xlane.xlu1 %710  ;;  %v965_v24 = vsub.f32 %v4298_v59, %v4544_v28 }
 0x300   : > { %v796_v5 = vmax.f32 %v780_v39, 0.0  ;;  %v782_v45 = vsub.f32 %v750_v41, %v766_v55  ;;  %v751_v43 = vmul.f32 0.03125, %v711_v48  ;;  %v1082_v55 = vmul.f32 %v4562_v14, %v4298_v59 }
 0x301   : > { %v640_v44 = vpop.xlane.xlu0 %639  ;;  %v4580_v39 = vmul.f32 %v4304_v62, %v4562_v14  ;;  %v4584_v41 = vmul.f32 %v4562_v14, %v4306_v63  ;;  %v4588_v48 = vmul.f32 %v4324_v16, %v4562_v14  ;;  %v967_v59 = vsub.f32 %v4296_v58, %v4542_v30 }
 0x302   : > { %v981_v25 = vadd.f32 1e-05, %v796_v5  ;;  %v798_v0 = vmax.f32 %v782_v45, 0.0  ;;  %v783_v54 = vsub.f32 %v751_v43, %v767_v52  ;;  %v4558_v35 = vmul.f32 0.03125, %v640_v44 }
 0x303   : > { %v705_v40 = vpop.xlane.xlu1 %704  ;;  %v4590_v45 = vsub.s32 1, %v1079_v29  ;;  %v4594_v43 = vmul.f32 %v4562_v14, %v4326_v19  ;;  %v4598_v44 = vmul.f32 %v4328_v22, %v4562_v14  ;;  %v1141_v29 = vmul.f32 %v4570_v21, %v4488_v17 }
 0x304   : > { %3637 = vrsqrt.f32 %v981_v25  ;;  %v983_v18 = vadd.f32 1e-05, %v798_v0  ;;  %v799_v51 = vmax.f32 %v783_v54, 0.0  ;;  %v765_v12 = vmul.f32 %v4558_v35, %v4558_v35 }
 0x305   : > { %v749_v8 = vmul.f32 0.03125, %v705_v40  ;;  %v655_v1 = vpop.xlane.xlu0 %654  ;;  %6074 = vst [vmem:[#allocation27_spill] sm:$0xff] %v4590_v45  ;;  %v4602_v25 = vmul.f32 %v4562_v14, %v4332_v26  ;;  %v4608_v54 = vmul.f32 %v4344_v47, %v4562_v14  ;;  %v4612_v40 = vmul.f32 %v4562_v14, %v4346_v50 }
 0x306   : > { %3639 = vrsqrt.f32 %v983_v18  ;;  %v984_v20 = vadd.f32 1e-05, %v799_v51  ;;  %v4604_v0 = vmul.f32 0.03125, %v655_v1  ;;  %v4616_v18 = vmul.f32 %v4351_v56, %v4562_v14 }
 0x307   : > { %v781_v31 = vsub.f32 %v749_v8, %v765_v12  ;;  %v658_v9 = vpop.xlane.xlu1 %657  ;;  %v4620_v8 = vmul.f32 %v4562_v14, %v4357_v61  ;;  %v968_v58 = vsub.f32 %v4304_v62, %v4546_v10  ;;  %v4661_v17 = vrot.slane %v4554_v57, %v4636_v11 }
 0x308   : > { %3641 = vrsqrt.f32 %v984_v20  ;;  %6075 = vst [vmem:[#allocation28_spill] sm:$0xff] %v4616_v18  ;;  %v4622_v1 = vmul.f32 0.03125, %v658_v9  ;;  %v1138_v20 = vmul.f32 %v4570_v21, %v4461_v37  ;;  %v770_v13 = vmul.f32 %v4604_v0, %v4604_v0 }
 0x309   : > { %v797_v52 = vmax.f32 %v781_v31, 0.0  ;;  %v649_v5 = vpop.xlane.xlu0 %648  ;;  %v4628_v31 = vmul.f32 %v4570_v21, %v4472_v7  ;;  %v1140_v7 = vmul.f32 %v4570_v21, %v4482_v60  ;;  %v966_v11 = vsub.f32 %v4306_v63, %v4558_v35 }
 0x30a   : > { %v4640_v37 = vmul.f32 0.03125, %v649_v5  ;;  %v771_v15 = vmul.f32 %v4622_v1, %v4622_v1  ;;  %v4677_v63 = vmul.f32 %v4570_v21, %v4500_v53 }
 0x30b   : > { %v982_v51 = vadd.f32 1e-05, %v797_v52  ;;  %v652_v12 = vpop.xlane.xlu1 %651  ;;  %v4634_v52 = vrot.slane %v4554_v57, %v4590_v45 }
 0x30d   : > { %3643 = vrsqrt.f32 %v982_v51  ;;  %v720_v42 = vpop.xlane.xlu0 %719  ;;  %v4646_v51 = vmul.f32 0.03125, %v652_v12 }
 0x30e   : > { %v3638_v9 = vpop.eup %3637  ;;  %v754_v49 = vmul.f32 0.03125, %v720_v42  ;;  %v4654_v42 = vmul.f32 %v4570_v21, %v4495_v3 }
 0x30f   : > { %v1013_v28 = vmul.f32 %v3638_v9, %v965_v24  ;;  %v723_v45 = vpop.xlane.xlu1 %722  ;;  %v769_v36 = vmul.f32 %v4646_v51, %v4646_v51 }
 0x310   : > { %v3640_v33 = vpop.eup %3639  ;;  %v786_v5 = vsub.f32 %v754_v49, %v770_v13  ;;  %v755_v23 = vmul.f32 0.03125, %v723_v45  ;;  %v768_v49 = vmul.f32 %v4640_v37, %v4640_v37 }
 0x311   : > { %v1015_v60 = vmul.f32 %v3640_v33, %v967_v59  ;;  %v714_v30 = vpop.xlane.xlu0 %713  ;;  %v1102_v24 = vmul.f32 %v4634_v52, %v1013_v28 }
 0x312   : > { %v3642_v12 = vpop.eup %3641  ;;  %v802_v13 = vmax.f32 %v786_v5, 0.0  ;;  %v787_v45 = vsub.f32 %v755_v23, %v771_v15  ;;  %v752_v9 = vmul.f32 0.03125, %v714_v30 }
 0x313   : > { %v1016_v3 = vmul.f32 %v3642_v12, %v968_v58  ;;  %v717_v62 = vpop.xlane.xlu1 %716  ;;  %v1118_v33 = vadd.f32 %v1102_v24, %v1082_v55  ;;  %v1104_v10 = vmul.f32 %v4634_v52, %v1015_v60 }
 0x314   : > { %v987_v59 = vadd.f32 1e-05, %v802_v13  ;;  %v803_v28 = vmax.f32 %v787_v45, 0.0  ;;  %v784_v14 = vsub.f32 %v752_v9, %v768_v49  ;;  %v753_v57 = vmul.f32 0.03125, %v717_v62 }
 0x315   : > { %v667_v27 = vpop.xlane.xlu0 %666  ;;  %v1154_v18 = vadd.f32 %v1138_v20, %v1118_v33  ;;  %v1105_v23 = vmul.f32 %v4634_v52, %v1016_v3  ;;  %v1120_v15 = vadd.f32 %v1104_v10, %v4574_v34 }
 0x316   : > { %3645 = vrsqrt.f32 %v987_v59  ;;  %v988_v5 = vadd.f32 1e-05, %v803_v28  ;;  %v800_v58 = vmax.f32 %v784_v14, 0.0  ;;  %v785_v30 = vsub.f32 %v753_v57, %v769_v36 }
 0x317   : > { %v3644_v55 = vpop.eup %3643  ;;  %v4672_v24 = vmul.f32 0.03125, %v667_v27  ;;  %v670_v60 = vpop.xlane.xlu1 %669  ;;  %v1121_v12 = vadd.f32 %v1105_v23, %v4580_v39  ;;  %v1156_v49 = vadd.f32 %v1140_v7, %v1120_v15  ;;  %v1174_v45 = vadd.f32 %v4661_v17, %v1154_v18 }
 0x318   : > { %v1014_v35 = vmul.f32 %v3644_v55, %v966_v11  ;;  %3647 = vrsqrt.f32 %v988_v5  ;;  %v985_v20 = vadd.f32 1e-05, %v800_v58  ;;  %v801_v13 = vmax.f32 %v785_v30, 0.0 }
 0x319   : > { %v661_v34 = vpop.xlane.xlu0 %660  ;;  %v4682_v36 = vmul.f32 %v4570_v21, %v4505_v4  ;;  %v4686_v27 = vmul.f32 %v4570_v21, %v4510_v32  ;;  %v4690_v14 = vmul.f32 %v4570_v21, %v4517_v38  ;;  %v4692_v11 = vmul.f32 0.03125, %v670_v60 }
 0x31a   : > { %3649 = vrsqrt.f32 %v985_v20  ;;  %v986_v53 = vadd.f32 1e-05, %v801_v13  ;;  %v1103_v39 = vmul.f32 %v4634_v52, %v1014_v35  ;;  %v971_v18 = vsub.f32 %v4324_v16, %v4604_v0 }
 0x31b   : > { %v972_v4 = vsub.f32 %v4328_v22, %v4622_v1  ;;  %v664_v7 = vpop.xlane.xlu1 %663  ;;  %v1157_v9 = vadd.f32 %v1141_v29, %v1121_v12  ;;  %v4701_v32 = vmul.f32 %v4570_v21, %v4527_v2  ;;  %v969_v38 = vsub.f32 %v4326_v19, %v4640_v37 }
 0x31c   : > { %3651 = vrsqrt.f32 %v986_v53  ;;  %v774_v3 = vmul.f32 %v4672_v24, %v4672_v24  ;;  %v4707_v62 = vmul.f32 0.03125, %v661_v34  ;;  %v4709_v33 = vmul.f32 0.03125, %v664_v7 }
 0x31d   : > { %v732_v16 = vpop.xlane.xlu0 %731  ;;  %v1119_v22 = vadd.f32 %v1103_v39, %v4584_v41  ;;  %v1176_v0 = vadd.f32 %v4661_v17, %v1156_v49  ;;  %v1177_v1 = vadd.f32 %v4661_v17, %v1157_v9  ;;  %v775_v2 = vmul.f32 %v4692_v11, %v4692_v11 }
 0x31e   : > { %v758_v29 = vmul.f32 0.03125, %v732_v16  ;;  %vm1190_vm1 = vcmp.gt.f32.partialorder %v1174_v45, 0.0  ;;  %v1206_v19 = vmul.f32 0.2, %v1174_v45  ;;  %v772_v41 = vmul.f32 %v4707_v62, %v4707_v62 }
 0x31f   : > { %v735_v37 = vpop.xlane.xlu1 %734  ;;  %v1155_v10 = vadd.f32 %v4628_v31, %v1119_v22  ;;  %vm1192_vm2 = vcmp.gt.f32.partialorder %v1176_v0, 0.0  ;;  %vm1193_vm3 = vcmp.gt.f32.partialorder %v1177_v1, 0.0  ;;  %v1208_v59 = vmul.f32 0.2, %v1176_v0 }
 0x320   : > { %v3646_v28 = vpop.eup %3645  ;;  %v790_v57 = vsub.f32 %v758_v29, %v774_v3  ;;  %v759_v23 = vmul.f32 0.03125, %v735_v37  ;;  %v1209_v15 = vmul.f32 0.2, %v1177_v1  ;;  %v773_v58 = vmul.f32 %v4709_v33, %v4709_v33 }
 0x321   : > { %v1019_v5 = vmul.f32 %v3646_v28, %v971_v18  ;;  %v726_v30 = vpop.xlane.xlu0 %725  ;;  %v1175_v55 = vadd.f32 %v4661_v17, %v1155_v10  ;;  %v1224_v60 = vsel %vm1192_vm2, %v1176_v0, %v1208_v59  ;;  %v970_v22 = vsub.f32 %v4332_v26, %v4646_v51 }
 0x322   : > { %v3648_v12 = vpop.eup %3647  ;;  %v806_v31 = vmax.f32 %v790_v57, 0.0  ;;  %v791_v49 = vsub.f32 %v759_v23, %v775_v2  ;;  %v756_v35 = vmul.f32 0.03125, %v726_v30  ;;  %v1225_v20 = vsel %vm1193_vm3, %v1177_v1, %v1209_v15 }
 0x323   : > { %v1020_v13 = vmul.f32 %v3648_v12, %v972_v4  ;;  %v729_v34 = vpop.xlane.xlu1 %728  ;;  %vm1191_vm4 = vcmp.gt.f32.partialorder %v1175_v55, 0.0  ;;  %v1207_v53 = vmul.f32 0.2, %v1175_v55  ;;  %v1239_v39 = vpack.c.bf16 %v1225_v20, %v1224_v60 }
 0x324   : > { %v3650_v7 = vpop.eup %3649  ;;  %v991_v18 = vadd.f32 1e-05, %v806_v31  ;;  %v807_v9 = vmax.f32 %v791_v49, 0.0  ;;  %v788_v3 = vsub.f32 %v756_v35, %v772_v41  ;;  %v757_v16 = vmul.f32 0.03125, %v729_v34 }
 0x325   : > { %v1017_v0 = vmul.f32 %v3650_v7, %v969_v38  ;;  %v679_v29 = vpop.xlane.xlu0 %678  ;;  %v1222_v2 = vsel %vm1190_vm1, %v1174_v45, %v1206_v19  ;;  %v1223_v37 = vsel %vm1191_vm4, %v1175_v55, %v1207_v53  ;;  %v1108_v41 = vmul.f32 %v4634_v52, %v1019_v5 }
 0x326   : > { %v3652_v10 = vpop.eup %3651  ;;  %3653 = vrsqrt.f32 %v991_v18  ;;  %v992_v4 = vadd.f32 1e-05, %v807_v9  ;;  %v804_v1 = vmax.f32 %v788_v3, 0.0  ;;  %v789_v59 = vsub.f32 %v757_v16, %v773_v58 }
 0x327   : > { %v1018_v28 = vmul.f32 %v3652_v10, %v970_v22  ;;  %v1238_v57 = vpack.c.bf16 %v1223_v37, %v1222_v2  ;;  %v682_v23 = vpop.xlane.xlu1 %681  ;;  %v1106_v15 = vmul.f32 %v4634_v52, %v1017_v0  ;;  %v1109_v51 = vmul.f32 %v4634_v52, %v1020_v13 }
 0x328   : > { %3655 = vrsqrt.f32 %v992_v4  ;;  %v989_v30 = vadd.f32 1e-05, %v804_v1  ;;  %v805_v26 = vmax.f32 %v789_v59, 0.0  ;;  %v975_v45 = vsub.f32 %v4344_v47, %v4672_v24 }
 0x329   : > { %v4731_v38 = vmul.f32 0.03125, %v679_v29  ;;  %3423 = vmatprep.subr.bf16.mxu1 %v1238_v57  ;;  %v673_v19 = vpop.xlane.xlu0 %672  ;;  %v1107_v58 = vmul.f32 %v4634_v52, %v1018_v28  ;;  %v1122_v55 = vadd.f32 %v1106_v15, %v4594_v43  ;;  %v976_v60 = vsub.f32 %v4351_v56, %v4692_v11 }
 0x32a   : > { %3657 = vrsqrt.f32 %v989_v30  ;;  %v990_v5 = vadd.f32 1e-05, %v805_v26  ;;  %3424 = vmatpush3.bf16.msra.mxu1 %v1238_v57  ;;  %v4737_v12 = vmul.f32 0.03125, %v682_v23  ;;  %v4739_v31 = vmul.f32 0.03125, %v673_v19 }
 0x32b   : > { %3425 = vmatprep.subr.bf16.mxu1 %v1239_v39  ;;  %v676_v47 = vpop.xlane.xlu1 %675  ;;  %v1123_v24 = vadd.f32 %v1107_v58, %v4602_v25  ;;  %v1158_v49 = vadd.f32 %v4654_v42, %v1122_v55  ;;  %v1124_v35 = vadd.f32 %v1108_v41, %v4588_v48  ;;  %v973_v43 = vsub.f32 %v4346_v50, %v4707_v62 }
 0x32c   : > { %3659 = vrsqrt.f32 %v990_v5  ;;  %v4746_v56 = vmul.f32 0.03125, %v676_v47  ;;  %v1125_v11 = vadd.f32 %v1109_v51, %v4598_v44  ;;  %v974_v20 = vsub.f32 %v4357_v61, %v4709_v33 }
 0x32d   : > { %v778_v13 = vmul.f32 %v4731_v38, %v4731_v38  ;;  %v738_v34 = vpop.xlane.xlu0 %737  ;;  %v1159_v25 = vadd.f32 %v4677_v63, %v1123_v24  ;;  %v1178_v42 = vadd.f32 %v4661_v17, %v1158_v49  ;;  %v779_v48 = vmul.f32 %v4737_v12, %v4737_v12 }
 0x32e   : > { %v776_v50 = vmul.f32 %v4739_v31, %v4739_v31  ;;  %3426 = vmatpush3.bf16.msra.mxu1 %v1239_v39  ;;  %v760_v62 = vmul.f32 0.03125, %v738_v34  ;;  %v1160_v44 = vadd.f32 %v4682_v36, %v1124_v35  ;;  %v1161_v7 = vadd.f32 %v4686_v27, %v1125_v11 }
 0x32f   : > { %v741_v53 = vpop.xlane.xlu1 %740  ;;  %v1179_v61 = vadd.f32 %v4661_v17, %v1159_v25  ;;  %vm1194_vm5 = vcmp.gt.f32.partialorder %v1178_v42, 0.0  ;;  %v1210_v33 = vmul.f32 0.2, %v1178_v42  ;;  %v777_v18 = vmul.f32 %v4746_v56, %v4746_v56 }
 0x330   : > { %v3654_v63 = vpop.eup %3653  ;;  %v792_v9 = vsub.f32 %v760_v62, %v776_v50  ;;  %v761_v3 = vmul.f32 0.03125, %v741_v53  ;;  %v1180_v16 = vadd.f32 %v4661_v17, %v1160_v44  ;;  %v1181_v4 = vadd.f32 %v4661_v17, %v1161_v7 }
 0x331   : > { %v1023_v22 = vmul.f32 %v3654_v63, %v975_v45  ;;  %v744_v39 = vpop.xlane.xlu0 %743  ;;  %vm1195_vm6 = vcmp.gt.f32.partialorder %v1179_v61, 0.0  ;;  %v1211_v0 = vmul.f32 0.2, %v1179_v61  ;;  %v1226_v36 = vsel %vm1194_vm5, %v1178_v42, %v1210_v33 }
 0x332   : > { %v3656_v29 = vpop.eup %3655  ;;  %v808_v2 = vmax.f32 %v792_v9, 0.0  ;;  %v793_v37 = vsub.f32 %v761_v3, %v777_v18  ;;  %v762_v10 = vmul.f32 0.03125, %v744_v39  ;;  %vm1196_vm7 = vcmp.gt.f32.partialorder %v1180_v16, 0.0  ;;  %v6079_v9 = vld [vmem:[#allocation25_spill] sm:$0xff] }
 0x333   : > { %v1024_v27 = vmul.f32 %v3656_v29, %v976_v60  ;;  %v747_v1 = vpop.xlane.xlu1 %746  ;;  %v1227_v59 = vsel %vm1195_vm6, %v1179_v61, %v1211_v0  ;;  %v1212_v28 = vmul.f32 0.2, %v1180_v16  ;;  %vm1197_vm8 = vcmp.gt.f32.partialorder %v1181_v4, 0.0  ;;  %v6081_v0 = vld [vmem:[#allocation16_spill] sm:$0xff] }
 0x334   : > { %v3658_v57 = vpop.eup %3657  ;;  %v993_v23 = vadd.f32 1e-05, %v808_v2  ;;  %v809_v15 = vmax.f32 %v793_v37, 0.0  ;;  %v794_v41 = vsub.f32 %v762_v10, %v778_v13  ;;  %v763_v30 = vmul.f32 0.03125, %v747_v1  ;;  %v6082_v29 = vld [vmem:[#allocation20_spill] sm:$0xff] }
 0x335   : > { %v1021_v26 = vmul.f32 %v3658_v57, %v973_v43  ;;  %v1240_v51 = vpack.c.bf16 %v1227_v59, %v1226_v36  ;;  %v1213_v45 = vmul.f32 0.2, %v1181_v4  ;;  %v1228_v60 = vsel %vm1196_vm7, %v1180_v16, %v1212_v28 }
 0x336   : > { %v3660_v19 = vpop.eup %3659  ;;  %3661 = vrsqrt.f32 %v993_v23  ;;  %v994_v58 = vadd.f32 1e-05, %v809_v15  ;;  %v810_v55 = vmax.f32 %v794_v41, 0.0  ;;  %v795_v5 = vsub.f32 %v763_v30, %v779_v48  ;;  %v6083_v15 = vld [vmem:[#allocation18_spill] sm:$0xff] }
 0x337   : > { %v1022_v47 = vmul.f32 %v3660_v19, %v974_v20  ;;  %3427 = vmatprep.subr.bf16.mxu1 %v1240_v51  ;;  %v1229_v24 = vsel %vm1197_vm8, %v1181_v4, %v1213_v45  ;;  %v1110_v49 = vmul.f32 %v4634_v52, %v1021_v26  ;;  %v1112_v25 = vmul.f32 %v4634_v52, %v1023_v22 }
 0x338   : > { %3663 = vrsqrt.f32 %v994_v58  ;;  %v995_v35 = vadd.f32 1e-05, %v810_v55  ;;  %v811_v11 = vmax.f32 %v795_v5, 0.0  ;;  %3428 = vmatpush3.bf16.msra.mxu1 %v1240_v51  ;;  %v1241_v43 = vpack.c.bf16 %v1229_v24, %v1228_v60 }
 0x339   : > { %v1111_v13 = vmul.f32 %v4634_v52, %v1022_v47  ;;  %v1126_v34 = vadd.f32 %v1110_v49, %v4612_v40  ;;  %v1113_v42 = vmul.f32 %v4634_v52, %v1024_v27  ;;  %v1147_v48 = vmul.f32 %v4570_v21, %v4532_v6  ;;  %v6077_v40 = vld [vmem:[#allocation28_spill] sm:$0xff]  ;;  %v6078_v6 = vld [vmem:[#allocation17_spill] sm:$0xff] }
 0x33a   : > { %3665 = vrsqrt.f32 %v995_v35  ;;  %v996_v20 = vadd.f32 1e-05, %v811_v11  ;;  %3429 = vmatprep.subr.bf16.mxu1 %v1241_v43  ;;  %v1149_v50 = vmul.f32 %v4570_v21, %v4522_v46  ;;  %v1128_v53 = vadd.f32 %v1112_v25, %v4608_v54  ;;  %v6080_v46 = vld [vmem:[#allocation19_spill] sm:$0xff]  ;;  %v6084_v47 = vld [vmem:[#allocation21_spill] sm:$0xff] }
 0x33b   : > { %v1127_v62 = vadd.f32 %v1111_v13, %v4620_v8  ;;  %v1162_v44 = vadd.f32 %v4701_v32, %v1126_v34  ;;  %v1129_v61 = vadd.f32 %v1113_v42, %v6077_v40  ;;  %v1094_v3 = vmul.f32 %v6079_v9, %v6078_v6  ;;  %v6085_v42 = vld [vmem:[#allocation22_spill] sm:$0xff] }
 0x33c   : > { %3667 = vrsqrt.f32 %v996_v20  ;;  %3430 = vmatpush3.bf16.msra.mxu1 %v1241_v43  ;;  %v1164_v63 = vadd.f32 %v4690_v14, %v1128_v53  ;;  %v1095_v8 = vmul.f32 %v6079_v9, %v6080_v46  ;;  %v977_v32 = vsub.f32 %v6078_v6, %v4739_v31 }
 0x33d   : > { %v1163_v33 = vadd.f32 %v1147_v48, %v1127_v62  ;;  %v1182_v7 = vadd.f32 %v4661_v17, %v1162_v44  ;;  %v1165_v18 = vadd.f32 %v1149_v50, %v1129_v61  ;;  %v979_v36 = vsub.f32 %v6081_v0, %v4731_v38  ;;  %v6086_v44 = vld [vmem:[#allocation23_spill] sm:$0xff] }
 0x33e   : > { %v1184_v22 = vadd.f32 %v4661_v17, %v1164_v63  ;;  %v1150_v2 = vmul.f32 %v4570_v21, %v6082_v29  ;;  %v978_v37 = vsub.f32 %v6080_v46, %v4746_v56  ;;  %v980_v41 = vsub.f32 %v6083_v15, %v4737_v12 }
 0x33f   : > { %v1183_v54 = vadd.f32 %v4661_v17, %v1163_v33  ;;  %v1214_v16 = vmul.f32 0.2, %v1182_v7  ;;  %vm1198_vm9 = vcmp.gt.f32.partialorder %v1182_v7, 0.0  ;;  %v1185_v14 = vadd.f32 %v4661_v17, %v1165_v18 }
 0x340   : > { %v3662_v39 = vpop.eup %3661  ;;  %vm1200_vm11 = vcmp.gt.f32.partialorder %v1184_v22, 0.0  ;;  %v1216_v27 = vmul.f32 0.2, %v1184_v22  ;;  %v1096_v5 = vmul.f32 %v6081_v0, %v6079_v9  ;;  %v1151_v60 = vmul.f32 %v4570_v21, %v6084_v47  ;;  %v3771_v0 = vld [vmem:[%s4238_s12 + $0x38] sm:$0xff]  }
 0x341   : > { %v1025_v10 = vmul.f32 %v3662_v39, %v977_v32  ;;  %vm1199_vm10 = vcmp.gt.f32.partialorder %v1183_v54, 0.0  ;;  %v1215_v31 = vmul.f32 0.2, %v1183_v54  ;;  %vm1201_vm12 = vcmp.gt.f32.partialorder %v1185_v14, 0.0  ;;  %v3765_v32 = vld [vmem:[%s4238_s12 + $0x8] sm:$0xff]   ;;  %v3770_v39 = vld [vmem:[%s4238_s12 + $0x30] sm:$0xff]  }
 0x342   : > { %v3664_v4 = vpop.eup %3663  ;;  %v1217_v1 = vmul.f32 0.2, %v1185_v14  ;;  %v1230_v28 = vsel %vm1198_vm9, %v1182_v7, %v1214_v16  ;;  %v1232_v26 = vsel %vm1200_vm11, %v1184_v22, %v1216_v27  ;;  %v1097_v11 = vmul.f32 %v6083_v15, %v6079_v9  ;;  %v3768_v16 = vld [vmem:[%s4238_s12 + $0x20] sm:$0xff]   ;;  %v3769_v22 = vld [vmem:[%s4238_s12 + $0x28] sm:$0xff]  }
 0x343   : > { %v1026_v59 = vmul.f32 %v3664_v4, %v978_v37  ;;  %v1231_v38 = vsel %vm1199_vm10, %v1183_v54, %v1215_v31  ;;  %v1114_v57 = vmul.f32 %v4634_v52, %v1025_v10  ;;  %v1152_v20 = vmul.f32 %v4570_v21, %v6085_v42  ;;  %v3767_v54 = vld [vmem:[%s4238_s12 + $0x18] sm:$0xff]  }
 0x344   : > { %v3666_v23 = vpop.eup %3665  ;;  %v1242_v30 = vpack.c.bf16 %v1231_v38, %v1230_v28  ;;  %v1233_v56 = vsel %vm1201_vm12, %v1185_v14, %v1217_v1  ;;  %v1153_v53 = vmul.f32 %v4570_v21, %v6086_v44 }
 0x345   : > { %v1027_v51 = vmul.f32 %v3666_v23, %v979_v36  ;;  %v1243_v45 = vpack.c.bf16 %v1233_v56, %v1232_v26  ;;  %v1115_v19 = vmul.f32 %v4634_v52, %v1026_v59  ;;  %v1130_v58 = vadd.f32 %v1114_v57, %v1094_v3  ;;  %v3772_v36 = vld [vmem:[%s4238_s12] sm:$0xff]  }
 0x346   : > { %v3668_v55 = vpop.eup %3667  ;;  %3431 = vmatprep.subr.bf16.mxu1 %v1242_v30 }
 0x347   : > { %v1028_v24 = vmul.f32 %v3668_v55, %v980_v41  ;;  %3432 = vmatpush3.bf16.msra.mxu1 %v1242_v30  ;;  %v1131_v49 = vadd.f32 %v1115_v19, %v1095_v8  ;;  %v1166_v12 = vadd.f32 %v1150_v2, %v1130_v58  ;;  %v1116_v35 = vmul.f32 %v4634_v52, %v1027_v51 }
 0x348   : > { %3433 = vmatprep.subr.bf16.mxu1 %v1243_v45 }
 0x349   : > { %v1167_v43 = vadd.f32 %v1151_v60, %v1131_v49  ;;  %v1186_v13 = vadd.f32 %v4661_v17, %v1166_v12  ;;  %v1117_v34 = vmul.f32 %v4634_v52, %v1028_v24  ;;  %v1132_v25 = vadd.f32 %v1116_v35, %v1096_v5 }
 0x34b   : > { %3434 = vmatpush3.bf16.msra.mxu1 %v1243_v45  ;;  %v1187_v48 = vadd.f32 %v4661_v17, %v1167_v43  ;;  %v1218_v50 = vmul.f32 0.2, %v1186_v13  ;;  %v1133_v62 = vadd.f32 %v1117_v34, %v1097_v11  ;;  %vm1202_vm13 = vcmp.gt.f32.partialorder %v1186_v13, 0.0 }
 0x34c   : > { %v1168_v40 = vadd.f32 %v1152_v20, %v1132_v25 }
 0x34d   : > { %vm1203_vm14 = vcmp.gt.f32.partialorder %v1187_v48, 0.0  ;;  %v1219_v61 = vmul.f32 0.2, %v1187_v48  ;;  %v1169_v33 = vadd.f32 %v1153_v53, %v1133_v62  ;;  %v1234_v52 = vsel %vm1202_vm13, %v1186_v13, %v1218_v50 }
 0x34e   : > { %v1188_v7 = vadd.f32 %v4661_v17, %v1168_v40 }
 0x34f   : > { %v1235_v63 = vsel %vm1203_vm14, %v1187_v48, %v1219_v61  ;;  %v1189_v18 = vadd.f32 %v4661_v17, %v1169_v33  ;;  %v3766_v17 = vld [vmem:[%s4238_s12 + $0x10] sm:$0xff]  }
 0x350   : > { %v1244_v6 = vpack.c.bf16 %v1235_v63, %v1234_v52  ;;  %vm1204_vm15 = vcmp.gt.f32.partialorder %v1188_v7, 0.0  ;;  %v1220_v9 = vmul.f32 0.2, %v1188_v7 }
 0x351   : > { %vm1205_vm1 = vcmp.gt.f32.partialorder %v1189_v18, 0.0  ;;  %v1221_v21 = vmul.f32 0.2, %v1189_v18 }
 0x352   : > { %3435 = vmatprep.subr.bf16.mxu1 %v1244_v6  ;;  %v1236_v3 = vsel %vm1204_vm15, %v1188_v7, %v1220_v9 }
 0x353   : > { %3436 = vmatpush3.bf16.msra.mxu1 %v1244_v6  ;;  %v1237_v46 = vsel %vm1205_vm1, %v1189_v18, %v1221_v21 }
 0x354   : > { %v1245_v8 = vpack.c.bf16 %v1237_v46, %v1236_v3 }
 0x356   : > { %3437 = vmatprep.subr.bf16.mxu1 %v1245_v8 }
 0x357   : > { %3438 = vmatpush3.bf16.msra.mxu1 %v1245_v8 }
 0x35a   : > { %3440 = vmatmul.mubr.bf16.vlgmr.msra.gmra.mrb[16].mxu1 %v3765_v32 }
 0x35b   : > { %3443 = vmatprep.mubr.bf16.mxu1 %v3766_v17 }
 0x362   : > { %3444 = vmatmul.mubr.bf16.gmra.mrb[20].mxu1 %v3767_v54 }
 0x363   : > { %3447 = vmatprep.mubr.bf16.mxu1 %v3768_v16 }
 0x36a   : > { %3448 = vmatmul.mubr.bf16.gmra.mrb[24].mxu1 %v3769_v22 }
 0x36b   : > { %3451 = vmatprep.mubr.bf16.mxu1 %v3770_v39 }
 0x372   : > { %3452 = vmatmul.mubr.bf16.gmra.mrb[28].mxu1 %v3771_v0 }
 0x373   : > { %3491 = vmatprep.mubr.bf16.mxu1 %v3772_v36 }
 0x42d   : > { %v3441_v14 = vpop.f32.mrb[16].mxu1 }
 0x42e   : > { %v1280_v29 = vpop.f32.mrb[17].mxu1 }
 0x42f   : > { %v3442_v2 = vpop.f32.mrb[18].mxu1 }
 0x430   : > { %v1344_v37 = vpack.c.bf16 %v3442_v2, %v3441_v14  ;;  %v1283_v10 = vpop.f32.mrb[19].mxu1 }
 0x431   : > { %v1343_v31 = vpack.c.bf16 %v1283_v10, %v1280_v29 }
 0x433   : > { %3459 = vmatprep.mubr.msk.bf16.mxu0 %vm497_vm0, %v1343_v31 }
 0x434   : > { %3460 = vmatmul.mubr.msk.bf16.vlgmr.msra.gmra.mrb[16].mxu0 %vm497_vm0, %v1344_v37 }
 0x435   : > { %v3445_v4 = vpop.f32.mrb[20].mxu1 }
 0x436   : > { %v1296_v27 = vpop.f32.mrb[21].mxu1 }
 0x437   : > { %v3446_v1 = vpop.f32.mrb[22].mxu1 }
 0x438   : > { %v1346_v59 = vpack.c.bf16 %v3446_v1, %v3445_v4  ;;  %v1299_v28 = vpop.f32.mrb[23].mxu1 }
 0x439   : > { %v1345_v38 = vpack.c.bf16 %v1299_v28, %v1296_v27 }
 0x43b   : > { %3463 = vmatprep.mubr.msk.bf16.mxu0 %vm497_vm0, %v1345_v38 }
 0x43c   : > { %3464 = vmatmul.mubr.msk.bf16.gmra.mrb[20].mxu0 %vm497_vm0, %v1346_v59 }
 0x43d   : > { %v3449_v57 = vpop.f32.mrb[24].mxu1 }
 0x43e   : > { %v1312_v23 = vpop.f32.mrb[25].mxu1 }
 0x43f   : > { %v3450_v15 = vpop.f32.mrb[26].mxu1 }
 0x440   : > { %v1348_v41 = vpack.c.bf16 %v3450_v15, %v3449_v57  ;;  %v1315_v30 = vpop.f32.mrb[27].mxu1 }
 0x441   : > { %v1347_v26 = vpack.c.bf16 %v1315_v30, %v1312_v23 }
 0x443   : > { %3467 = vmatprep.mubr.msk.bf16.mxu0 %vm497_vm0, %v1347_v26 }
 0x444   : > { %3468 = vmatmul.mubr.msk.bf16.gmra.mrb[24].mxu0 %vm497_vm0, %v1348_v41 }
 0x445   : > { %v3453_v56 = vpop.f32.mrb[28].mxu1 }
 0x446   : > { %v1328_v51 = vpop.f32.mrb[29].mxu1 }
 0x447   : > { %v3454_v45 = vpop.f32.mrb[30].mxu1 }
 0x448   : > { %v1350_v19 = vpack.c.bf16 %v3454_v45, %v3453_v56  ;;  %v1331_v58 = vpop.f32.mrb[31].mxu1 }
 0x449   : > { %v1349_v55 = vpack.c.bf16 %v1331_v58, %v1328_v51 }
 0x44b   : > { %3471 = vmatprep.mubr.msk.bf16.mxu0 %vm497_vm0, %v1349_v55 }
 0x44c   : > { %3472 = vmatmul.mubr.msk.bf16.gmra.mrb[28].mxu0 %vm497_vm0, %v1350_v19 }
 0x507   : > { %v4833_v5 = vpop.f32.mrb[16].mxu0 }
 0x508   : > { %v4835_v47 = vpop.f32.mrb[17].mxu0  ;;  %v1511_v60 = vsel %vm497_vm0, %v4833_v5, 0.0  ;;  %v1491_v24 = vmul.f32 %v4833_v5, %v4833_v5 }
 0x509   : > { %1512 = vadd.xlane.f32.xlu0 %v1511_v60  ;;  %v4841_v49 = vpop.f32.mrb[18].mxu0  ;;  %v1489_v43 = vmul.f32 %v4835_v47, %v4835_v47  ;;  %v1505_v34 = vsel %vm497_vm0, %v4835_v47, 0.0 }
 0x50a   : > { %v4843_v12 = vpop.f32.mrb[19].mxu0  ;;  %v1514_v35 = vsel %vm497_vm0, %v4841_v49, 0.0  ;;  %v1492_v11 = vmul.f32 %v4841_v49, %v4841_v49  ;;  %v1575_v20 = vsel %vm497_vm0, %v1491_v24, 0.0 }
 0x50b   : > { %1515 = vadd.xlane.f32.xlu1 %v1514_v35  ;;  %v1688_v13 = vadd.f32 %v1514_v35, %v1511_v60  ;;  %v1508_v25 = vsel %vm497_vm0, %v4843_v12, 0.0  ;;  %v1490_v50 = vmul.f32 %v4843_v12, %v4843_v12  ;;  %v1569_v40 = vsel %vm497_vm0, %v1489_v43, 0.0 }
 0x50c   : > { %v1681_v42 = vadd.f32 %v1508_v25, %v1505_v34  ;;  %v1578_v48 = vsel %vm497_vm0, %v1492_v11, 0.0 }
 0x50d   : > { %v1689_v62 = vrot.slane %v1688_v13, 4  ;;  %1506 = vadd.xlane.f32.xlu0 %v1505_v34  ;;  %v1752_v44 = vadd.f32 %v1578_v48, %v1575_v20  ;;  %v1572_v61 = vsel %vm497_vm0, %v1490_v50, 0.0 }
 0x50e   : > { %v1682_v53 = vrot.slane %v1681_v42, 4  ;;  %v1745_v63 = vadd.f32 %v1572_v61, %v1569_v40 }
 0x50f   : > { %v1690_v33 = vadd.f32 %v1689_v62, %v1688_v13  ;;  %1509 = vadd.xlane.f32.xlu1 %v1508_v25  ;;  %v4861_v7 = vpop.f32.mrb[20].mxu0  ;;  %v1753_v52 = vrot.slane %v1752_v44, 4 }
 0x510   : > { %v1683_v18 = vadd.f32 %v1682_v53, %v1681_v42  ;;  %v4863_v6 = vpop.f32.mrb[21].mxu0  ;;  %v1746_v46 = vrot.slane %v1745_v63, 4  ;;  %v1523_v8 = vsel %vm497_vm0, %v4861_v7, 0.0  ;;  %v1495_v2 = vmul.f32 %v4861_v7, %v4861_v7 }
 0x511   : > { %v1691_v9 = vrot.slane %v1690_v33, 2  ;;  %1576 = vadd.xlane.f32.xlu0 %v1575_v20  ;;  %v4865_v21 = vpop.f32.mrb[22].mxu0  ;;  %v1754_v3 = vadd.f32 %v1753_v52, %v1752_v44  ;;  %v1517_v16 = vsel %vm497_vm0, %v4863_v6, 0.0  ;;  %v1493_v55 = vmul.f32 %v4863_v6, %v4863_v6 }
 0x512   : > { %v1684_v32 = vrot.slane %v1683_v18, 2  ;;  %v4869_v17 = vpop.f32.mrb[23].mxu0  ;;  %v1526_v54 = vsel %vm497_vm0, %v4865_v21, 0.0  ;;  %v1747_v0 = vadd.f32 %v1746_v46, %v1745_v63  ;;  %v1496_v59 = vmul.f32 %v4865_v21, %v4865_v21 }
 0x513   : > { %v1692_v22 = vadd.f32 %v1691_v9, %v1690_v33  ;;  %v1755_v39 = vrot.slane %v1754_v3, 2  ;;  %1579 = vadd.xlane.f32.xlu1 %v1578_v48  ;;  %v1702_v14 = vadd.f32 %v1526_v54, %v1523_v8  ;;  %v1520_v29 = vsel %vm497_vm0, %v4869_v17, 0.0 }
 0x514   : > { %v1685_v36 = vadd.f32 %v1684_v32, %v1683_v18  ;;  %v1748_v31 = vrot.slane %v1747_v0, 2  ;;  %v1695_v4 = vadd.f32 %v1520_v29, %v1517_v16  ;;  %v1587_v56 = vsel %vm497_vm0, %v1495_v2, 0.0 }
 0x515   : > { %v1693_v37 = vrot.slane %v1692_v22, 1  ;;  %v1756_v10 = vadd.f32 %v1755_v39, %v1754_v3  ;;  %1570 = vadd.xlane.f32.xlu0 %v1569_v40  ;;  %v1703_v1 = vrot.slane %v1702_v14, 4  ;;  %v1590_v43 = vsel %vm497_vm0, %v1496_v59, 0.0 }
 0x516   : > { %v1686_v27 = vrot.slane %v1685_v36, 1  ;;  %v1749_v57 = vadd.f32 %v1748_v31, %v1747_v0  ;;  %v1696_v15 = vrot.slane %v1695_v4, 4  ;;  %v1766_v33 = vadd.f32 %v1590_v43, %v1587_v56 }
 0x517   : > { %v1694_v28 = vadd.f32 %v1693_v37, %v1692_v22  ;;  %v1757_v38 = vrot.slane %v1756_v10, 1  ;;  %1573 = vadd.xlane.f32.xlu1 %v1572_v61  ;;  %v4881_v23 = vpop.f32.mrb[24].mxu0  ;;  %v1704_v26 = vadd.f32 %v1703_v1, %v1702_v14  ;;  %v1494_v52 = vmul.f32 %v4869_v17, %v4869_v17 }
 0x518   : > { %v1687_v41 = vadd.f32 %v1686_v27, %v1685_v36  ;;  %v4883_v30 = vpop.f32.mrb[25].mxu0  ;;  %v1750_v19 = vrot.slane %v1749_v57, 1  ;;  %v1697_v11 = vadd.f32 %v1696_v15, %v1695_v4  ;;  %v1581_v46 = vsel %vm497_vm0, %v1493_v55, 0.0 }
 0x519   : > { %v4886_v51 = vmul.f32 0.0625, %v1694_v28  ;;  %v1758_v45 = vadd.f32 %v1757_v38, %v1756_v10  ;;  %1524 = vadd.xlane.f32.xlu0 %v1523_v8  ;;  %v4888_v58 = vpop.f32.mrb[26].mxu0  ;;  %v1705_v35 = vrot.slane %v1704_v26, 2  ;;  %v1535_v4 = vsel %vm497_vm0, %v4881_v23, 0.0 }
 0x51a   : > { %v4892_v60 = vmul.f32 0.0625, %v1687_v41  ;;  %v4894_v24 = vpop.f32.mrb[27].mxu0  ;;  %v1751_v62 = vadd.f32 %v1750_v19, %v1749_v57  ;;  %v1698_v40 = vrot.slane %v1697_v11, 2  ;;  %v1538_v28 = vsel %vm497_vm0, %v4888_v58, 0.0 }
 0x51b   : > { %v1899_v13 = vsub.f32 %v4833_v5, %v4886_v51  ;;  %v1900_v34 = vsub.f32 %v4841_v49, %v4886_v51  ;;  %v1802_v25 = vmul.f32 0.0625, %v1758_v45  ;;  %v1810_v42 = vmul.f32 %v4886_v51, %v4886_v51  ;;  %1527 = vadd.xlane.f32.xlu1 %v1526_v54 }
 0x51c   : > { %v1897_v20 = vsub.f32 %v4835_v47, %v4892_v60  ;;  %v1898_v48 = vsub.f32 %v4843_v12, %v4892_v60  ;;  %v1809_v50 = vmul.f32 %v4892_v60, %v4892_v60  ;;  %v1706_v53 = vadd.f32 %v1705_v35, %v1704_v26 }
 0x51d   : > { %v1818_v44 = vsub.f32 %v1802_v25, %v1810_v42  ;;  %1518 = vadd.xlane.f32.xlu0 %v1517_v16  ;;  %v1801_v61 = vmul.f32 0.0625, %v1751_v62  ;;  %v1699_v9 = vadd.f32 %v1698_v40, %v1697_v11  ;;  %v1767_v54 = vrot.slane %v1766_v33, 4 }
 0x51e   : > { %v1707_v18 = vrot.slane %v1706_v53, 1  ;;  %v1584_v16 = vsel %vm497_vm0, %v1494_v52, 0.0  ;;  %v1716_v45 = vadd.f32 %v1538_v28, %v1535_v4  ;;  %v1529_v11 = vsel %vm497_vm0, %v4883_v30, 0.0 }
 0x51f   : > { %v1826_v63 = vmax.f32 %v1818_v44, 0.0  ;;  %1521 = vadd.xlane.f32.xlu1 %v1520_v29  ;;  %v4911_v3 = vpop.f32.mrb[28].mxu0  ;;  %v1817_v8 = vsub.f32 %v1801_v61, %v1809_v50  ;;  %v1700_v0 = vrot.slane %v1699_v9, 1  ;;  %v1768_v29 = vadd.f32 %v1767_v54, %v1766_v33 }
 0x520   : > { %6087 = vst [vmem:[#allocation28_spill] sm:$0xff] %v4911_v3  ;;  %v4914_v32 = vpop.f32.mrb[29].mxu0  ;;  %v1708_v39 = vadd.f32 %v1707_v18, %v1706_v53  ;;  %v1759_v37 = vadd.f32 %v1584_v16, %v1581_v46  ;;  %v1717_v42 = vrot.slane %v1716_v45, 4  ;;  %v1532_v50 = vsel %vm497_vm0, %v4894_v24, 0.0 }
 0x521   : > { %6088 = vst [vmem:[#allocation17_spill] sm:$0xff] %v4914_v32  ;;  %v1914_v22 = vadd.f32 1e-05, %v1826_v63  ;;  %1588 = vadd.xlane.f32.xlu0 %v1587_v56  ;;  %v4917_v36 = vpop.f32.mrb[30].mxu0  ;;  %v1825_v14 = vmax.f32 %v1817_v8, 0.0  ;;  %v1701_v31 = vadd.f32 %v1700_v0, %v1699_v9  ;;  %v1769_v1 = vrot.slane %v1768_v29, 2 }
 0x522   : > { %6089 = vst [vmem:[#allocation25_spill] sm:$0xff] %v4917_v36  ;;  %v4919_v2 = vpop.f32.mrb[31].mxu0  ;;  %v4921_v10 = vmul.f32 0.0625, %v1708_v39  ;;  %v1760_v59 = vrot.slane %v1759_v37, 4  ;;  %v1709_v62 = vadd.f32 %v1532_v50, %v1529_v11  ;;  %v1499_v44 = vmul.f32 %v4881_v23, %v4881_v23 }
 0x523   : > { %6090 = vst [vmem:[#allocation19_spill] sm:$0xff] %v4919_v2  ;;  %3669 = vrsqrt.f32 %v1914_v22  ;;  %1591 = vadd.xlane.f32.xlu1 %v1590_v43  ;;  %v1913_v27 = vadd.f32 1e-05, %v1825_v14  ;;  %v4931_v15 = vmul.f32 0.0625, %v1701_v31  ;;  %v1770_v26 = vadd.f32 %v1769_v1, %v1768_v29 }
 0x524   : > { %v1903_v38 = vsub.f32 %v4861_v7, %v4921_v10  ;;  %v1904_v57 = vsub.f32 %v4865_v21, %v4921_v10  ;;  %v1812_v41 = vmul.f32 %v4921_v10, %v4921_v10  ;;  %v1761_v56 = vadd.f32 %v1760_v59, %v1759_v37 }
 0x525   : > { %1582 = vadd.xlane.f32.xlu0 %v1581_v46  ;;  %3671 = vrsqrt.f32 %v1913_v27  ;;  %v1901_v19 = vsub.f32 %v4863_v6, %v4931_v15  ;;  %v1902_v55 = vsub.f32 %v4869_v17, %v4931_v15  ;;  %v1811_v35 = vmul.f32 %v4931_v15, %v4931_v15 }
 0x526   : > { %v1771_v43 = vrot.slane %v1770_v26, 1  ;;  %v1762_v25 = vrot.slane %v1761_v56, 2  ;;  %v1500_v53 = vmul.f32 %v4888_v58, %v4888_v58  ;;  %v1497_v40 = vmul.f32 %v4883_v30, %v4883_v30 }
 0x527   : > { %1585 = vadd.xlane.f32.xlu1 %v1584_v16  ;;  %v1718_v52 = vadd.f32 %v1717_v42, %v1716_v45  ;;  %v1498_v63 = vmul.f32 %v4894_v24, %v4894_v24  ;;  %v1710_v18 = vrot.slane %v1709_v62, 4  ;;  %v1599_v9 = vsel %vm497_vm0, %v1499_v44, 0.0 }
 0x528   : > { %v1772_v61 = vadd.f32 %v1771_v43, %v1770_v26  ;;  %v1763_v33 = vadd.f32 %v1762_v25, %v1761_v56  ;;  %v1602_v46 = vsel %vm497_vm0, %v1500_v53, 0.0  ;;  %v1593_v8 = vsel %vm497_vm0, %v1497_v40, 0.0 }
 0x529   : > { %1536 = vadd.xlane.f32.xlu0 %v1535_v4  ;;  %v1719_v22 = vrot.slane %v1718_v52, 2  ;;  %v1780_v39 = vadd.f32 %v1602_v46, %v1599_v9  ;;  %v1711_v14 = vadd.f32 %v1710_v18, %v1709_v62  ;;  %v1596_v29 = vsel %vm497_vm0, %v1498_v63, 0.0 }
 0x52a   : > { %v1804_v54 = vmul.f32 0.0625, %v1772_v61  ;;  %v1764_v16 = vrot.slane %v1763_v33, 1  ;;  %v1547_v37 = vsel %vm497_vm0, %v4911_v3, 0.0  ;;  %v1550_v31 = vsel %vm497_vm0, %v4917_v36, 0.0 }
 0x52b   : > { %1539 = vadd.xlane.f32.xlu1 %v1538_v28  ;;  %v1720_v1 = vadd.f32 %v1719_v22, %v1718_v52  ;;  %v1781_v59 = vrot.slane %v1780_v39, 4  ;;  %v1712_v28 = vrot.slane %v1711_v14, 2  ;;  %v1773_v26 = vadd.f32 %v1596_v29, %v1593_v8 }
 0x52c   : > { %v1820_v4 = vsub.f32 %v1804_v54, %v1812_v41  ;;  %v1765_v27 = vadd.f32 %v1764_v16, %v1763_v33  ;;  %v1730_v56 = vadd.f32 %v1550_v31, %v1547_v37  ;;  %v1541_v45 = vsel %vm497_vm0, %v4914_v32, 0.0 }
 0x52d   : > { %v4956_v0 = vpop.eup %3669  ;;  %1530 = vadd.xlane.f32.xlu0 %v1529_v11  ;;  %v1721_v42 = vrot.slane %v1720_v1, 1  ;;  %v1782_v62 = vadd.f32 %v1781_v59, %v1780_v39  ;;  %v1713_v44 = vadd.f32 %v1712_v28, %v1711_v14  ;;  %v1774_v53 = vrot.slane %v1773_v26, 4 }
 0x52e   : > { %v1828_v43 = vmax.f32 %v1820_v4, 0.0  ;;  %v1803_v25 = vmul.f32 0.0625, %v1765_v27  ;;  %v1731_v41 = vrot.slane %v1730_v56, 4  ;;  %v1544_v40 = vsel %vm497_vm0, %v4919_v2, 0.0 }
 0x52f   : > { %1533 = vadd.xlane.f32.xlu1 %v1532_v50  ;;  %v4965_v11 = vpop.eup %3671  ;;  %v1722_v33 = vadd.f32 %v1721_v42, %v1720_v1  ;;  %v1783_v52 = vrot.slane %v1782_v62, 2  ;;  %v1714_v63 = vrot.slane %v1713_v44, 1  ;;  %v1775_v18 = vadd.f32 %v1774_v53, %v1773_v26 }
 0x530   : > { %v1916_v50 = vadd.f32 1e-05, %v1828_v43  ;;  %v1819_v61 = vsub.f32 %v1803_v25, %v1811_v35  ;;  %v1732_v54 = vadd.f32 %v1731_v41, %v1730_v56  ;;  %v1723_v16 = vadd.f32 %v1544_v40, %v1541_v45 }
 0x531   : > { %1600 = vadd.xlane.f32.xlu0 %v1599_v9  ;;  %v4969_v4 = vmul.f32 0.0625, %v1722_v33  ;;  %v1784_v39 = vadd.f32 %v1783_v52, %v1782_v62  ;;  %v1715_v9 = vadd.f32 %v1714_v63, %v1713_v44  ;;  %v1776_v14 = vrot.slane %v1775_v18, 2 }
 0x532   : > { %3673 = vrsqrt.f32 %v1916_v50  ;;  %v1827_v22 = vmax.f32 %v1819_v61, 0.0  ;;  %v1733_v27 = vrot.slane %v1732_v54, 2  ;;  %v1724_v59 = vrot.slane %v1723_v16, 4 }
 0x533   : > { %1603 = vadd.xlane.f32.xlu1 %v1602_v46  ;;  %v1907_v35 = vsub.f32 %v4881_v23, %v4969_v4  ;;  %v1908_v46 = vsub.f32 %v4888_v58, %v4969_v4  ;;  %v1785_v1 = vrot.slane %v1784_v39, 1  ;;  %v4975_v26 = vmul.f32 0.0625, %v1715_v9 }
 0x534   : > { %v1915_v28 = vadd.f32 1e-05, %v1827_v22  ;;  %v1814_v56 = vmul.f32 %v4969_v4, %v4969_v4  ;;  %v1777_v43 = vadd.f32 %v1776_v14, %v1775_v18  ;;  %v1734_v25 = vadd.f32 %v1733_v27, %v1732_v54 }
 0x535   : > { %1594 = vadd.xlane.f32.xlu0 %v1593_v8  ;;  %v1786_v8 = vadd.f32 %v1785_v1, %v1784_v39  ;;  %v1725_v42 = vadd.f32 %v1724_v59, %v1723_v16  ;;  %v1501_v62 = vmul.f32 %v4914_v32, %v4914_v32  ;;  %v1905_v44 = vsub.f32 %v4883_v30, %v4975_v26 }
 0x536   : > { %3675 = vrsqrt.f32 %v1915_v28  ;;  %v1906_v53 = vsub.f32 %v4894_v24, %v4975_v26  ;;  %v1813_v41 = vmul.f32 %v4975_v26, %v4975_v26  ;;  %v1778_v50 = vrot.slane %v1777_v43, 1  ;;  %v5081_v26 = vld [vmem:[#allocation7 + $0x28] sm:$0xff]  }
 0x537   : > { %1597 = vadd.xlane.f32.xlu1 %v1596_v29  ;;  %v1806_v29 = vmul.f32 0.0625, %v1786_v8  ;;  %v1735_v61 = vrot.slane %v1734_v25, 1  ;;  %v1726_v33 = vrot.slane %v1725_v42, 2  ;;  %v1605_v52 = vsel %vm497_vm0, %v1501_v62, 0.0  ;;  %6096 = vst [vmem:[#allocation23_spill] sm:$0xff] %v5081_v26 }
 0x538   : > { %v1779_v63 = vadd.f32 %v1778_v50, %v1777_v43  ;;  %v1502_v18 = vmul.f32 %v4919_v2, %v4919_v2  ;;  %v1503_v54 = vmul.f32 %v4911_v3, %v4911_v3  ;;  %v1504_v16 = vmul.f32 %v4917_v36, %v4917_v36 }
 0x539   : > { %1548 = vadd.xlane.f32.xlu0 %v1547_v37  ;;  %v1822_v22 = vsub.f32 %v1806_v29, %v1814_v56  ;;  %v1736_v39 = vadd.f32 %v1735_v61, %v1734_v25  ;;  %v1727_v9 = vadd.f32 %v1726_v33, %v1725_v42  ;;  %v4998_v37 = vmul.f32 %v4965_v11, %v1897_v20 }
 0x53a   : > { %v1805_v14 = vmul.f32 0.0625, %v1779_v63  ;;  %v1611_v27 = vsel %vm497_vm0, %v1503_v54, 0.0  ;;  %v1614_v59 = vsel %vm497_vm0, %v1504_v16, 0.0  ;;  %v5009_v20 = vmul.f32 %v4965_v11, %v1898_v48 }
 0x53b   : > { %1551 = vadd.xlane.f32.xlu1 %v1550_v31  ;;  %v1608_v31 = vsel %vm497_vm0, %v1502_v18, 0.0  ;;  %v1830_v1 = vmax.f32 %v1822_v22, 0.0  ;;  %v5003_v43 = vmul.f32 0.0625, %v1736_v39  ;;  %v1728_v56 = vrot.slane %v1727_v9, 1 }
 0x53c   : > { %v3674_v28 = vpop.eup %3673  ;;  %v1787_v25 = vadd.f32 %v1608_v31, %v1605_v52  ;;  %v1821_v8 = vsub.f32 %v1805_v14, %v1813_v41  ;;  %v1794_v42 = vadd.f32 %v1614_v59, %v1611_v27  ;;  %v5019_v60 = vmul.f32 %v4956_v0, %v1899_v13 }
 0x53d   : > { %1542 = vadd.xlane.f32.xlu0 %v1541_v45  ;;  %v1918_v45 = vadd.f32 1e-05, %v1830_v1  ;;  %v1911_v62 = vsub.f32 %v4911_v3, %v5003_v43  ;;  %v1912_v50 = vsub.f32 %v4917_v36, %v5003_v43  ;;  %v1729_v29 = vadd.f32 %v1728_v56, %v1727_v9 }
 0x53e   : > { %v1829_v61 = vmax.f32 %v1821_v8, 0.0  ;;  %v1788_v33 = vrot.slane %v1787_v25, 4  ;;  %v1795_v41 = vrot.slane %v1794_v42, 4 }
 0x53f   : > { %1545 = vadd.xlane.f32.xlu1 %v1544_v40  ;;  %3677 = vrsqrt.f32 %v1918_v45  ;;  %v1743_v63 = vmul.f32 0.0625, %v1729_v29 }
 0x540   : > { %v3676_v40 = vpop.eup %3675  ;;  %v1917_v48 = vadd.f32 1e-05, %v1829_v61  ;;  %v1789_v11 = vadd.f32 %v1788_v33, %v1787_v25  ;;  %v1796_v18 = vadd.f32 %v1795_v41, %v1794_v42 }
 0x541   : > { %1606 = vadd.xlane.f32.xlu0 %v1605_v52  ;;  %v5025_v52 = vmul.f32 %v4956_v0, %v1900_v34  ;;  %v1909_v54 = vsub.f32 %v4914_v32, %v1743_v63  ;;  %v1910_v16 = vsub.f32 %v4919_v2, %v1743_v63  ;;  %v5032_v13 = vmul.f32 %v3676_v40, %v1901_v19 }
 0x542   : > { %3679 = vrsqrt.f32 %v1917_v48  ;;  %v1790_v22 = vrot.slane %v1789_v11, 2  ;;  %v1797_v39 = vrot.slane %v1796_v18, 2  ;;  %v5037_v51 = vmul.f32 %v3676_v40, %v1902_v55 }
 0x543   : > { %1609 = vadd.xlane.f32.xlu1 %v1608_v31  ;;  %v5042_v34 = vmul.f32 %v3674_v28, %v1903_v38  ;;  %v5047_v0 = vmul.f32 %v3674_v28, %v1904_v57  ;;  %v1816_v55 = vmul.f32 %v5003_v43, %v5003_v43 }
 0x544   : > { %v1791_v9 = vadd.f32 %v1790_v22, %v1789_v11  ;;  %v1798_v14 = vadd.f32 %v1797_v39, %v1796_v18 }
 0x545   : > { %1612 = vadd.xlane.f32.xlu0 %v1611_v27  ;;  %v1815_v27 = vmul.f32 %v1743_v63, %v1743_v63  ;;  %v5079_v63 = vld [vmem:[#allocation7 + $0x20] sm:$0xff]  }
 0x546   : > { %v1792_v19 = vrot.slane %v1791_v9, 1  ;;  %v1799_v31 = vrot.slane %v1798_v14, 1  ;;  %6095 = vst [vmem:[#allocation22_spill] sm:$0xff] %v5079_v63  ;;  %3507 = vmatprep.subr.bf16.mxu0 %v5079_v63 }
 0x547   : > { %1615 = vadd.xlane.f32.xlu1 %v1614_v59  ;;  %3508 = vmatpush3.bf16.msra.mxu0 %v5079_v63 }
 0x548   : > { %v1793_v1 = vadd.f32 %v1792_v19, %v1791_v9  ;;  %v1800_v15 = vadd.f32 %v1799_v31, %v1798_v14  ;;  %3509 = vmatprep.subr.bf16.mxu0 %v5081_v26  ;;  %v5097_v19 = vld [vmem:[#allocation8 + $0x4] sm:$0xf] }
 0x549   : > { %v3678_v56 = vpop.eup %3677 }
 0x54a   : > { %v1807_v25 = vmul.f32 0.0625, %v1793_v1  ;;  %v1808_v38 = vmul.f32 0.0625, %v1800_v15  ;;  %v5054_v10 = vmul.f32 %v3678_v56, %v1907_v35  ;;  %v5059_v57 = vmul.f32 %v3678_v56, %v1908_v46 }
 0x54b   : > { %3510 = vmatpush3.bf16.msra.mxu0 %v5081_v26 }
 0x54c   : > { %v3680_v59 = vpop.eup %3679  ;;  %v1823_v28 = vsub.f32 %v1807_v25, %v1815_v27  ;;  %v1824_v8 = vsub.f32 %v1808_v38, %v1816_v55 }
 0x54d   : > { %v5064_v43 = vmul.f32 %v3680_v59, %v1905_v44  ;;  %v5069_v42 = vmul.f32 %v3680_v59, %v1906_v53  ;;  %v6097_v59 = vld [vmem:[#allocation24_spill] sm:$0xff] }
 0x54e   : > { %v1831_v35 = vmax.f32 %v1823_v28, 0.0  ;;  %v1832_v45 = vmax.f32 %v1824_v8, 0.0  ;;  %v5105_v28 = vrot.slane %v5097_v19, %v6097_v59 }
 0x550   : > { %v1919_v29 = vadd.f32 1e-05, %v1831_v35  ;;  %v1920_v61 = vadd.f32 1e-05, %v1832_v45  ;;  %6098 = vst [vmem:[#allocation30_spill] sm:$0xff] %v5105_v28 }
 0x552   : > { %3681 = vrsqrt.f32 %v1919_v29 }
 0x553   : > { %3683 = vrsqrt.f32 %v1920_v61 }
 0x55c   : > { %v3682_v4 = vpop.eup %3681 }
 0x55d   : > { %v3684_v46 = vpop.eup %3683  ;;  %v5071_v33 = vmul.f32 %v3682_v4, %v1909_v54  ;;  %v5073_v41 = vmul.f32 %v3682_v4, %v1910_v16 }
 0x55e   : > { %v5075_v40 = vmul.f32 %v3684_v46, %v1911_v62  ;;  %v5077_v44 = vmul.f32 %v3684_v46, %v1912_v50 }
 0x55f   : > { %6091 = vst [vmem:[#allocation16_spill] sm:$0xff] %v5071_v33  ;;  %6092 = vst [vmem:[#allocation20_spill] sm:$0xff] %v5073_v41 }
 0x560   : > { %6093 = vst [vmem:[#allocation18_spill] sm:$0xff] %v5075_v40  ;;  %6094 = vst [vmem:[#allocation21_spill] sm:$0xff] %v5077_v44  ;;  %v6100_v44 = vld [vmem:[#allocation27_spill] sm:$0xff] }
 0x596   : > { %v1513_v53 = vpop.xlane.xlu0 %1512 }
 0x597   : > { %v5087_v18 = vmul.f32 0.03125, %v1513_v53 }
 0x598   : > { %v1516_v48 = vpop.xlane.xlu1 %1515 }
 0x599   : > { %v5089_v50 = vmul.f32 0.03125, %v1516_v48  ;;  %v1635_v16 = vmul.f32 %v5087_v18, %v5087_v18 }
 0x59a   : > { %v1507_v11 = vpop.xlane.xlu0 %1506 }
 0x59b   : > { %v5093_v22 = vmul.f32 0.03125, %v1507_v11  ;;  %v1636_v31 = vmul.f32 %v5089_v50, %v5089_v50 }
 0x59c   : > { %v1510_v62 = vpop.xlane.xlu1 %1509 }
 0x59d   : > { %v5095_v9 = vmul.f32 0.03125, %v1510_v62  ;;  %v1633_v55 = vmul.f32 %v5093_v22, %v5093_v22 }
 0x59e   : > { %v1577_v54 = vpop.xlane.xlu0 %1576 }
 0x59f   : > { %v1619_v39 = vmul.f32 0.03125, %v1577_v54  ;;  %v1634_v8 = vmul.f32 %v5095_v9, %v5095_v9  ;;  %v6099_v54 = vld [vmem:[#allocation26_spill] sm:$0xff] }
 0x5a0   : > { %v1580_v14 = vpop.xlane.xlu1 %1579 }
 0x5a1   : > { %v1651_v27 = vsub.f32 %v1619_v39, %v1635_v16  ;;  %v1620_v1 = vmul.f32 0.03125, %v1580_v14  ;;  %v5111_v16 = vrot.slane %v5097_v19, %v6099_v54  ;;  %v5115_v39 = vmul.f32 %v4833_v5, %v5105_v28 }
 0x5a2   : > { %v1571_v15 = vpop.xlane.xlu0 %1570 }
 0x5a3   : > { %v1667_v56 = vmax.f32 %v1651_v27, 0.0  ;;  %v1652_v25 = vsub.f32 %v1620_v1, %v1636_v31  ;;  %v1617_v38 = vmul.f32 0.03125, %v1571_v15  ;;  %v5119_v27 = vmul.f32 %v5105_v28, %v4835_v47 }
 0x5a4   : > { %v1574_v35 = vpop.xlane.xlu1 %1573  ;;  %v5123_v1 = vmul.f32 %v4841_v49, %v5105_v28  ;;  %v5127_v15 = vmul.f32 %v5105_v28, %v4843_v12  ;;  %v5175_v54 = vmul.f32 %v5111_v16, %v5019_v60  ;;  %v5179_v59 = vmul.f32 %v5111_v16, %v5025_v52 }
 0x5a5   : > { %v1851_v45 = vadd.f32 1e-05, %v1667_v56  ;;  %v1668_v29 = vmax.f32 %v1652_v25, 0.0  ;;  %v1649_v61 = vsub.f32 %v1617_v38, %v1633_v55  ;;  %v1618_v4 = vmul.f32 0.03125, %v1574_v35 }
 0x5a6   : > { %v1525_v46 = vpop.xlane.xlu0 %1524  ;;  %v5131_v55 = vmul.f32 %v4861_v7, %v5105_v28  ;;  %v5135_v25 = vmul.f32 %v5105_v28, %v4863_v6  ;;  %v5141_v35 = vmul.f32 %v4865_v21, %v5105_v28  ;;  %v5195_v52 = vrot.slane %v5097_v19, %v6100_v44 }
 0x5a7   : > { %3685 = vrsqrt.f32 %v1851_v45  ;;  %v1852_v53 = vadd.f32 1e-05, %v1668_v29  ;;  %v1665_v48 = vmax.f32 %v1649_v61, 0.0  ;;  %v1650_v11 = vsub.f32 %v1618_v4, %v1634_v8 }
 0x5a8   : > { %v1528_v62 = vpop.xlane.xlu1 %1527  ;;  %v5137_v8 = vmul.f32 0.03125, %v1525_v46  ;;  %v5145_v45 = vmul.f32 %v5105_v28, %v4869_v17  ;;  %v5149_v29 = vmul.f32 %v4881_v23, %v5105_v28  ;;  %v5153_v61 = vmul.f32 %v5105_v28, %v4883_v30 }
 0x5a9   : > { %3687 = vrsqrt.f32 %v1852_v53  ;;  %v1849_v14 = vadd.f32 1e-05, %v1665_v48  ;;  %v1666_v31 = vmax.f32 %v1650_v11, 0.0  ;;  %v5157_v46 = vmul.f32 %v4888_v58, %v5105_v28 }
 0x5aa   : > { %v1519_v56 = vpop.xlane.xlu0 %1518  ;;  %v5161_v53 = vmul.f32 %v5105_v28, %v4894_v24  ;;  %v5163_v48 = vmul.f32 0.03125, %v1528_v62  ;;  %v1639_v62 = vmul.f32 %v5137_v8, %v5137_v8  ;;  %v5199_v40 = vmul.f32 %v5111_v16, %v5037_v51 }
 0x5ab   : > { %3689 = vrsqrt.f32 %v1849_v14  ;;  %v1850_v38 = vadd.f32 1e-05, %v1666_v31  ;;  %v5167_v14 = vmul.f32 %v5111_v16, %v4998_v37  ;;  %v5171_v31 = vmul.f32 %v5111_v16, %v5009_v20 }
 0x5ac   : > { %v1522_v4 = vpop.xlane.xlu1 %1521  ;;  %v5187_v37 = vmul.f32 %v5111_v16, %v5032_v13  ;;  %v1835_v20 = vsub.f32 %v4833_v5, %v5087_v18  ;;  %v5205_v5 = vmul.f32 %v5111_v16, %v5042_v34  ;;  %v1836_v18 = vsub.f32 %v4841_v49, %v5089_v50 }
 0x5ad   : > { %3691 = vrsqrt.f32 %v1850_v38  ;;  %v5183_v38 = vmul.f32 0.03125, %v1519_v56  ;;  %v5191_v63 = vmul.f32 0.03125, %v1522_v4  ;;  %v5211_v36 = vmul.f32 %v5111_v16, %v5047_v0 }
 0x5ae   : > { %v1589_v11 = vpop.xlane.xlu0 %1588  ;;  %v5215_v51 = vmul.f32 %v5111_v16, %v5054_v10  ;;  %v1833_v49 = vsub.f32 %v4835_v47, %v5093_v22  ;;  %v5229_v47 = vmul.f32 %v5111_v16, %v5059_v57 }
 0x5af   : > { %v1623_v26 = vmul.f32 0.03125, %v1589_v11  ;;  %v1640_v11 = vmul.f32 %v5163_v48, %v5163_v48 }
 0x5b0   : > { %v1592_v60 = vpop.xlane.xlu1 %1591 }
 0x5b1   : > { %v3686_v56 = vpop.eup %3685  ;;  %v1655_v13 = vsub.f32 %v1623_v26, %v1639_v62  ;;  %v1624_v41 = vmul.f32 0.03125, %v1592_v60  ;;  %v1637_v26 = vmul.f32 %v5183_v38, %v5183_v38 }
 0x5b2   : > { %v1883_v4 = vmul.f32 %v3686_v56, %v1835_v20  ;;  %v1583_v44 = vpop.xlane.xlu0 %1582  ;;  %v1638_v20 = vmul.f32 %v5191_v63, %v5191_v63 }
 0x5b3   : > { %v3688_v33 = vpop.eup %3687  ;;  %v1671_v62 = vmax.f32 %v1655_v13, 0.0  ;;  %v1656_v34 = vsub.f32 %v1624_v41, %v1640_v11  ;;  %v1621_v60 = vmul.f32 0.03125, %v1583_v44  ;;  %v1834_v13 = vsub.f32 %v4843_v12, %v5095_v9 }
 0x5b4   : > { %v1884_v50 = vmul.f32 %v3688_v33, %v1836_v18  ;;  %v1586_v0 = vpop.xlane.xlu1 %1585  ;;  %v1973_v56 = vmul.f32 %v5195_v52, %v1883_v4  ;;  %v5235_v12 = vmul.f32 %v5111_v16, %v5064_v43 }
 0x5b5   : > { %v3690_v3 = vpop.eup %3689  ;;  %v1855_v10 = vadd.f32 1e-05, %v1671_v62  ;;  %v1672_v2 = vmax.f32 %v1656_v34, 0.0  ;;  %v1653_v28 = vsub.f32 %v1621_v60, %v1637_v26  ;;  %v1622_v32 = vmul.f32 0.03125, %v1586_v0 }
 0x5b6   : > { %v1881_v41 = vmul.f32 %v3690_v3, %v1833_v49  ;;  %v1537_v44 = vpop.xlane.xlu0 %1536  ;;  %v1974_v11 = vmul.f32 %v5195_v52, %v1884_v50  ;;  %v1989_v60 = vadd.f32 %v1973_v56, %v5115_v39  ;;  %v6101_v49 = vld [vmem:[#allocation29_spill] sm:$0xff] }
 0x5b7   : > { %v3692_v33 = vpop.eup %3691  ;;  %3693 = vrsqrt.f32 %v1855_v10  ;;  %v1856_v22 = vadd.f32 1e-05, %v1672_v2  ;;  %v1669_v18 = vmax.f32 %v1653_v28, 0.0  ;;  %v1654_v4 = vsub.f32 %v1622_v32, %v1638_v20 }
 0x5b8   : > { %v1882_v62 = vmul.f32 %v3692_v33, %v1834_v13  ;;  %v1540_v34 = vpop.xlane.xlu1 %1539  ;;  %v1971_v26 = vmul.f32 %v5195_v52, %v1881_v41  ;;  %v5239_v57 = vrot.slane %v5097_v19, %v6101_v49  ;;  %v1990_v2 = vadd.f32 %v1974_v11, %v5123_v1 }
 0x5b9   : > { %v1853_v3 = vadd.f32 1e-05, %v1669_v18  ;;  %v1670_v9 = vmax.f32 %v1654_v4, 0.0  ;;  %v1839_v32 = vsub.f32 %v4861_v7, %v5137_v8  ;;  %3695 = vrsqrt.f32 %v1856_v22 }
 0x5ba   : > { %v1531_v28 = vpop.xlane.xlu0 %1530  ;;  %v1972_v50 = vmul.f32 %v5195_v52, %v1882_v62  ;;  %v1987_v39 = vadd.f32 %v1971_v26, %v5119_v27  ;;  %v5246_v20 = vmul.f32 0.03125, %v1537_v44  ;;  %v5248_v0 = vmul.f32 0.03125, %v1540_v34 }
 0x5bb   : > { %3697 = vrsqrt.f32 %v1853_v3  ;;  %v1854_v43 = vadd.f32 1e-05, %v1670_v9  ;;  %v5250_v56 = vmul.f32 0.03125, %v1531_v28  ;;  %v2025_v7 = vadd.f32 %v5175_v54, %v1989_v60 }
 0x5bc   : > { %v1534_v19 = vpop.xlane.xlu1 %1533  ;;  %v1988_v1 = vadd.f32 %v1972_v50, %v5127_v15  ;;  %v2023_v10 = vadd.f32 %v5167_v14, %v1987_v39  ;;  %v1840_v8 = vsub.f32 %v4865_v21, %v5163_v48  ;;  %v2026_v13 = vadd.f32 %v5179_v59, %v1990_v2 }
 0x5bd   : > { %3699 = vrsqrt.f32 %v1854_v43  ;;  %v5257_v27 = vmul.f32 0.03125, %v1534_v19  ;;  %v1837_v41 = vsub.f32 %v4863_v6, %v5183_v38  ;;  %v1838_v44 = vsub.f32 %v4869_v17, %v5191_v63 }
 0x5be   : > { %v1601_v11 = vpop.xlane.xlu0 %1600  ;;  %v2024_v15 = vadd.f32 %v5171_v31, %v1988_v1  ;;  %v2043_v14 = vadd.f32 %v5239_v57, %v2023_v10  ;;  %v1643_v54 = vmul.f32 %v5246_v20, %v5246_v20  ;;  %v1644_v21 = vmul.f32 %v5248_v0, %v5248_v0 }
 0x5bf   : > { %v1627_v48 = vmul.f32 0.03125, %v1601_v11  ;;  %v2045_v59 = vadd.f32 %v5239_v57, %v2025_v7  ;;  %v1641_v6 = vmul.f32 %v5250_v56, %v5250_v56  ;;  %v2046_v31 = vadd.f32 %v5239_v57, %v2026_v13 }
 0x5c0   : > { %v1604_v38 = vpop.xlane.xlu1 %1603  ;;  %v2044_v17 = vadd.f32 %v5239_v57, %v2024_v15  ;;  %v2075_v63 = vmul.f32 0.2, %v2043_v14  ;;  %v1642_v22 = vmul.f32 %v5257_v27, %v5257_v27  ;;  %vm2059_vm2 = vcmp.gt.f32.partialorder %v2043_v14, 0.0 }
 0x5c1   : > { %v3694_v33 = vpop.eup %3693  ;;  %v1659_v18 = vsub.f32 %v1627_v48, %v1643_v54  ;;  %v1628_v4 = vmul.f32 0.03125, %v1604_v38  ;;  %vm2061_vm4 = vcmp.gt.f32.partialorder %v2045_v59, 0.0  ;;  %v2077_v26 = vmul.f32 0.2, %v2045_v59 }
 0x5c2   : > { %v1595_v62 = vpop.xlane.xlu0 %1594  ;;  %vm2060_vm3 = vcmp.gt.f32.partialorder %v2044_v17, 0.0  ;;  %v2076_v34 = vmul.f32 0.2, %v2044_v17  ;;  %vm2062_vm5 = vcmp.gt.f32.partialorder %v2046_v31, 0.0  ;;  %v1887_v28 = vmul.f32 %v3694_v33, %v1839_v32 }
 0x5c3   : > { %v1675_v60 = vmax.f32 %v1659_v18, 0.0  ;;  %v1660_v3 = vsub.f32 %v1628_v4, %v1644_v21  ;;  %v1625_v9 = vmul.f32 0.03125, %v1595_v62  ;;  %v3696_v2 = vpop.eup %3695  ;;  %v2091_v39 = vsel %vm2059_vm2, %v2043_v14, %v2075_v63 }
 0x5c4   : > { %v1598_v50 = vpop.xlane.xlu1 %1597  ;;  %v2092_v43 = vsel %vm2060_vm3, %v2044_v17, %v2076_v34  ;;  %v2078_v19 = vmul.f32 0.2, %v2046_v31  ;;  %v2093_v38 = vsel %vm2061_vm4, %v2045_v59, %v2077_v26  ;;  %v1888_v14 = vmul.f32 %v3696_v2, %v1840_v8 }
 0x5c5   : > { %v3698_v1 = vpop.eup %3697  ;;  %v1859_v10 = vadd.f32 1e-05, %v1675_v60  ;;  %v1676_v7 = vmax.f32 %v1660_v3, 0.0  ;;  %v1657_v13 = vsub.f32 %v1625_v9, %v1641_v6  ;;  %v1626_v11 = vmul.f32 0.03125, %v1598_v50 }
 0x5c6   : > { %v1885_v15 = vmul.f32 %v3698_v1, %v1837_v41  ;;  %v1549_v54 = vpop.xlane.xlu0 %1548  ;;  %v2107_v48 = vpack.c.bf16 %v2092_v43, %v2091_v39  ;;  %v2094_v21 = vsel %vm2062_vm5, %v2046_v31, %v2078_v19  ;;  %v1977_v59 = vmul.f32 %v5195_v52, %v1887_v28 }
 0x5c7   : > { %v3700_v18 = vpop.eup %3699  ;;  %3701 = vrsqrt.f32 %v1859_v10  ;;  %v1860_v4 = vadd.f32 1e-05, %v1676_v7  ;;  %v1673_v32 = vmax.f32 %v1657_v13, 0.0  ;;  %v1658_v33 = vsub.f32 %v1626_v11, %v1642_v22 }
 0x5c8   : > { %v1886_v17 = vmul.f32 %v3700_v18, %v1838_v44  ;;  %3475 = vmatprep.subr.bf16.mxu1 %v2107_v48  ;;  %v1552_v63 = vpop.xlane.xlu1 %1551  ;;  %v2108_v62 = vpack.c.bf16 %v2094_v21, %v2093_v38  ;;  %v1975_v6 = vmul.f32 %v5195_v52, %v1885_v15  ;;  %v1843_v31 = vsub.f32 %v4881_v23, %v5246_v20 }
 0x5c9   : > { %3703 = vrsqrt.f32 %v1860_v4  ;;  %v1857_v41 = vadd.f32 1e-05, %v1673_v32  ;;  %v1674_v34 = vmax.f32 %v1658_v33, 0.0  ;;  %3476 = vmatpush3.bf16.msra.mxu1 %v2107_v48  ;;  %v5283_v26 = vmul.f32 0.03125, %v1549_v54 }
 0x5ca   : > { %3477 = vmatprep.subr.bf16.mxu1 %v2108_v62  ;;  %v1543_v22 = vpop.xlane.xlu0 %1542  ;;  %v1976_v8 = vmul.f32 %v5195_v52, %v1886_v17  ;;  %v1991_v44 = vadd.f32 %v1975_v6, %v5135_v25  ;;  %v1844_v60 = vsub.f32 %v4888_v58, %v5248_v0  ;;  %v5289_v9 = vmul.f32 0.03125, %v1552_v63 }
 0x5cb   : > { %3705 = vrsqrt.f32 %v1857_v41  ;;  %v1858_v3 = vadd.f32 1e-05, %v1674_v34  ;;  %v5291_v2 = vmul.f32 0.03125, %v1543_v22  ;;  %v1978_v50 = vmul.f32 %v5195_v52, %v1888_v14 }
 0x5cc   : > { %v1546_v28 = vpop.xlane.xlu1 %1545  ;;  %v1992_v23 = vadd.f32 %v1976_v8, %v5145_v45  ;;  %v2027_v20 = vadd.f32 %v5187_v37, %v1991_v44  ;;  %v1841_v39 = vsub.f32 %v4883_v30, %v5250_v56  ;;  %v1993_v58 = vadd.f32 %v1977_v59, %v5131_v55 }
 0x5cd   : > { %3707 = vrsqrt.f32 %v1858_v3  ;;  %3478 = vmatpush3.bf16.msra.mxu1 %v2108_v62  ;;  %v5298_v25 = vmul.f32 0.03125, %v1546_v28  ;;  %v1842_v0 = vsub.f32 %v4894_v24, %v5257_v27  ;;  %v1647_v43 = vmul.f32 %v5283_v26, %v5283_v26 }
 0x5ce   : > { %v1607_v45 = vpop.xlane.xlu0 %1606  ;;  %v2028_v37 = vadd.f32 %v5199_v40, %v1992_v23  ;;  %v2047_v19 = vadd.f32 %v5239_v57, %v2027_v20  ;;  %v1648_v30 = vmul.f32 %v5289_v9, %v5289_v9  ;;  %v1645_v56 = vmul.f32 %v5291_v2, %v5291_v2 }
 0x5cf   : > { %v1629_v1 = vmul.f32 0.03125, %v1607_v45  ;;  %v1994_v55 = vadd.f32 %v1978_v50, %v5141_v35  ;;  %v2029_v7 = vadd.f32 %v5205_v5, %v1993_v58  ;;  %v1646_v40 = vmul.f32 %v5298_v25, %v5298_v25 }
 0x5d0   : > { %v1610_v10 = vpop.xlane.xlu1 %1609  ;;  %v2048_v24 = vadd.f32 %v5239_v57, %v2028_v37  ;;  %vm2063_vm6 = vcmp.gt.f32.partialorder %v2047_v19, 0.0  ;;  %v2079_v27 = vmul.f32 0.2, %v2047_v19 }
 0x5d1   : > { %v3702_v13 = vpop.eup %3701  ;;  %v1661_v11 = vsub.f32 %v1629_v1, %v1645_v56  ;;  %v1630_v15 = vmul.f32 0.03125, %v1610_v10  ;;  %v2030_v54 = vadd.f32 %v5211_v36, %v1994_v55  ;;  %v2049_v14 = vadd.f32 %v5239_v57, %v2029_v7 }
 0x5d2   : > { %v1891_v48 = vmul.f32 %v3702_v13, %v1843_v31  ;;  %v1613_v38 = vpop.xlane.xlu0 %1612  ;;  %vm2064_vm7 = vcmp.gt.f32.partialorder %v2048_v24, 0.0  ;;  %v2080_v21 = vmul.f32 0.2, %v2048_v24  ;;  %v2095_v35 = vsel %vm2063_vm6, %v2047_v19, %v2079_v27 }
 0x5d3   : > { %v3704_v18 = vpop.eup %3703  ;;  %v1677_v4 = vmax.f32 %v1661_v11, 0.0  ;;  %v1662_v32 = vsub.f32 %v1630_v15, %v1646_v40  ;;  %v1631_v33 = vmul.f32 0.03125, %v1613_v38  ;;  %v2050_v62 = vadd.f32 %v5239_v57, %v2030_v54  ;;  %v6103_v15 = vld [vmem:[#allocation30_spill] sm:$0xff]  ;;  %v6104_v38 = vld [vmem:[#allocation19_spill] sm:$0xff] }
 0x5d4   : > { %v1892_v5 = vmul.f32 %v3704_v18, %v1844_v60  ;;  %v1616_v17 = vpop.xlane.xlu1 %1615  ;;  %v2096_v63 = vsel %vm2064_vm7, %v2048_v24, %v2080_v21  ;;  %v1981_v6 = vmul.f32 %v5195_v52, %v1891_v48  ;;  %vm2065_vm8 = vcmp.gt.f32.partialorder %v2049_v14, 0.0 }
 0x5d5   : > { %v3706_v41 = vpop.eup %3705  ;;  %v1861_v36 = vadd.f32 1e-05, %v1677_v4  ;;  %v1678_v34 = vmax.f32 %v1662_v32, 0.0  ;;  %v1663_v59 = vsub.f32 %v1631_v33, %v1647_v43  ;;  %v1632_v31 = vmul.f32 0.03125, %v1616_v17 }
 0x5d6   : > { %v1889_v22 = vmul.f32 %v3706_v41, %v1841_v39  ;;  %v2109_v8 = vpack.c.bf16 %v2096_v63, %v2095_v35  ;;  %vm2066_vm9 = vcmp.gt.f32.partialorder %v2050_v62, 0.0  ;;  %v2081_v20 = vmul.f32 0.2, %v2049_v14 }
 0x5d7   : > { %v3708_v44 = vpop.eup %3707  ;;  %3709 = vrsqrt.f32 %v1861_v36  ;;  %v1862_v3 = vadd.f32 1e-05, %v1678_v34  ;;  %v1679_v28 = vmax.f32 %v1663_v59, 0.0  ;;  %v1664_v60 = vsub.f32 %v1632_v31, %v1648_v30  ;;  %v6107_v36 = vld [vmem:[#allocation25_spill] sm:$0xff] }
 0x5d8   : > { %v1890_v23 = vmul.f32 %v3708_v44, %v1842_v0  ;;  %3479 = vmatprep.subr.bf16.mxu1 %v2109_v8  ;;  %v2082_v50 = vmul.f32 0.2, %v2050_v62  ;;  %v1979_v58 = vmul.f32 %v5195_v52, %v1889_v22  ;;  %v1982_v39 = vmul.f32 %v5195_v52, %v1892_v5  ;;  %v6106_v5 = vld [vmem:[#allocation16_spill] sm:$0xff] }
 0x5d9   : > { %3711 = vrsqrt.f32 %v1862_v3  ;;  %v1863_v45 = vadd.f32 1e-05, %v1679_v28  ;;  %v1680_v37 = vmax.f32 %v1664_v60, 0.0  ;;  %3480 = vmatpush3.bf16.msra.mxu1 %v2109_v8  ;;  %v2097_v43 = vsel %vm2065_vm8, %v2049_v14, %v2081_v20 }
 0x5da   : > { %v2098_v19 = vsel %vm2066_vm9, %v2050_v62, %v2082_v50  ;;  %v1980_v56 = vmul.f32 %v5195_v52, %v1890_v23  ;;  %v1995_v30 = vadd.f32 %v1979_v58, %v5153_v61  ;;  %v1997_v55 = vadd.f32 %v1981_v6, %v5149_v29  ;;  %v6102_v29 = vld [vmem:[#allocation17_spill] sm:$0xff]  ;;  %v6108_v23 = vld [vmem:[#allocation20_spill] sm:$0xff] }
 0x5db   : > { %3713 = vrsqrt.f32 %v1863_v45  ;;  %v1864_v0 = vadd.f32 1e-05, %v1680_v37  ;;  %v2110_v1 = vpack.c.bf16 %v2098_v19, %v2097_v43  ;;  %v2016_v24 = vmul.f32 %v5111_v16, %v5069_v42 }
 0x5dc   : > { %v1996_v10 = vadd.f32 %v1980_v56, %v5161_v53  ;;  %v2031_v27 = vadd.f32 %v5235_v12, %v1995_v30  ;;  %v1998_v7 = vadd.f32 %v1982_v39, %v5157_v46  ;;  %v2033_v13 = vadd.f32 %v5215_v51, %v1997_v55  ;;  %v6109_v30 = vld [vmem:[#allocation18_spill] sm:$0xff] }
 0x5dd   : > { %3715 = vrsqrt.f32 %v1864_v0  ;;  %3481 = vmatprep.subr.bf16.mxu1 %v2110_v1  ;;  %v1963_v53 = vmul.f32 %v6103_v15, %v6102_v29  ;;  %v1845_v42 = vsub.f32 %v6102_v29, %v5291_v2  ;;  %v1964_v21 = vmul.f32 %v6103_v15, %v6104_v38  ;;  %v6105_v2 = vld [vmem:[#allocation28_spill] sm:$0xff] }
 0x5de   : > { %3482 = vmatpush3.bf16.msra.mxu1 %v2110_v1  ;;  %v2032_v61 = vadd.f32 %v2016_v24, %v1996_v10  ;;  %v2051_v40 = vadd.f32 %v5239_v57, %v2031_v27  ;;  %v2034_v11 = vadd.f32 %v5229_v47, %v1998_v7  ;;  %v2053_v54 = vadd.f32 %v5239_v57, %v2033_v13  ;;  %v6110_v24 = vld [vmem:[#allocation21_spill] sm:$0xff] }
 0x5df   : > { %v1846_v47 = vsub.f32 %v6104_v38, %v5298_v25  ;;  %v1847_v33 = vsub.f32 %v6105_v2, %v5283_v26  ;;  %v2019_v17 = vmul.f32 %v5111_v16, %v6106_v5  ;;  %v1848_v34 = vsub.f32 %v6107_v36, %v5289_v9  ;;  %v3775_v38 = vld [vmem:[%s4238_s12 + $0x18] sm:$0xff]  }
 0x5e0   : > { %v2052_v46 = vadd.f32 %v5239_v57, %v2032_v61  ;;  %v2083_v12 = vmul.f32 0.2, %v2051_v40  ;;  %v2054_v48 = vadd.f32 %v5239_v57, %v2034_v11  ;;  %vm2067_vm10 = vcmp.gt.f32.partialorder %v2051_v40, 0.0 }
 0x5e1   : > { %v3710_v51 = vpop.eup %3709  ;;  %v2085_v35 = vmul.f32 0.2, %v2053_v54  ;;  %vm2069_vm12 = vcmp.gt.f32.partialorder %v2053_v54, 0.0  ;;  %v1965_v60 = vmul.f32 %v6105_v2, %v6103_v15  ;;  %v2020_v20 = vmul.f32 %v5111_v16, %v6108_v23 }
 0x5e2   : > { %v1893_v18 = vmul.f32 %v3710_v51, %v1845_v42  ;;  %vm2068_vm11 = vcmp.gt.f32.partialorder %v2052_v46, 0.0  ;;  %v2084_v4 = vmul.f32 0.2, %v2052_v46  ;;  %vm2070_vm13 = vcmp.gt.f32.partialorder %v2054_v48, 0.0  ;;  %v6112_v51 = vld [vmem:[#allocation23_spill] sm:$0xff] }
 0x5e3   : > { %v3712_v32 = vpop.eup %3711  ;;  %v2086_v14 = vmul.f32 0.2, %v2054_v48  ;;  %v2099_v62 = vsel %vm2067_vm10, %v2051_v40, %v2083_v12  ;;  %v2101_v31 = vsel %vm2069_vm12, %v2053_v54, %v2085_v35  ;;  %v1966_v37 = vmul.f32 %v6107_v36, %v6103_v15  ;;  %v6111_v12 = vld [vmem:[#allocation22_spill] sm:$0xff]  ;;  %v3778_v35 = vld [vmem:[%s4238_s12 + $0x30] sm:$0xff]  }
 0x5e4   : > { %v1894_v63 = vmul.f32 %v3712_v32, %v1846_v47  ;;  %v2100_v6 = vsel %vm2068_vm11, %v2052_v46, %v2084_v4  ;;  %v1983_v25 = vmul.f32 %v5195_v52, %v1893_v18  ;;  %v2021_v0 = vmul.f32 %v5111_v16, %v6109_v30  ;;  %v3777_v47 = vld [vmem:[%s4238_s12 + $0x28] sm:$0xff]   ;;  %v3779_v18 = vld [vmem:[%s4238_s12 + $0x38] sm:$0xff]  }
 0x5e5   : > { %v3714_v41 = vpop.eup %3713  ;;  %v2111_v59 = vpack.c.bf16 %v2100_v6, %v2099_v62  ;;  %v2102_v22 = vsel %vm2070_vm13, %v2054_v48, %v2086_v14  ;;  %v2022_v27 = vmul.f32 %v5111_v16, %v6110_v24  ;;  %v3774_v48 = vld [vmem:[%s4238_s12 + $0x10] sm:$0xff]  }
 0x5e6   : > { %v1895_v8 = vmul.f32 %v3714_v41, %v1847_v33  ;;  %v2112_v44 = vpack.c.bf16 %v2102_v22, %v2101_v31  ;;  %v1984_v26 = vmul.f32 %v5195_v52, %v1894_v63  ;;  %v1999_v3 = vadd.f32 %v1983_v25, %v1963_v53 }
 0x5e7   : > { %v3716_v28 = vpop.eup %3715  ;;  %3483 = vmatprep.subr.bf16.mxu1 %v2111_v59 }
 0x5e8   : > { %v1896_v50 = vmul.f32 %v3716_v28, %v1848_v34  ;;  %3484 = vmatpush3.bf16.msra.mxu1 %v2111_v59  ;;  %v2000_v58 = vadd.f32 %v1984_v26, %v1964_v21  ;;  %v2035_v9 = vadd.f32 %v2019_v17, %v1999_v3  ;;  %v1985_v45 = vmul.f32 %v5195_v52, %v1895_v8  ;;  %v3776_v21 = vld [vmem:[%s4238_s12 + $0x20] sm:$0xff]  }
 0x5e9   : > { %3485 = vmatprep.subr.bf16.mxu1 %v2112_v44 }
 0x5ea   : > { %v2036_v39 = vadd.f32 %v2020_v20, %v2000_v58  ;;  %v2055_v43 = vadd.f32 %v5239_v57, %v2035_v9  ;;  %v1986_v19 = vmul.f32 %v5195_v52, %v1896_v50  ;;  %v2001_v56 = vadd.f32 %v1985_v45, %v1965_v60 }
 0x5ec   : > { %3486 = vmatpush3.bf16.msra.mxu1 %v2112_v44  ;;  %v2056_v1 = vadd.f32 %v5239_v57, %v2036_v39  ;;  %v2087_v55 = vmul.f32 0.2, %v2055_v43  ;;  %v2002_v10 = vadd.f32 %v1986_v19, %v1966_v37  ;;  %vm2071_vm14 = vcmp.gt.f32.partialorder %v2055_v43, 0.0 }
 0x5ed   : > { %v2037_v7 = vadd.f32 %v2021_v0, %v2001_v56 }
 0x5ee   : > { %vm2072_vm15 = vcmp.gt.f32.partialorder %v2056_v1, 0.0  ;;  %v2088_v13 = vmul.f32 0.2, %v2056_v1  ;;  %v2038_v61 = vadd.f32 %v2022_v27, %v2002_v10  ;;  %v2103_v52 = vsel %vm2071_vm14, %v2055_v43, %v2087_v55 }
 0x5ef   : > { %v2057_v40 = vadd.f32 %v5239_v57, %v2037_v7 }
 0x5f0   : > { %v2104_v11 = vsel %vm2072_vm15, %v2056_v1, %v2088_v13  ;;  %v2058_v29 = vadd.f32 %v5239_v57, %v2038_v61  ;;  %v3773_v57 = vld [vmem:[%s4238_s12 + $0x8] sm:$0xff]  }
 0x5f1   : > { %v2113_v15 = vpack.c.bf16 %v2104_v11, %v2103_v52  ;;  %vm2073_vm1 = vcmp.gt.f32.partialorder %v2057_v40, 0.0  ;;  %v2089_v53 = vmul.f32 0.2, %v2057_v40 }
 0x5f2   : > { %vm2074_vm2 = vcmp.gt.f32.partialorder %v2058_v29, 0.0  ;;  %v2090_v54 = vmul.f32 0.2, %v2058_v29 }
 0x5f3   : > { %3487 = vmatprep.subr.bf16.mxu1 %v2113_v15  ;;  %v2105_v16 = vsel %vm2073_vm1, %v2057_v40, %v2089_v53 }
 0x5f4   : > { %3488 = vmatpush3.bf16.msra.mxu1 %v2113_v15  ;;  %v2106_v42 = vsel %vm2074_vm2, %v2058_v29, %v2090_v54 }
 0x5f5   : > { %v2114_v46 = vpack.c.bf16 %v2106_v42, %v2105_v16 }
 0x5f7   : > { %3489 = vmatprep.subr.bf16.mxu1 %v2114_v46 }
 0x5f8   : > { %3490 = vmatpush3.bf16.msra.mxu1 %v2114_v46 }
 0x5f9   : > { %3527 = vmatprep.subr.bf16.mxu1 %v6111_v12 }
 0x5fb   : > { %3492 = vmatmul.mubr.bf16.vlgmr.msra.gmra.mrb[32].mxu1 %v3773_v57 }
 0x5fc   : > { %3495 = vmatprep.mubr.bf16.mxu1 %v3774_v48  ;;  %3529 = vmatpush3.bf16.msra.mxu1 %v6111_v12 }
 0x5fd   : > { %3528 = vmatprep.subr.bf16.mxu1 %v6112_v51 }
 0x600   : > { %3530 = vmatpush3.bf16.msra.mxu1 %v6112_v51 }
 0x603   : > { %3496 = vmatmul.mubr.bf16.gmra.mrb[36].mxu1 %v3775_v38 }
 0x604   : > { %3499 = vmatprep.mubr.bf16.mxu1 %v3776_v21 }
 0x60b   : > { %3500 = vmatmul.mubr.bf16.gmra.mrb[40].mxu1 %v3777_v47 }
 0x60c   : > { %3503 = vmatprep.mubr.bf16.mxu1 %v3778_v35 }
 0x613   : > { %3504 = vmatmul.mubr.bf16.gmra.mrb[44].mxu1 %v3779_v18 }
 0x6ce   : > { %v3493_v4 = vpop.f32.mrb[32].mxu1 }
 0x6cf   : > { %v2149_v32 = vpop.f32.mrb[33].mxu1 }
 0x6d0   : > { %v3494_v2 = vpop.f32.mrb[34].mxu1 }
 0x6d1   : > { %v2213_v33 = vpack.c.bf16 %v3494_v2, %v3493_v4  ;;  %v2152_v14 = vpop.f32.mrb[35].mxu1 }
 0x6d2   : > { %v2212_v5 = vpack.c.bf16 %v2152_v14, %v2149_v32 }
 0x6d4   : > { %3511 = vmatprep.mubr.msk.bf16.mxu0 %vm497_vm0, %v2212_v5 }
 0x6d5   : > { %3512 = vmatmul.mubr.msk.bf16.vlgmr.msra.gmra.mrb[32].mxu0 %vm497_vm0, %v2213_v33 }
 0x6d6   : > { %v3497_v17 = vpop.f32.mrb[36].mxu1 }
 0x6d7   : > { %v2165_v63 = vpop.f32.mrb[37].mxu1 }
 0x6d8   : > { %v3498_v62 = vpop.f32.mrb[38].mxu1 }
 0x6d9   : > { %v2215_v6 = vpack.c.bf16 %v3498_v62, %v3497_v17  ;;  %v2168_v25 = vpop.f32.mrb[39].mxu1 }
 0x6da   : > { %v2214_v41 = vpack.c.bf16 %v2168_v25, %v2165_v63 }
 0x6dc   : > { %3515 = vmatprep.mubr.msk.bf16.mxu0 %vm497_vm0, %v2214_v41 }
 0x6dd   : > { %3516 = vmatmul.mubr.msk.bf16.gmra.mrb[36].mxu0 %vm497_vm0, %v2215_v6 }
 0x6de   : > { %v3501_v36 = vpop.f32.mrb[40].mxu1 }
 0x6df   : > { %v2181_v34 = vpop.f32.mrb[41].mxu1 }
 0x6e0   : > { %v3502_v59 = vpop.f32.mrb[42].mxu1 }
 0x6e1   : > { %v2217_v31 = vpack.c.bf16 %v3502_v59, %v3501_v36  ;;  %v2184_v22 = vpop.f32.mrb[43].mxu1 }
 0x6e2   : > { %v2216_v8 = vpack.c.bf16 %v2184_v22, %v2181_v34 }
 0x6e4   : > { %3519 = vmatprep.mubr.msk.bf16.mxu0 %vm497_vm0, %v2216_v8 }
 0x6e5   : > { %3520 = vmatmul.mubr.msk.bf16.gmra.mrb[40].mxu0 %vm497_vm0, %v2217_v31 }
 0x6e6   : > { %v3505_v44 = vpop.f32.mrb[44].mxu1 }
 0x6e7   : > { %v2197_v26 = vpop.f32.mrb[45].mxu1 }
 0x6e8   : > { %v3506_v3 = vpop.f32.mrb[46].mxu1 }
 0x6e9   : > { %v2219_v28 = vpack.c.bf16 %v3506_v3, %v3505_v44  ;;  %v2200_v60 = vpop.f32.mrb[47].mxu1 }
 0x6ea   : > { %v2218_v23 = vpack.c.bf16 %v2200_v60, %v2197_v26 }
 0x6ec   : > { %3523 = vmatprep.mubr.msk.bf16.mxu1 %vm497_vm0, %v2218_v23 }
 0x6ed   : > { %3524 = vmatmul.mubr.msk.bf16.vlgmr.msra.gmra.mrb[48].mxu1 %vm497_vm0, %v2219_v28 }
 0x7a8   : > { %v5389_v20 = vpop.f32.mrb[32].mxu0 }
 0x7a9   : > { %v5391_v50 = vpop.f32.mrb[33].mxu0  ;;  %v2380_v58 = vsel %vm497_vm0, %v5389_v20, 0.0  ;;  %v2360_v9 = vmul.f32 %v5389_v20, %v5389_v20 }
 0x7aa   : > { %2381 = vadd.xlane.f32.xlu0 %v2380_v58  ;;  %v5397_v45 = vpop.f32.mrb[34].mxu0  ;;  %v2358_v19 = vmul.f32 %v5391_v50, %v5391_v50  ;;  %v2374_v30 = vsel %vm497_vm0, %v5391_v50, 0.0 }
 0x7ab   : > { %v5399_v37 = vpop.f32.mrb[35].mxu0  ;;  %v2383_v39 = vsel %vm497_vm0, %v5397_v45, 0.0  ;;  %v2361_v43 = vmul.f32 %v5397_v45, %v5397_v45  ;;  %v2444_v55 = vsel %vm497_vm0, %v2360_v9, 0.0 }
 0x7ac   : > { %2384 = vadd.xlane.f32.xlu1 %v2383_v39  ;;  %v2557_v56 = vadd.f32 %v2383_v39, %v2380_v58  ;;  %v2377_v0 = vsel %vm497_vm0, %v5399_v37, 0.0  ;;  %v2359_v24 = vmul.f32 %v5399_v37, %v5399_v37  ;;  %v2438_v61 = vsel %vm497_vm0, %v2358_v19, 0.0 }
 0x7ad   : > { %v2550_v1 = vadd.f32 %v2377_v0, %v2374_v30  ;;  %v2447_v10 = vsel %vm497_vm0, %v2361_v43, 0.0 }
 0x7ae   : > { %v2558_v27 = vrot.slane %v2557_v56, 4  ;;  %2375 = vadd.xlane.f32.xlu0 %v2374_v30  ;;  %v2621_v7 = vadd.f32 %v2447_v10, %v2444_v55  ;;  %v2441_v40 = vsel %vm497_vm0, %v2359_v24, 0.0 }
 0x7af   : > { %v2551_v13 = vrot.slane %v2550_v1, 4  ;;  %v2614_v15 = vadd.f32 %v2441_v40, %v2438_v61 }
 0x7b0   : > { %v2559_v52 = vadd.f32 %v2558_v27, %v2557_v56  ;;  %2378 = vadd.xlane.f32.xlu1 %v2377_v0  ;;  %v5417_v11 = vpop.f32.mrb[36].mxu0  ;;  %v2622_v29 = vrot.slane %v2621_v7, 4 }
 0x7b1   : > { %v2552_v53 = vadd.f32 %v2551_v13, %v2550_v1  ;;  %v5419_v54 = vpop.f32.mrb[37].mxu0  ;;  %v2615_v12 = vrot.slane %v2614_v15, 4  ;;  %v2392_v57 = vsel %vm497_vm0, %v5417_v11, 0.0  ;;  %v2364_v33 = vmul.f32 %v5417_v11, %v5417_v11 }
 0x7b2   : > { %v2560_v16 = vrot.slane %v2559_v52, 2  ;;  %2445 = vadd.xlane.f32.xlu0 %v2444_v55  ;;  %v5421_v42 = vpop.f32.mrb[38].mxu0  ;;  %v2623_v46 = vadd.f32 %v2622_v29, %v2621_v7  ;;  %v2386_v21 = vsel %vm497_vm0, %v5419_v54, 0.0  ;;  %v2362_v58 = vmul.f32 %v5419_v54, %v5419_v54 }
 0x7b3   : > { %v2553_v48 = vrot.slane %v2552_v53, 2  ;;  %v5425_v51 = vpop.f32.mrb[39].mxu0  ;;  %v2395_v38 = vsel %vm497_vm0, %v5421_v42, 0.0  ;;  %v2616_v18 = vadd.f32 %v2615_v12, %v2614_v15  ;;  %v2365_v25 = vmul.f32 %v5421_v42, %v5421_v42 }
 0x7b4   : > { %v2561_v47 = vadd.f32 %v2560_v16, %v2559_v52  ;;  %v2624_v35 = vrot.slane %v2623_v46, 2  ;;  %2448 = vadd.xlane.f32.xlu1 %v2447_v10  ;;  %v2571_v32 = vadd.f32 %v2395_v38, %v2392_v57  ;;  %v2389_v2 = vsel %vm497_vm0, %v5425_v51, 0.0 }
 0x7b5   : > { %v2554_v4 = vadd.f32 %v2553_v48, %v2552_v53  ;;  %v2617_v17 = vrot.slane %v2616_v18, 2  ;;  %v2564_v63 = vadd.f32 %v2389_v2, %v2386_v21  ;;  %v2456_v26 = vsel %vm497_vm0, %v2364_v33, 0.0 }
 0x7b6   : > { %v2562_v14 = vrot.slane %v2561_v47, 1  ;;  %v2625_v5 = vadd.f32 %v2624_v35, %v2623_v46  ;;  %2439 = vadd.xlane.f32.xlu0 %v2438_v61  ;;  %v2572_v6 = vrot.slane %v2571_v32, 4  ;;  %v2459_v56 = vsel %vm497_vm0, %v2365_v25, 0.0 }
 0x7b7   : > { %v2555_v62 = vrot.slane %v2554_v4, 1  ;;  %v2618_v34 = vadd.f32 %v2617_v17, %v2616_v18  ;;  %v2565_v31 = vrot.slane %v2564_v63, 4  ;;  %v2635_v29 = vadd.f32 %v2459_v56, %v2456_v26 }
 0x7b8   : > { %v2563_v41 = vadd.f32 %v2562_v14, %v2561_v47  ;;  %v2626_v36 = vrot.slane %v2625_v5, 1  ;;  %2442 = vadd.xlane.f32.xlu1 %v2441_v40  ;;  %v5437_v59 = vpop.f32.mrb[40].mxu0  ;;  %v2573_v44 = vadd.f32 %v2572_v6, %v2571_v32  ;;  %v2363_v15 = vmul.f32 %v5425_v51, %v5425_v51 }
 0x7b9   : > { %v2556_v22 = vadd.f32 %v2555_v62, %v2554_v4  ;;  %v5439_v8 = vpop.f32.mrb[41].mxu0  ;;  %v2619_v60 = vrot.slane %v2618_v34, 1  ;;  %v2566_v19 = vadd.f32 %v2565_v31, %v2564_v63  ;;  %v2636_v47 = vrot.slane %v2635_v29, 4 }
 0x7ba   : > { %v5442_v3 = vmul.f32 0.0625, %v2563_v41  ;;  %v2627_v28 = vadd.f32 %v2626_v36, %v2625_v5  ;;  %2393 = vadd.xlane.f32.xlu0 %v2392_v57  ;;  %v5444_v23 = vpop.f32.mrb[42].mxu0  ;;  %v2574_v43 = vrot.slane %v2573_v44, 2  ;;  %v2450_v57 = vsel %vm497_vm0, %v2362_v58, 0.0 }
 0x7bb   : > { %v5448_v9 = vmul.f32 0.0625, %v2556_v22  ;;  %v5450_v39 = vpop.f32.mrb[43].mxu0  ;;  %v2620_v7 = vadd.f32 %v2619_v60, %v2618_v34  ;;  %v2567_v40 = vrot.slane %v2566_v19, 2  ;;  %v2404_v62 = vsel %vm497_vm0, %v5437_v59, 0.0 }
 0x7bc   : > { %v2768_v30 = vsub.f32 %v5389_v20, %v5442_v3  ;;  %v2769_v0 = vsub.f32 %v5397_v45, %v5442_v3  ;;  %v2671_v1 = vmul.f32 0.0625, %v2627_v28  ;;  %v2679_v55 = vmul.f32 %v5442_v3, %v5442_v3  ;;  %2396 = vadd.xlane.f32.xlu1 %v2395_v38 }
 0x7bd   : > { %v2766_v10 = vsub.f32 %v5391_v50, %v5448_v9  ;;  %v2767_v24 = vsub.f32 %v5399_v37, %v5448_v9  ;;  %v2678_v27 = vmul.f32 %v5448_v9, %v5448_v9  ;;  %v2575_v61 = vadd.f32 %v2574_v43, %v2573_v44 }
 0x7be   : > { %v2687_v13 = vsub.f32 %v2671_v1, %v2679_v55  ;;  %2387 = vadd.xlane.f32.xlu0 %v2386_v21  ;;  %v2670_v52 = vmul.f32 0.0625, %v2620_v7  ;;  %v2568_v46 = vadd.f32 %v2567_v40, %v2566_v19  ;;  %v2453_v21 = vsel %vm497_vm0, %v2363_v15, 0.0 }
 0x7bf   : > { %v2576_v16 = vrot.slane %v2575_v61, 1  ;;  %v2628_v5 = vadd.f32 %v2453_v21, %v2450_v57  ;;  %v2407_v36 = vsel %vm497_vm0, %v5444_v23, 0.0  ;;  %v2401_v7 = vsel %vm497_vm0, %v5450_v39, 0.0 }
 0x7c0   : > { %v2695_v53 = vmax.f32 %v2687_v13, 0.0  ;;  %2390 = vadd.xlane.f32.xlu1 %v2389_v2  ;;  %v5467_v12 = vpop.f32.mrb[48].mxu1  ;;  %v2686_v48 = vsub.f32 %v2670_v52, %v2678_v27  ;;  %v2569_v4 = vrot.slane %v2568_v46, 1  ;;  %v2637_v2 = vadd.f32 %v2636_v47, %v2635_v29 }
 0x7c1   : > { %6113 = vst [vmem:[#allocation29_spill] sm:$0xff] %v5467_v12  ;;  %v5470_v38 = vpop.f32.mrb[49].mxu1  ;;  %v2577_v18 = vadd.f32 %v2576_v16, %v2575_v61  ;;  %v2629_v41 = vrot.slane %v2628_v5, 4  ;;  %v2585_v60 = vadd.f32 %v2407_v36, %v2404_v62  ;;  %v2368_v61 = vmul.f32 %v5437_v59, %v5437_v59 }
 0x7c2   : > { %v2783_v35 = vadd.f32 1e-05, %v2695_v53  ;;  %2457 = vadd.xlane.f32.xlu0 %v2456_v26  ;;  %v5473_v32 = vpop.f32.mrb[50].mxu1  ;;  %v2694_v33 = vmax.f32 %v2686_v48, 0.0  ;;  %v2570_v63 = vadd.f32 %v2569_v4, %v2568_v46  ;;  %v2638_v25 = vrot.slane %v2637_v2, 2 }
 0x7c3   : > { %6114 = vst [vmem:[#allocation17_spill] sm:$0xff] %v5473_v32  ;;  %v5475_v14 = vpop.f32.mrb[51].mxu1  ;;  %v5477_v17 = vmul.f32 0.0625, %v2577_v18  ;;  %v2630_v28 = vadd.f32 %v2629_v41, %v2628_v5  ;;  %v2586_v27 = vrot.slane %v2585_v60, 4  ;;  %v2369_v40 = vmul.f32 %v5444_v23, %v5444_v23 }
 0x7c4   : > { %6115 = vst [vmem:[#allocation30_spill] sm:$0xff] %v5475_v14  ;;  %3717 = vrsqrt.f32 %v2783_v35  ;;  %2460 = vadd.xlane.f32.xlu1 %v2459_v56  ;;  %v2782_v6 = vadd.f32 1e-05, %v2694_v33  ;;  %v5487_v22 = vmul.f32 0.0625, %v2570_v63  ;;  %v2639_v26 = vadd.f32 %v2638_v25, %v2637_v2 }
 0x7c5   : > { %v2772_v34 = vsub.f32 %v5417_v11, %v5477_v17  ;;  %v2773_v31 = vsub.f32 %v5421_v42, %v5477_v17  ;;  %v2681_v44 = vmul.f32 %v5477_v17, %v5477_v17  ;;  %v2398_v56 = vsel %vm497_vm0, %v5439_v8, 0.0 }
 0x7c6   : > { %2451 = vadd.xlane.f32.xlu0 %v2450_v57  ;;  %3719 = vrsqrt.f32 %v2782_v6  ;;  %v2770_v58 = vsub.f32 %v5419_v54, %v5487_v22  ;;  %v2771_v43 = vsub.f32 %v5425_v51, %v5487_v22  ;;  %v2680_v19 = vmul.f32 %v5487_v22, %v5487_v22 }
 0x7c7   : > { %v2640_v1 = vrot.slane %v2639_v26, 1  ;;  %v2631_v55 = vrot.slane %v2630_v28, 2  ;;  %v2578_v13 = vadd.f32 %v2401_v7, %v2398_v56  ;;  %v2366_v52 = vmul.f32 %v5439_v8, %v5439_v8 }
 0x7c8   : > { %2454 = vadd.xlane.f32.xlu1 %v2453_v21  ;;  %v2587_v53 = vadd.f32 %v2586_v27, %v2585_v60  ;;  %v2367_v16 = vmul.f32 %v5450_v39, %v5450_v39  ;;  %v2468_v57 = vsel %vm497_vm0, %v2368_v61, 0.0  ;;  %v2471_v48 = vsel %vm497_vm0, %v2369_v40, 0.0 }
 0x7c9   : > { %v2641_v29 = vadd.f32 %v2640_v1, %v2639_v26  ;;  %v2632_v15 = vadd.f32 %v2631_v55, %v2630_v28  ;;  %v2579_v46 = vrot.slane %v2578_v13, 4  ;;  %v2462_v47 = vsel %vm497_vm0, %v2366_v52, 0.0 }
 0x7ca   : > { %2405 = vadd.xlane.f32.xlu0 %v2404_v62  ;;  %v2588_v18 = vrot.slane %v2587_v53, 2  ;;  %v2649_v4 = vadd.f32 %v2471_v48, %v2468_v57  ;;  %v2465_v5 = vsel %vm497_vm0, %v2367_v16, 0.0  ;;  %v2416_v63 = vsel %vm497_vm0, %v5467_v12, 0.0 }
 0x7cb   : > { %v2673_v21 = vmul.f32 0.0625, %v2641_v29  ;;  %v2633_v35 = vrot.slane %v2632_v15, 1  ;;  %v2580_v2 = vadd.f32 %v2579_v46, %v2578_v13  ;;  %v2419_v62 = vsel %vm497_vm0, %v5473_v32, 0.0 }
 0x7cc   : > { %2408 = vadd.xlane.f32.xlu1 %v2407_v36  ;;  %v2589_v26 = vadd.f32 %v2588_v18, %v2587_v53  ;;  %v2650_v60 = vrot.slane %v2649_v4, 4  ;;  %v2599_v13 = vadd.f32 %v2419_v62, %v2416_v63 }
 0x7cd   : > { %v2689_v41 = vsub.f32 %v2673_v21, %v2681_v44  ;;  %v2634_v36 = vadd.f32 %v2633_v35, %v2632_v15  ;;  %v2581_v28 = vrot.slane %v2580_v2, 2 }
 0x7ce   : > { %v3718_v33 = vpop.eup %3717  ;;  %2399 = vadd.xlane.f32.xlu0 %v2398_v56  ;;  %v2642_v56 = vadd.f32 %v2465_v5, %v2462_v47  ;;  %v2651_v40 = vadd.f32 %v2650_v60, %v2649_v4  ;;  %v2600_v53 = vrot.slane %v2599_v13, 4  ;;  %v2413_v4 = vsel %vm497_vm0, %v5475_v14, 0.0 }
 0x7cf   : > { %v5520_v6 = vmul.f32 %v3718_v33, %v2768_v30  ;;  %v5525_v25 = vmul.f32 %v3718_v33, %v2769_v0  ;;  %v2697_v55 = vmax.f32 %v2689_v41, 0.0  ;;  %v2672_v27 = vmul.f32 0.0625, %v2634_v36 }
 0x7d0   : > { %2402 = vadd.xlane.f32.xlu1 %v2401_v7  ;;  %v3720_v1 = vpop.eup %3719  ;;  %v2590_v0 = vrot.slane %v2589_v26, 1  ;;  %v2582_v44 = vadd.f32 %v2581_v28, %v2580_v2  ;;  %v2643_v52 = vrot.slane %v2642_v56, 4 }
 0x7d1   : > { %v5530_v30 = vmul.f32 %v3720_v1, %v2766_v10  ;;  %v5535_v3 = vmul.f32 %v3720_v1, %v2767_v24  ;;  %v2785_v7 = vadd.f32 1e-05, %v2697_v55  ;;  %v2688_v61 = vsub.f32 %v2672_v27, %v2680_v19 }
 0x7d2   : > { %2469 = vadd.xlane.f32.xlu0 %v2468_v57  ;;  %v2591_v29 = vadd.f32 %v2590_v0, %v2589_v26  ;;  %v2583_v15 = vrot.slane %v2582_v44, 1  ;;  %v2652_v10 = vrot.slane %v2651_v40, 2  ;;  %v2644_v46 = vadd.f32 %v2643_v52, %v2642_v56 }
 0x7d3   : > { %3721 = vrsqrt.f32 %v2785_v7  ;;  %v2696_v16 = vmax.f32 %v2688_v61, 0.0  ;;  %v2601_v24 = vadd.f32 %v2600_v53, %v2599_v13  ;;  %v2410_v57 = vsel %vm497_vm0, %v5470_v38, 0.0 }
 0x7d4   : > { %2472 = vadd.xlane.f32.xlu1 %v2471_v48  ;;  %v5537_v21 = vmul.f32 0.0625, %v2591_v29  ;;  %v2584_v9 = vadd.f32 %v2583_v15, %v2582_v44  ;;  %v2653_v19 = vadd.f32 %v2652_v10, %v2651_v40  ;;  %v2645_v18 = vrot.slane %v2644_v46, 2 }
 0x7d5   : > { %v2784_v35 = vadd.f32 1e-05, %v2696_v16  ;;  %v2602_v26 = vrot.slane %v2601_v24, 2  ;;  %v2592_v1 = vadd.f32 %v2413_v4, %v2410_v57  ;;  %v2371_v44 = vmul.f32 %v5475_v14, %v5475_v14 }
 0x7d6   : > { %2463 = vadd.xlane.f32.xlu0 %v2462_v47  ;;  %v2776_v48 = vsub.f32 %v5437_v59, %v5537_v21  ;;  %v2777_v33 = vsub.f32 %v5444_v23, %v5537_v21  ;;  %v5547_v2 = vmul.f32 0.0625, %v2584_v9  ;;  %v2683_v47 = vmul.f32 %v5537_v21, %v5537_v21 }
 0x7d7   : > { %3723 = vrsqrt.f32 %v2784_v35  ;;  %v2654_v41 = vrot.slane %v2653_v19, 1  ;;  %v2646_v36 = vadd.f32 %v2645_v18, %v2644_v46  ;;  %v2603_v13 = vadd.f32 %v2602_v26, %v2601_v24 }
 0x7d8   : > { %2466 = vadd.xlane.f32.xlu1 %v2465_v5  ;;  %v2774_v28 = vsub.f32 %v5439_v8, %v5547_v2  ;;  %v2775_v60 = vsub.f32 %v5450_v39, %v5547_v2  ;;  %v2682_v56 = vmul.f32 %v5547_v2, %v5547_v2  ;;  %v2370_v5 = vmul.f32 %v5470_v38, %v5470_v38 }
 0x7d9   : > { %v2655_v55 = vadd.f32 %v2654_v41, %v2653_v19  ;;  %v2647_v27 = vrot.slane %v2646_v36, 1  ;;  %v2593_v0 = vrot.slane %v2592_v1, 4  ;;  %v2372_v7 = vmul.f32 %v5467_v12, %v5467_v12 }
 0x7da   : > { %2417 = vadd.xlane.f32.xlu0 %v2416_v63  ;;  %v2373_v61 = vmul.f32 %v5473_v32, %v5473_v32  ;;  %v2604_v52 = vrot.slane %v2603_v13, 1  ;;  %v2474_v29 = vsel %vm497_vm0, %v2370_v5, 0.0  ;;  %v2477_v53 = vsel %vm497_vm0, %v2371_v44, 0.0 }
 0x7db   : > { %v2675_v40 = vmul.f32 0.0625, %v2655_v55  ;;  %v2648_v63 = vadd.f32 %v2647_v27, %v2646_v36  ;;  %v2594_v15 = vadd.f32 %v2593_v0, %v2592_v1  ;;  %v2656_v35 = vadd.f32 %v2477_v53, %v2474_v29 }
 0x7dc   : > { %2420 = vadd.xlane.f32.xlu1 %v2419_v62  ;;  %v2480_v62 = vsel %vm497_vm0, %v2372_v7, 0.0  ;;  %v2483_v16 = vsel %vm497_vm0, %v2373_v61, 0.0  ;;  %v2605_v24 = vadd.f32 %v2604_v52, %v2603_v13 }
 0x7dd   : > { %v3722_v10 = vpop.eup %3721  ;;  %v2691_v46 = vsub.f32 %v2675_v40, %v2683_v47  ;;  %v2674_v9 = vmul.f32 0.0625, %v2648_v63  ;;  %v2595_v18 = vrot.slane %v2594_v15, 2  ;;  %v2663_v41 = vadd.f32 %v2483_v16, %v2480_v62 }
 0x7de   : > { %2411 = vadd.xlane.f32.xlu0 %v2410_v57  ;;  %v5572_v19 = vmul.f32 %v3722_v10, %v2772_v34  ;;  %v5577_v57 = vmul.f32 %v3722_v10, %v2773_v31  ;;  %v2613_v1 = vmul.f32 0.0625, %v2605_v24  ;;  %v2657_v47 = vrot.slane %v2656_v35, 4 }
 0x7df   : > { %v2699_v36 = vmax.f32 %v2691_v46, 0.0  ;;  %v2690_v26 = vsub.f32 %v2674_v9, %v2682_v56  ;;  %v2596_v55 = vadd.f32 %v2595_v18, %v2594_v15  ;;  %v2664_v27 = vrot.slane %v2663_v41, 4 }
 0x7e0   : > { %2414 = vadd.xlane.f32.xlu1 %v2413_v4  ;;  %v2780_v34 = vsub.f32 %v5467_v12, %v2613_v1  ;;  %v2781_v44 = vsub.f32 %v5473_v32, %v2613_v1  ;;  %v2658_v56 = vadd.f32 %v2657_v47, %v2656_v35  ;;  %v2685_v35 = vmul.f32 %v2613_v1, %v2613_v1 }
 0x7e1   : > { %v3724_v13 = vpop.eup %3723  ;;  %v2787_v5 = vadd.f32 1e-05, %v2699_v36  ;;  %v2698_v0 = vmax.f32 %v2690_v26, 0.0  ;;  %v2597_v4 = vrot.slane %v2596_v55, 1  ;;  %v2665_v61 = vadd.f32 %v2664_v27, %v2663_v41 }
 0x7e2   : > { %2475 = vadd.xlane.f32.xlu0 %v2474_v29  ;;  %v5584_v17 = vmul.f32 %v3724_v13, %v2770_v58  ;;  %v5589_v31 = vmul.f32 %v3724_v13, %v2771_v43  ;;  %v2659_v63 = vrot.slane %v2658_v56, 2 }
 0x7e3   : > { %3725 = vrsqrt.f32 %v2787_v5  ;;  %v2786_v7 = vadd.f32 1e-05, %v2698_v0  ;;  %v2598_v40 = vadd.f32 %v2597_v4, %v2596_v55  ;;  %v2666_v52 = vrot.slane %v2665_v61, 2 }
 0x7e4   : > { %2478 = vadd.xlane.f32.xlu1 %v2477_v53  ;;  %v2660_v15 = vadd.f32 %v2659_v63, %v2658_v56 }
 0x7e5   : > { %3727 = vrsqrt.f32 %v2786_v7  ;;  %v2612_v29 = vmul.f32 0.0625, %v2598_v40  ;;  %v2667_v58 = vadd.f32 %v2666_v52, %v2665_v61  ;;  %v2815_v52 = vld [vmem:[#allocation8 + $0x8] sm:$0xf] }
 0x7e6   : > { %2481 = vadd.xlane.f32.xlu0 %v2480_v62  ;;  %v2661_v43 = vrot.slane %v2660_v15, 1 }
 0x7e7   : > { %v2778_v10 = vsub.f32 %v5470_v38, %v2612_v29  ;;  %v2779_v22 = vsub.f32 %v5475_v14, %v2612_v29  ;;  %v2668_v46 = vrot.slane %v2667_v58, 1  ;;  %v2684_v53 = vmul.f32 %v2612_v29, %v2612_v29 }
 0x7e8   : > { %2484 = vadd.xlane.f32.xlu1 %v2483_v16  ;;  %v2662_v9 = vadd.f32 %v2661_v43, %v2660_v15 }
 0x7e9   : > { %v2669_v24 = vadd.f32 %v2668_v46, %v2667_v58 }
 0x7ea   : > { %v2676_v18 = vmul.f32 0.0625, %v2662_v9 }
 0x7eb   : > { %v2677_v36 = vmul.f32 0.0625, %v2669_v24 }
 0x7ec   : > { %v2692_v26 = vsub.f32 %v2676_v18, %v2684_v53 }
 0x7ed   : > { %v3726_v41 = vpop.eup %3725  ;;  %v2693_v55 = vsub.f32 %v2677_v36, %v2685_v35  ;;  %v6118_v35 = vld [vmem:[#allocation26_spill] sm:$0xff] }
 0x7ee   : > { %v5596_v62 = vmul.f32 %v3726_v41, %v2776_v48  ;;  %v5601_v16 = vmul.f32 %v3726_v41, %v2777_v33  ;;  %v2700_v48 = vmax.f32 %v2692_v26, 0.0  ;;  %v5635_v18 = vrot.slane %v2815_v52, %v6118_v35 }
 0x7ef   : > { %v3728_v47 = vpop.eup %3727  ;;  %v2701_v13 = vmax.f32 %v2693_v55, 0.0 }
 0x7f0   : > { %v5606_v1 = vmul.f32 %v3728_v47, %v2774_v28  ;;  %v5611_v27 = vmul.f32 %v3728_v47, %v2775_v60  ;;  %v2788_v5 = vadd.f32 1e-05, %v2700_v48  ;;  %6119 = vst [vmem:[#allocation28_spill] sm:$0xff] %v5635_v18  ;;  %v5640_v48 = vrot.slane %v2815_v52, %v6101_v49 }
 0x7f1   : > { %v2789_v0 = vadd.f32 1e-05, %v2701_v13 }
 0x7f2   : > { %3729 = vrsqrt.f32 %v2788_v5 }
 0x7f3   : > { %3731 = vrsqrt.f32 %v2789_v0 }
 0x7fc   : > { %v3730_v21 = vpop.eup %3729 }
 0x7fd   : > { %v3732_v33 = vpop.eup %3731  ;;  %v5613_v4 = vmul.f32 %v3730_v21, %v2778_v10  ;;  %v5615_v56 = vmul.f32 %v3730_v21, %v2779_v22 }
 0x7fe   : > { %v5617_v7 = vmul.f32 %v3732_v33, %v2780_v34  ;;  %v5619_v28 = vmul.f32 %v3732_v33, %v2781_v44  ;;  %v6117_v34 = vld [vmem:[#allocation24_spill] sm:$0xff] }
 0x7ff   : > { %v2819_v43 = vrot.slane %v2815_v52, %v6117_v34 }
 0x800   : > { %6116 = vst [vmem:[#allocation19_spill] sm:$0xff] %v5617_v7 }
 0x801   : > { %v5643_v13 = vmul.f32 %v5389_v20, %v2819_v43  ;;  %v5646_v5 = vmul.f32 %v2819_v43, %v5391_v50  ;;  %v5654_v49 = vmul.f32 %v2819_v43, %v5399_v37  ;;  %v5669_v35 = vmul.f32 %v5437_v59, %v2819_v43 }
 0x837   : > { %v2382_v61 = vpop.xlane.xlu0 %2381 }
 0x838   : > { %v5621_v40 = vmul.f32 0.03125, %v2382_v61 }
 0x839   : > { %v2385_v2 = vpop.xlane.xlu1 %2384 }
 0x83a   : > { %v5623_v29 = vmul.f32 0.03125, %v2385_v2  ;;  %v2504_v58 = vmul.f32 %v5621_v40, %v5621_v40 }
 0x83b   : > { %v2376_v60 = vpop.xlane.xlu0 %2375 }
 0x83c   : > { %v5627_v10 = vmul.f32 0.03125, %v2376_v60  ;;  %v2505_v53 = vmul.f32 %v5623_v29, %v5623_v29 }
 0x83d   : > { %v2379_v63 = vpop.xlane.xlu1 %2378 }
 0x83e   : > { %v5630_v44 = vmul.f32 0.03125, %v2379_v63  ;;  %v2502_v36 = vmul.f32 %v5627_v10, %v5627_v10  ;;  %v5651_v63 = vmul.f32 %v5397_v45, %v2819_v43 }
 0x83f   : > { %v2446_v15 = vpop.xlane.xlu0 %2445 }
 0x840   : > { %v2488_v22 = vmul.f32 0.03125, %v2446_v15  ;;  %v2503_v0 = vmul.f32 %v5630_v44, %v5630_v44  ;;  %v5657_v15 = vmul.f32 %v5417_v11, %v2819_v43 }
 0x841   : > { %v2449_v46 = vpop.xlane.xlu1 %2448 }
 0x842   : > { %v2520_v9 = vsub.f32 %v2488_v22, %v2504_v58  ;;  %v2489_v24 = vmul.f32 0.03125, %v2449_v46  ;;  %v5660_v58 = vmul.f32 %v2819_v43, %v5419_v54 }
 0x843   : > { %v2440_v41 = vpop.xlane.xlu0 %2439 }
 0x844   : > { %v2536_v26 = vmax.f32 %v2520_v9, 0.0  ;;  %v2521_v47 = vsub.f32 %v2489_v24, %v2505_v53  ;;  %v2486_v55 = vmul.f32 0.03125, %v2440_v41  ;;  %v5663_v9 = vmul.f32 %v5421_v42, %v2819_v43 }
 0x845   : > { %v2443_v21 = vpop.xlane.xlu1 %2442  ;;  %v5666_v24 = vmul.f32 %v2819_v43, %v5425_v51  ;;  %v5672_v41 = vmul.f32 %v2819_v43, %v5439_v8 }
 0x846   : > { %v2720_v33 = vadd.f32 1e-05, %v2536_v26  ;;  %v2537_v61 = vmax.f32 %v2521_v47, 0.0  ;;  %v2518_v2 = vsub.f32 %v2486_v55, %v2502_v36  ;;  %v2487_v60 = vmul.f32 0.03125, %v2443_v21 }
 0x847   : > { %v2394_v22 = vpop.xlane.xlu0 %2393  ;;  %v5675_v26 = vmul.f32 %v5444_v23, %v2819_v43  ;;  %v5681_v21 = vmul.f32 %v5467_v12, %v2819_v43  ;;  %v5767_v12 = vmul.f32 %v5635_v18, %v5613_v4 }
 0x848   : > { %3733 = vrsqrt.f32 %v2720_v33  ;;  %v2721_v34 = vadd.f32 1e-05, %v2537_v61  ;;  %v2534_v46 = vmax.f32 %v2518_v2, 0.0  ;;  %v2519_v53 = vsub.f32 %v2487_v60, %v2503_v0 }
 0x849   : > { %v2397_v36 = vpop.xlane.xlu1 %2396  ;;  %v5678_v0 = vmul.f32 %v2819_v43, %v5450_v39  ;;  %6120 = vst [vmem:[#allocation16_spill] sm:$0xff] %v5681_v21  ;;  %v5684_v33 = vmul.f32 %v2819_v43, %v5470_v38  ;;  %v5687_v61 = vmul.f32 %v5473_v32, %v2819_v43  ;;  %v5690_v60 = vmul.f32 %v2819_v43, %v5475_v14 }
 0x84a   : > { %3735 = vrsqrt.f32 %v2721_v34  ;;  %v2718_v47 = vadd.f32 1e-05, %v2534_v46  ;;  %v2535_v55 = vmax.f32 %v2519_v53, 0.0  ;;  %v5692_v46 = vmul.f32 0.03125, %v2394_v22  ;;  %6128 = vst [vmem:[#allocation24_spill] sm:$0xff] %v5767_v12 }
 0x84b   : > { %6121 = vst [vmem:[#allocation25_spill] sm:$0xff] %v5684_v33  ;;  %6122 = vst [vmem:[#allocation20_spill] sm:$0xff] %v5687_v61  ;;  %v2388_v2 = vpop.xlane.xlu0 %2387  ;;  %v5696_v53 = vmul.f32 %v5635_v18, %v5525_v25  ;;  %v5700_v21 = vmul.f32 %v5635_v18, %v5535_v3  ;;  %v5704_v33 = vmul.f32 %v5635_v18, %v5577_v57  ;;  %v6124_v61 = vld [vmem:[#allocation27_spill] sm:$0xff] }
 0x84c   : > { %6123 = vst [vmem:[#allocation18_spill] sm:$0xff] %v5690_v60  ;;  %3737 = vrsqrt.f32 %v2718_v47  ;;  %v2719_v34 = vadd.f32 1e-05, %v2535_v55  ;;  %v5707_v32 = vrot.slane %v2815_v52, %v6124_v61  ;;  %v5711_v22 = vmul.f32 %v5635_v18, %v5589_v31 }
 0x84d   : > { %v2391_v43 = vpop.xlane.xlu1 %2390  ;;  %v2878_v25 = vmul.f32 %v5635_v18, %v5520_v6  ;;  %v5715_v47 = vmul.f32 0.03125, %v2397_v36  ;;  %v5719_v3 = vmul.f32 %v5635_v18, %v5601_v16  ;;  %v5723_v57 = vmul.f32 %v5635_v18, %v5530_v30 }
 0x84e   : > { %3739 = vrsqrt.f32 %v2719_v34  ;;  %v5727_v55 = vmul.f32 %v5635_v18, %v5572_v19  ;;  %v5731_v31 = vmul.f32 %v5635_v18, %v5584_v17  ;;  %v2508_v6 = vmul.f32 %v5692_v46, %v5692_v46 }
 0x84f   : > { %v2458_v52 = vpop.xlane.xlu0 %2457  ;;  %v5735_v36 = vmul.f32 0.03125, %v2388_v2  ;;  %v5739_v61 = vmul.f32 %v5635_v18, %v5596_v62  ;;  %v5743_v30 = vmul.f32 %v5635_v18, %v5611_v27  ;;  %v2704_v19 = vsub.f32 %v5389_v20, %v5621_v40 }
 0x850   : > { %v2492_v16 = vmul.f32 0.03125, %v2458_v52  ;;  %v5747_v34 = vmul.f32 0.03125, %v2391_v43  ;;  %v5751_v60 = vmul.f32 %v5635_v18, %v5606_v1  ;;  %v5755_v52 = vmul.f32 %v5635_v18, %v5615_v56 }
 0x851   : > { %6125 = vst [vmem:[#allocation21_spill] sm:$0xff] %v5743_v30  ;;  %v2461_v17 = vpop.xlane.xlu1 %2460  ;;  %v2509_v62 = vmul.f32 %v5715_v47, %v5715_v47  ;;  %v5761_v20 = vmul.f32 %v5635_v18, %v5619_v28  ;;  %v2705_v40 = vsub.f32 %v5397_v45, %v5623_v29  ;;  %v2702_v28 = vsub.f32 %v5391_v50, %v5627_v10 }
 0x852   : > { %v3734_v2 = vpop.eup %3733  ;;  %6126 = vst [vmem:[#allocation22_spill] sm:$0xff] %v5755_v52  ;;  %v2524_v27 = vsub.f32 %v2492_v16, %v2508_v6  ;;  %v2493_v14 = vmul.f32 0.03125, %v2461_v17  ;;  %v2506_v52 = vmul.f32 %v5735_v36, %v5735_v36  ;;  %v2507_v45 = vmul.f32 %v5747_v34, %v5747_v34 }
 0x853   : > { %6127 = vst [vmem:[#allocation23_spill] sm:$0xff] %v5761_v20  ;;  %v2752_v43 = vmul.f32 %v3734_v2, %v2704_v19  ;;  %v2452_v1 = vpop.xlane.xlu0 %2451 }
 0x854   : > { %v3736_v56 = vpop.eup %3735  ;;  %v2540_v7 = vmax.f32 %v2524_v27, 0.0  ;;  %v2525_v6 = vsub.f32 %v2493_v14, %v2509_v62  ;;  %v2490_v16 = vmul.f32 0.03125, %v2452_v1  ;;  %v2703_v27 = vsub.f32 %v5399_v37, %v5630_v44 }
 0x855   : > { %v2842_v17 = vmul.f32 %v5707_v32, %v2752_v43  ;;  %v2753_v20 = vmul.f32 %v3736_v56, %v2705_v40  ;;  %v2455_v29 = vpop.xlane.xlu1 %2454  ;;  %v2708_v37 = vsub.f32 %v5417_v11, %v5692_v46 }
 0x856   : > { %v3738_v19 = vpop.eup %3737  ;;  %v2724_v4 = vadd.f32 1e-05, %v2540_v7  ;;  %v2541_v2 = vmax.f32 %v2525_v6, 0.0  ;;  %v2522_v12 = vsub.f32 %v2490_v16, %v2506_v52  ;;  %v2491_v18 = vmul.f32 0.03125, %v2455_v29 }
 0x857   : > { %v2858_v14 = vadd.f32 %v2842_v17, %v5643_v13  ;;  %v2843_v62 = vmul.f32 %v5707_v32, %v2753_v20  ;;  %v2750_v50 = vmul.f32 %v3738_v19, %v2702_v28  ;;  %v2406_v10 = vpop.xlane.xlu0 %2405 }
 0x858   : > { %v3740_v43 = vpop.eup %3739  ;;  %3741 = vrsqrt.f32 %v2724_v4  ;;  %v2725_v40 = vadd.f32 1e-05, %v2541_v2  ;;  %v2538_v1 = vmax.f32 %v2522_v12, 0.0  ;;  %v2523_v56 = vsub.f32 %v2491_v18, %v2507_v45 }
 0x859   : > { %v2894_v30 = vadd.f32 %v2878_v25, %v2858_v14  ;;  %v2859_v7 = vadd.f32 %v2843_v62, %v5651_v63  ;;  %v2840_v52 = vmul.f32 %v5707_v32, %v2750_v50  ;;  %v2751_v6 = vmul.f32 %v3740_v43, %v2703_v27  ;;  %v2409_v16 = vpop.xlane.xlu1 %2408 }
 0x85a   : > { %3743 = vrsqrt.f32 %v2725_v40  ;;  %v2722_v44 = vadd.f32 1e-05, %v2538_v1  ;;  %v2539_v13 = vmax.f32 %v2523_v56, 0.0  ;;  %v2709_v63 = vsub.f32 %v5421_v42, %v5715_v47 }
 0x85b   : > { %v2914_v20 = vadd.f32 %v5640_v48, %v2894_v30  ;;  %v2895_v28 = vadd.f32 %v5696_v53, %v2859_v7  ;;  %v2856_v12 = vadd.f32 %v2840_v52, %v5646_v5  ;;  %v2841_v18 = vmul.f32 %v5707_v32, %v2751_v6  ;;  %v2400_v25 = vpop.xlane.xlu0 %2399 }
 0x85c   : > { %3745 = vrsqrt.f32 %v2722_v44  ;;  %v2723_v17 = vadd.f32 1e-05, %v2539_v13  ;;  %v5790_v45 = vmul.f32 0.03125, %v2406_v10  ;;  %v2706_v5 = vsub.f32 %v5419_v54, %v5735_v36 }
 0x85d   : > { %vm2930_vm3 = vcmp.gt.f32.partialorder %v2914_v20, 0.0  ;;  %v2946_v11 = vmul.f32 0.2, %v2914_v20  ;;  %v2915_v46 = vadd.f32 %v5640_v48, %v2895_v28  ;;  %v2892_v30 = vadd.f32 %v5723_v57, %v2856_v12  ;;  %v2403_v29 = vpop.xlane.xlu1 %2402 }
 0x85e   : > { %v2857_v53 = vadd.f32 %v2841_v18, %v5654_v49  ;;  %3747 = vrsqrt.f32 %v2723_v17  ;;  %v5797_v19 = vmul.f32 0.03125, %v2409_v16  ;;  %v2707_v57 = vsub.f32 %v5425_v51, %v5747_v34 }
 0x85f   : > { %v2962_v42 = vsel %vm2930_vm3, %v2914_v20, %v2946_v11  ;;  %vm2931_vm4 = vcmp.gt.f32.partialorder %v2915_v46, 0.0  ;;  %v2947_v47 = vmul.f32 0.2, %v2915_v46  ;;  %v2912_v4 = vadd.f32 %v5640_v48, %v2892_v30  ;;  %v2470_v2 = vpop.xlane.xlu0 %2469 }
 0x860   : > { %v2893_v27 = vadd.f32 %v5700_v21, %v2857_v53  ;;  %v2512_v49 = vmul.f32 %v5790_v45, %v5790_v45  ;;  %v5805_v14 = vmul.f32 0.03125, %v2400_v25  ;;  %v2712_v62 = vsub.f32 %v5437_v59, %v5790_v45 }
 0x861   : > { %v2963_v54 = vsel %vm2931_vm4, %v2915_v46, %v2947_v47  ;;  %vm2928_vm5 = vcmp.gt.f32.partialorder %v2912_v4, 0.0  ;;  %v2944_v36 = vmul.f32 0.2, %v2912_v4  ;;  %v2473_v50 = vpop.xlane.xlu1 %2472  ;;  %v2985_v43 = vsel %vm497_vm0, %v2962_v42, 0.0 }
 0x862   : > { %v3742_v10 = vpop.eup %3741  ;;  %v2986_v21 = vsel %vm497_vm0, %v2963_v54, 0.0  ;;  %v2913_v40 = vadd.f32 %v5640_v48, %v2893_v27  ;;  %v2513_v51 = vmul.f32 %v5797_v19, %v5797_v19  ;;  %v2496_v7 = vmul.f32 0.03125, %v2470_v2 }
 0x863   : > { %v2987_v34 = vadd.f32 %v2986_v21, %v2985_v43  ;;  %v2960_v1 = vsel %vm2928_vm5, %v2912_v4, %v2944_v36  ;;  %v2756_v56 = vmul.f32 %v3742_v10, %v2708_v37  ;;  %v2464_v52 = vpop.xlane.xlu0 %2463  ;;  %v2713_v44 = vsub.f32 %v5444_v23, %v5797_v19 }
 0x864   : > { %v3744_v6 = vpop.eup %3743  ;;  %vm2929_vm6 = vcmp.gt.f32.partialorder %v2913_v40, 0.0  ;;  %v2945_v16 = vmul.f32 0.2, %v2913_v40  ;;  %v2510_v13 = vmul.f32 %v5805_v14, %v5805_v14  ;;  %v2710_v12 = vsub.f32 %v5439_v8, %v5805_v14 }
 0x865   : > { %v2846_v20 = vmul.f32 %v5707_v32, %v2756_v56  ;;  %v2757_v28 = vmul.f32 %v3744_v6, %v2709_v63  ;;  %v5821_v18 = vmul.f32 0.03125, %v2403_v29  ;;  %v2467_v37 = vpop.xlane.xlu1 %2466  ;;  %v2976_v17 = vsel %vm497_vm0, %v2960_v1, 0.0 }
 0x866   : > { %v3746_v25 = vpop.eup %3745  ;;  %v2961_v11 = vsel %vm2929_vm6, %v2913_v40, %v2945_v16  ;;  %v2528_v46 = vsub.f32 %v2496_v7, %v2512_v49  ;;  %v2497_v30 = vmul.f32 0.03125, %v2473_v50  ;;  %v2494_v4 = vmul.f32 0.03125, %v2464_v52 }
 0x867   : > { %v2977_v53 = vsel %vm497_vm0, %v2961_v11, 0.0  ;;  %v2862_v42 = vadd.f32 %v2846_v20, %v5657_v15  ;;  %v2847_v47 = vmul.f32 %v5707_v32, %v2757_v28  ;;  %v2418_v63 = vpop.xlane.xlu0 %2417  ;;  %v2754_v54 = vmul.f32 %v3746_v25, %v2706_v5 }
 0x868   : > { %v3748_v2 = vpop.eup %3747  ;;  %v2978_v27 = vadd.f32 %v2977_v53, %v2976_v17  ;;  %v2544_v29 = vmax.f32 %v2528_v46, 0.0  ;;  %v2529_v36 = vsub.f32 %v2497_v30, %v2513_v51  ;;  %v2511_v49 = vmul.f32 %v5821_v18, %v5821_v18 }
 0x869   : > { %v2898_v10 = vadd.f32 %v5727_v55, %v2862_v42  ;;  %v2863_v43 = vadd.f32 %v2847_v47, %v5663_v9  ;;  %v2755_v21 = vmul.f32 %v3748_v2, %v2707_v57  ;;  %v2421_v50 = vpop.xlane.xlu1 %2420  ;;  %v2988_v40 = vrot.slane %v2987_v34, 4 }
 0x86a   : > { %v2844_v15 = vmul.f32 %v5707_v32, %v2754_v54  ;;  %v2728_v1 = vadd.f32 1e-05, %v2544_v29  ;;  %v2545_v56 = vmax.f32 %v2529_v36, 0.0  ;;  %v2526_v52 = vsub.f32 %v2494_v4, %v2510_v13 }
 0x86b   : > { %v2918_v7 = vadd.f32 %v5640_v48, %v2898_v10  ;;  %v2899_v5 = vadd.f32 %v5704_v33, %v2863_v43  ;;  %v2845_v51 = vmul.f32 %v5707_v32, %v2755_v21  ;;  %v2412_v55 = vpop.xlane.xlu0 %2411  ;;  %v2979_v6 = vrot.slane %v2978_v27, 4 }
 0x86c   : > { %v2860_v9 = vadd.f32 %v2844_v15, %v5660_v58  ;;  %3749 = vrsqrt.f32 %v2728_v1  ;;  %v2729_v57 = vadd.f32 1e-05, %v2545_v56  ;;  %v5838_v17 = vadd.f32 %v2988_v40, %v2987_v34 }
 0x86d   : > { %vm2934_vm7 = vcmp.gt.f32.partialorder %v2918_v7, 0.0  ;;  %v2950_v16 = vmul.f32 0.2, %v2918_v7  ;;  %v2919_v20 = vadd.f32 %v5640_v48, %v2899_v5  ;;  %v2861_v28 = vadd.f32 %v2845_v51, %v5666_v24  ;;  %v2415_v25 = vpop.xlane.xlu1 %2414 }
 0x86e   : > { %v2896_v33 = vadd.f32 %v5731_v31, %v2860_v9  ;;  %3751 = vrsqrt.f32 %v2729_v57  ;;  %v2542_v11 = vmax.f32 %v2526_v52, 0.0  ;;  %v2980_v30 = vadd.f32 %v2979_v6, %v2978_v27 }
 0x86f   : > { %v2966_v13 = vsel %vm2934_vm7, %v2918_v7, %v2950_v16  ;;  %vm2935_vm8 = vcmp.gt.f32.partialorder %v2919_v20, 0.0  ;;  %v2951_v46 = vmul.f32 0.2, %v2919_v20  ;;  %v2897_v58 = vadd.f32 %v5711_v22, %v2861_v28  ;;  %v2476_v31 = vpop.xlane.xlu0 %2475 }
 0x870   : > { %v2916_v53 = vadd.f32 %v5640_v48, %v2896_v33  ;;  %v2726_v42 = vadd.f32 1e-05, %v2542_v11  ;;  %v2495_v47 = vmul.f32 0.03125, %v2467_v37  ;;  %v3003_v4 = vsel %vm497_vm0, %v2966_v13, 0.0 }
 0x871   : > { %v2967_v24 = vsel %vm2935_vm8, %v2919_v20, %v2951_v46  ;;  %v2917_v34 = vadd.f32 %v5640_v48, %v2897_v58  ;;  %v5845_v2 = vmul.f32 0.03125, %v2418_v63  ;;  %v2479_v54 = vpop.xlane.xlu1 %2478  ;;  %v2990_v37 = vrot.slane %v5838_v17, 2 }
 0x872   : > { %v3004_v29 = vsel %vm497_vm0, %v2967_v24, 0.0  ;;  %vm2932_vm9 = vcmp.gt.f32.partialorder %v2916_v53, 0.0  ;;  %v2948_v36 = vmul.f32 0.2, %v2916_v53  ;;  %3753 = vrsqrt.f32 %v2726_v42 }
 0x873   : > { %v5848_v22 = vadd.f32 %v3004_v29, %v3003_v4  ;;  %vm2933_vm10 = vcmp.gt.f32.partialorder %v2917_v34, 0.0  ;;  %v2949_v27 = vmul.f32 0.2, %v2917_v34  ;;  %v2527_v10 = vsub.f32 %v2495_v47, %v2511_v49  ;;  %v2482_v16 = vpop.xlane.xlu0 %2481 }
 0x874   : > { %v2964_v43 = vsel %vm2932_vm9, %v2916_v53, %v2948_v36  ;;  %v2711_v21 = vsub.f32 %v5450_v39, %v5821_v18  ;;  %v5853_v63 = vmul.f32 0.03125, %v2421_v50  ;;  %v2981_v40 = vrot.slane %v2980_v30, 2 }
 0x875   : > { %v2965_v15 = vsel %vm2933_vm10, %v2917_v34, %v2949_v27  ;;  %v2543_v1 = vmax.f32 %v2527_v10, 0.0  ;;  %v2516_v56 = vmul.f32 %v5845_v2, %v5845_v2  ;;  %v2994_v5 = vsel %vm497_vm0, %v2964_v43, 0.0  ;;  %v2485_v20 = vpop.xlane.xlu1 %2484 }
 0x876   : > { %v3750_v7 = vpop.eup %3749  ;;  %v2995_v51 = vsel %vm497_vm0, %v2965_v15, 0.0  ;;  %v5859_v49 = vmul.f32 0.03125, %v2412_v55  ;;  %v5861_v52 = vmul.f32 0.03125, %v2415_v25  ;;  %v2498_v57 = vmul.f32 0.03125, %v2476_v31 }
 0x877   : > { %v2996_v6 = vadd.f32 %v2995_v51, %v2994_v5  ;;  %v2760_v50 = vmul.f32 %v3750_v7, %v2712_v62  ;;  %v2727_v9 = vadd.f32 1e-05, %v2543_v1  ;;  %v3006_v33 = vrot.slane %v5848_v22, 4 }
 0x878   : > { %v3752_v28 = vpop.eup %3751  ;;  %v2517_v11 = vmul.f32 %v5853_v63, %v5853_v63  ;;  %v2514_v55 = vmul.f32 %v5859_v49, %v5859_v49  ;;  %v2515_v25 = vmul.f32 %v5861_v52, %v5861_v52  ;;  %v2499_v46 = vmul.f32 0.03125, %v2479_v54 }
 0x879   : > { %v2997_v13 = vrot.slane %v2996_v6, 4  ;;  %v2850_v59 = vmul.f32 %v5707_v32, %v2760_v50  ;;  %v2761_v45 = vmul.f32 %v3752_v28, %v2713_v44  ;;  %3755 = vrsqrt.f32 %v2727_v9 }
 0x87a   : > { %v2530_v62 = vsub.f32 %v2498_v57, %v2514_v55  ;;  %v2500_v58 = vmul.f32 0.03125, %v2482_v16  ;;  %v2501_v53 = vmul.f32 0.03125, %v2485_v20  ;;  %v2982_v24 = vadd.f32 %v2981_v40, %v2980_v30 }
 0x87b   : > { %v2998_v42 = vadd.f32 %v2997_v13, %v2996_v6  ;;  %v2866_v47 = vadd.f32 %v2850_v59, %v5669_v35  ;;  %v2851_v4 = vmul.f32 %v5707_v32, %v2761_v45  ;;  %v2531_v29 = vsub.f32 %v2499_v46, %v2515_v25 }
 0x87c   : > { %v3754_v34 = vpop.eup %3753  ;;  %v2546_v31 = vmax.f32 %v2530_v62, 0.0  ;;  %v2532_v36 = vsub.f32 %v2500_v58, %v2516_v56  ;;  %v2533_v27 = vsub.f32 %v2501_v53, %v2517_v11  ;;  %v2983_v44 = vrot.slane %v2982_v24, 1 }
 0x87d   : > { %v2902_v10 = vadd.f32 %v5739_v61, %v2866_v47  ;;  %v2867_v23 = vadd.f32 %v2851_v4, %v5675_v26  ;;  %v2758_v19 = vmul.f32 %v3754_v34, %v2710_v12  ;;  %v2547_v43 = vmax.f32 %v2531_v29, 0.0  ;;  %v6130_v4 = vld [vmem:[#allocation19_spill] sm:$0xff] }
 0x87e   : > { %v2730_v54 = vadd.f32 1e-05, %v2546_v31  ;;  %v2548_v35 = vmax.f32 %v2532_v36, 0.0  ;;  %v2549_v15 = vmax.f32 %v2533_v27, 0.0  ;;  %v2984_v56 = vadd.f32 %v2983_v44, %v2982_v24  ;;  %v6131_v24 = vld [vmem:[#allocation28_spill] sm:$0xff]  ;;  %v6134_v27 = vld [vmem:[#allocation30_spill] sm:$0xff] }
 0x87f   : > { %v2922_v30 = vadd.f32 %v5640_v48, %v2902_v10  ;;  %v2903_v40 = vadd.f32 %v5719_v3, %v2867_v23  ;;  %v2848_v1 = vmul.f32 %v5707_v32, %v2758_v19  ;;  %v2731_v61 = vadd.f32 1e-05, %v2547_v43 }
 0x880   : > { %3757 = vrsqrt.f32 %v2730_v54  ;;  %v2732_v7 = vadd.f32 1e-05, %v2548_v35  ;;  %v2733_v26 = vadd.f32 1e-05, %v2549_v15  ;;  %v2991_v12 = vadd.f32 %v2990_v37, %v5838_v17 }
 0x881   : > { %vm2938_vm11 = vcmp.gt.f32.partialorder %v2922_v30, 0.0  ;;  %v2954_v5 = vmul.f32 0.2, %v2922_v30  ;;  %v2923_v8 = vadd.f32 %v5640_v48, %v2903_v40  ;;  %v2864_v14 = vadd.f32 %v2848_v1, %v5672_v41  ;;  %v6135_v1 = vld [vmem:[#allocation25_spill] sm:$0xff] }
 0x882   : > { %3759 = vrsqrt.f32 %v2731_v61  ;;  %v2999_v51 = vrot.slane %v2998_v42, 2  ;;  %v3007_v6 = vadd.f32 %v3006_v33, %v5848_v22  ;;  %v2992_v20 = vrot.slane %v2991_v12, 1 }
 0x883   : > { %v3756_v3 = vpop.eup %3755  ;;  %v2970_v50 = vsel %vm2938_vm11, %v2922_v30, %v2954_v5  ;;  %vm2939_vm12 = vcmp.gt.f32.partialorder %v2923_v8, 0.0  ;;  %v2955_v9 = vmul.f32 0.2, %v2923_v8  ;;  %v2900_v57 = vadd.f32 %v5751_v60, %v2864_v14 }
 0x884   : > { %v2759_v16 = vmul.f32 %v3756_v3, %v2711_v21  ;;  %3761 = vrsqrt.f32 %v2732_v7  ;;  %v3000_v28 = vadd.f32 %v2999_v51, %v2998_v42  ;;  %v3008_v17 = vrot.slane %v3007_v6, 2  ;;  %v6129_v42 = vld [vmem:[#allocation21_spill] sm:$0xff] }
 0x885   : > { %v2971_v41 = vsel %vm2939_vm12, %v2923_v8, %v2955_v9  ;;  %v2920_v11 = vadd.f32 %v5640_v48, %v2900_v57  ;;  %3763 = vrsqrt.f32 %v2733_v26  ;;  %v2993_v37 = vadd.f32 %v2992_v20, %v2991_v12 }
 0x886   : > { %v2849_v22 = vmul.f32 %v5707_v32, %v2759_v16  ;;  %v3001_v33 = vrot.slane %v3000_v28, 1  ;;  %v3021_v55 = vsel %vm497_vm0, %v2970_v50, 0.0  ;;  %v3009_v25 = vadd.f32 %v3008_v17, %v3007_v6  ;;  %v6136_v6 = vld [vmem:[#allocation24_spill] sm:$0xff]  ;;  %v6137_v50 = vld [vmem:[#allocation18_spill] sm:$0xff] }
 0x887   : > { %vm2936_vm13 = vcmp.gt.f32.partialorder %v2920_v11, 0.0  ;;  %v2952_v60 = vmul.f32 0.2, %v2920_v11  ;;  %v3022_v39 = vsel %vm497_vm0, %v2971_v41, 0.0  ;;  %v2714_v21 = vsub.f32 %v5470_v38, %v5859_v49  ;;  %v6133_v38 = vld [vmem:[#allocation17_spill] sm:$0xff]  ;;  %v6138_v17 = vld [vmem:[#allocation22_spill] sm:$0xff] }
 0x888   : > { %v2865_v18 = vadd.f32 %v2849_v22, %v5678_v0  ;;  %v3002_v13 = vadd.f32 %v3001_v33, %v3000_v28  ;;  %v3023_v59 = vadd.f32 %v3022_v39, %v3021_v55  ;;  %v3010_v62 = vrot.slane %v3009_v25, 1  ;;  %v6132_v0 = vld [vmem:[#allocation29_spill] sm:$0xff] }
 0x889   : > { %v2968_v45 = vsel %vm2936_vm13, %v2920_v11, %v2952_v60  ;;  %v3048_v46 = vmul.f32 0.0625, %v2984_v56  ;;  %v5902_v58 = vmul.f32 0.0625, %v2993_v37  ;;  %v2890_v34 = vmul.f32 %v6131_v24, %v6130_v4  ;;  %v6139_v37 = vld [vmem:[#allocation16_spill] sm:$0xff] }
 0x88a   : > { %v3758_v53 = vpop.eup %3757  ;;  %v2901_v47 = vadd.f32 %v6129_v42, %v2865_v18  ;;  %v3024_v31 = vrot.slane %v3023_v59, 4  ;;  %v5907_v29 = vmul.f32 0.0625, %v3002_v13  ;;  %v2716_v36 = vsub.f32 %v6132_v0, %v5845_v2  ;;  %v6140_v60 = vld [vmem:[#allocation20_spill] sm:$0xff] }
 0x88b   : > { %v2717_v49 = vsub.f32 %v6133_v38, %v5853_v63  ;;  %v2715_v10 = vsub.f32 %v6134_v27, %v5861_v52  ;;  %v2762_v23 = vmul.f32 %v3758_v53, %v2714_v21  ;;  %v3012_v44 = vsel %vm497_vm0, %v2968_v45, 0.0 }
 0x88c   : > { %v3760_v19 = vpop.eup %3759  ;;  %v2921_v54 = vadd.f32 %v5640_v48, %v2901_v47  ;;  %v3011_v43 = vadd.f32 %v3010_v62, %v3009_v25  ;;  %v3025_v35 = vadd.f32 %v3024_v31, %v3023_v59  ;;  %vm3056_vm14 = vcmp.gt.f32.partialorder %v3048_v46, 0.0  ;;  %v6141_v59 = vld [vmem:[#allocation23_spill] sm:$0xff] }
 0x88d   : > { %v2852_v15 = vmul.f32 %v5707_v32, %v2762_v23  ;;  %v2763_v30 = vmul.f32 %v3760_v19, %v2715_v10  ;;  %vm3057_vm15 = vcmp.gt.f32.partialorder %v5902_v58, 0.0  ;;  %vm3058_vm2 = vcmp.gt.f32.partialorder %v5907_v29, 0.0 }
 0x88e   : > { %v3762_v2 = vpop.eup %3761  ;;  %vm2937_vm1 = vcmp.gt.f32.partialorder %v2921_v54, 0.0  ;;  %v2953_v63 = vmul.f32 0.2, %v2921_v54  ;;  %v3026_v40 = vrot.slane %v3025_v35, 2  ;;  %v3064_v26 = vmul.f32 0.2, %v3048_v46 }
 0x88f   : > { %v3764_v52 = vpop.eup %3763  ;;  %v2868_v56 = vadd.f32 %v2852_v15, %v6135_v1  ;;  %v2853_v61 = vmul.f32 %v5707_v32, %v2763_v30  ;;  %v2764_v7 = vmul.f32 %v3762_v2, %v2716_v36  ;;  %v3051_v12 = vmul.f32 0.0625, %v3011_v43 }
 0x890   : > { %v2969_v5 = vsel %vm2937_vm1, %v2921_v54, %v2953_v63  ;;  %v2765_v8 = vmul.f32 %v3764_v52, %v2717_v49  ;;  %v3027_v14 = vadd.f32 %v3026_v40, %v3025_v35  ;;  %vm3088_vm3 = vcmask 1041409  }
 0x891   : > { %v3013_v51 = vsel %vm497_vm0, %v2969_v5, 0.0  ;;  %v2904_v3 = vadd.f32 %v6136_v6, %v2868_v56  ;;  %v2869_v9 = vadd.f32 %v2853_v61, %v6137_v50  ;;  %v2854_v57 = vmul.f32 %v5707_v32, %v2764_v7 }
 0x892   : > { %vm3090_vm4 = vcmask 1042434   ;;  %v3014_v16 = vadd.f32 %v3013_v51, %v3012_v44  ;;  %v2855_v20 = vmul.f32 %v5707_v32, %v2765_v8  ;;  %v3028_v28 = vrot.slane %v3027_v14, 1 }
 0x893   : > { %v3065_v41 = vmul.f32 0.2, %v5902_v58  ;;  %vm3092_vm5 = vcmask 1043459   ;;  %v2924_v11 = vadd.f32 %v5640_v48, %v2904_v3  ;;  %v2905_v22 = vadd.f32 %v6138_v17, %v2869_v9 }
 0x894   : > { %v2870_v33 = vadd.f32 %v2854_v57, %v6139_v37  ;;  %v3066_v55 = vmul.f32 0.2, %v5907_v29  ;;  %v2871_v25 = vadd.f32 %v2855_v20, %v6140_v60  ;;  %v3015_v39 = vrot.slane %v3014_v16, 4 }
 0x895   : > { %vm3059_vm6 = vcmp.gt.f32.partialorder %v3051_v12, 0.0  ;;  %v3067_v18 = vmul.f32 0.2, %v3051_v12  ;;  %vm2940_vm7 = vcmp.gt.f32.partialorder %v2924_v11, 0.0  ;;  %v2956_v21 = vmul.f32 0.2, %v2924_v11 }
 0x896   : > { %v2925_v32 = vadd.f32 %v5640_v48, %v2905_v22  ;;  %v2906_v13 = vadd.f32 %v2890_v34, %v2870_v33  ;;  %v2907_v45 = vadd.f32 %v6141_v59, %v2871_v25  ;;  %v3016_v62 = vadd.f32 %v3015_v39, %v3014_v16 }
 0x897   : > { %v3029_v53 = vadd.f32 %v3028_v28, %v3027_v14  ;;  %v3072_v42 = vsel %vm3056_vm14, %v3048_v46, %v3064_v26  ;;  %v2972_v24 = vsel %vm2940_vm7, %v2924_v11, %v2956_v21  ;;  %v3073_v36 = vsel %vm3057_vm15, %v5902_v58, %v3065_v41 }
 0x898   : > { %vm2941_vm8 = vcmp.gt.f32.partialorder %v2925_v32, 0.0  ;;  %v2957_v47 = vmul.f32 0.2, %v2925_v32  ;;  %v2926_v4 = vadd.f32 %v5640_v48, %v2906_v13  ;;  %v2927_v31 = vadd.f32 %v5640_v48, %v2907_v45 }
 0x899   : > { %v3017_v0 = vrot.slane %v3016_v62, 2  ;;  %v3074_v34 = vsel %vm3058_vm2, %v5907_v29, %v3066_v55  ;;  %v3030_v46 = vsel %vm497_vm0, %v2972_v24, 0.0  ;;  %v3053_v44 = vmul.f32 0.0625, %v3029_v53 }
 0x89a   : > { %vm2942_vm9 = vcmp.gt.f32.partialorder %v2926_v4, 0.0  ;;  %v2958_v38 = vmul.f32 0.2, %v2926_v4  ;;  %v2973_v49 = vsel %vm2941_vm8, %v2925_v32, %v2957_v47  ;;  %vm2943_vm10 = vcmp.gt.f32.partialorder %v2927_v31, 0.0 }
 0x89b   : > { %v2959_v27 = vmul.f32 0.2, %v2927_v31  ;;  %v3018_v10 = vadd.f32 %v3017_v0, %v3016_v62  ;;  %v3031_v23 = vsel %vm497_vm0, %v2973_v49, 0.0  ;;  %v3089_v54 = vsel %vm3088_vm3, %v3073_v36, %v3072_v42 }
 0x89c   : > { %v2974_v48 = vsel %vm2942_vm9, %v2926_v4, %v2958_v38  ;;  %v3032_v19 = vadd.f32 %v3031_v23, %v3030_v46  ;;  %v3075_v35 = vsel %vm3059_vm6, %v3051_v12, %v3067_v18  ;;  %v3091_v29 = vsel %vm3090_vm4, %v3074_v34, %v3089_v54 }
 0x89d   : > { %v2975_v58 = vsel %vm2943_vm10, %v2927_v31, %v2959_v27  ;;  %v3019_v43 = vrot.slane %v3018_v10, 1  ;;  %v3039_v30 = vsel %vm497_vm0, %v2974_v48, 0.0  ;;  %v3093_v63 = vsel %vm3092_vm5, %v3075_v35, %v3091_v29 }
 0x89e   : > { %v3033_v15 = vrot.slane %v3032_v19, 4  ;;  %v3040_v2 = vsel %vm497_vm0, %v2975_v58, 0.0  ;;  %v3069_v26 = vmul.f32 0.2, %v3053_v44  ;;  %vm3094_vm11 = vcmask 1044484  }
 0x89f   : > { %v3020_v40 = vadd.f32 %v3019_v43, %v3018_v10  ;;  %v3041_v52 = vadd.f32 %v3040_v2, %v3039_v30  ;;  %vm3061_vm13 = vcmp.gt.f32.partialorder %v3053_v44, 0.0  ;;  %vm3096_vm14 = vcmask 1045509  }
 0x8a0   : > { %v3034_v1 = vadd.f32 %v3033_v15, %v3032_v19  ;;  %v3077_v3 = vsel %vm3061_vm13, %v3053_v44, %v3069_v26  ;;  %vm3098_vm1 = vcmask 1046534   ;;  %vm3100_vm3 = vcmask 1047559  }
 0x8a1   : > { %v3042_v56 = vrot.slane %v3041_v52, 4  ;;  %v3052_v61 = vmul.f32 0.0625, %v3020_v40 }
 0x8a2   : > { %v3035_v7 = vrot.slane %v3034_v1, 2 }
 0x8a3   : > { %v3043_v5 = vadd.f32 %v3042_v56, %v3041_v52  ;;  %vm3060_vm12 = vcmp.gt.f32.partialorder %v3052_v61, 0.0  ;;  %v3068_v8 = vmul.f32 0.2, %v3052_v61 }
 0x8a4   : > { %v3036_v14 = vadd.f32 %v3035_v7, %v3034_v1 }
 0x8a5   : > { %v3044_v12 = vrot.slane %v3043_v5, 2  ;;  %v3076_v51 = vsel %vm3060_vm12, %v3052_v61, %v3068_v8 }
 0x8a6   : > { %v3037_v6 = vrot.slane %v3036_v14, 1  ;;  %v3095_v50 = vsel %vm3094_vm11, %v3076_v51, %v3093_v63 }
 0x8a7   : > { %v3045_v9 = vadd.f32 %v3044_v12, %v3043_v5  ;;  %v3097_v57 = vsel %vm3096_vm14, %v3077_v3, %v3095_v50 }
 0x8a8   : > { %v3038_v16 = vadd.f32 %v3037_v6, %v3036_v14 }
 0x8a9   : > { %v3046_v20 = vrot.slane %v3045_v9, 1 }
 0x8aa   : > { %v3054_v28 = vmul.f32 0.0625, %v3038_v16 }
 0x8ab   : > { %v3047_v41 = vadd.f32 %v3046_v20, %v3045_v9 }
 0x8ac   : > { %vm3062_vm15 = vcmp.gt.f32.partialorder %v3054_v28, 0.0  ;;  %v3070_v11 = vmul.f32 0.2, %v3054_v28 }
 0x8ad   : > { %v3055_v17 = vmul.f32 0.0625, %v3047_v41 }
 0x8ae   : > { %v3078_v22 = vsel %vm3062_vm15, %v3054_v28, %v3070_v11 }
 0x8af   : > { %vm3063_vm2 = vcmp.gt.f32.partialorder %v3055_v17, 0.0  ;;  %v3071_v37 = vmul.f32 0.2, %v3055_v17  ;;  %v3099_v33 = vsel %vm3098_vm1, %v3078_v22, %v3097_v57 }
 0x8b1   : > { %v3079_v55 = vsel %vm3063_vm2, %v3055_v17, %v3071_v37 }
 0x8b2   : > { %v3101_v60 = vsel %vm3100_vm3, %v3079_v55, %v3099_v33 }
 0x8b3   : > { %3103 = vst.msk [vmem:[%s285_s20] sm:$0xff] %vm497_vm0, %v3101_v60 }
 0x8b4   : > { %3909 = shalt.err (!%p3906_p7)
}
 0x8b5   : > { %s3910_s28 = scalar_lea.hbm %s5957_s9, 128  ;;  %s3914_s12 = scalar_lea.hbm %s6006_s4, 256 }
 0x8b6   : > { %p3911_p9 = scmp.ne.s32.totalorder %s5957_s9, %s3910_s28  ;;  %p3915_p11 = scmp.lt.u32.totalorder %s5957_s9, %s6006_s4 }
 0x8b7   : > { %p3916_p2 = scmp.lt.u32.totalorder %s3914_s12, %s3910_s28  ;;  %p3918_p1 = scmp.lt.u32.totalorder %s3910_s28, %s5957_s9 }
 0x8b8   : > { %p3912_p0 = pnand %p3911_p9, %p6142_p13 }
 0x8b9   : > { %p3917_p12 = por %p3916_p2, %p3915_p11 }
 0x8ba   : > { %p3913_p8 = pneg %p3912_p0 }
 0x8bb   : > { %p3919_p6 = por %p3918_p1, %p3917_p12 }
 0x8bd   : > { %p3920_p10 = pnand %p3919_p6, %p3913_p8 }
 0x8bf   : > { %3923 = shalt.err (!%p3920_p10)
}
 0x8c0   : > { %3543 = dma.vmem_to_hbm [thread:$0]  (%p6142_p13), %s5959_s30, 128, %s5957_s9, %s3105_s19  }
 0x8c1 PF: > { %s3130_s25 = sand.u32 1, %s3962_s15   ;;  %p6143_p4 = scmp.ne.s32.totalorder %s6049_s22, 0 }
 0x8c2   : > { %p6144_p5 = scmp.ge.s32.totalorder %s3974_s18, 2  ;;  %s3131_s5 = scalar_lea.sflag [#allocation4], %s3130_s25 }
 0x8c4   : > { %p3560_p3 = pnand %p6144_p5, %p6143_p4 }
 0x8c6   : > { %3957 = dma.done.wait (!%p3560_p3), %s3131_s5, 128  }
 0x8c7   : > { %3959 = vsyncadd (!%p3560_p3), %s3131_s5, 4294967168  ;;  %p21_p7 = scmp.ge.s32.totalorder %s4126_s26, 4   ;;  %s6145_s15 = smov %s3966_s16 }
 0x8c8   : > { %s6146_s16 = smov %s3970_s17  ;;  %s6147_s17 = smov %s4142_s14 }
 0x8c9   : > { %s6148_s18 = smov %s4126_s26  ;;  %23 = sbr.rel (!%p21_p7) target bundleno = 11 (0xb), region = 106 }
 0x8d0   :  { %3136 = vsyncpa [#allocation3], 1 }
 0x8d1   :  { %3138 = vsyncpa [#allocation3 + $0x1], 1 }
 0x8d2   :  { %3139 = vsyncpa [#allocation6], 1 }
 0x8d3   :  { %3141 = vsyncpa [#allocation6 + $0x1], 1 }
 0x8d4   :  { %3142 = vsyncpa [#allocation9], 1 }
 0x8d5   :  { %3143 = vsyncpa [#allocation4], 1 }
 0x8d6   :  { %3145 = vsyncpa [#allocation4 + $0x1], 1 }

</bundles_post_ra>
